<compile_context>
chip_gen: v7x
topology: tpu7x:2x2x1
jax: 0.10.0
libtpu: 0.0.40
codegen_flags: <defaults>
</compile_context>

<pallas_src>
import functools

import jax
import jax.numpy as jnp
from jax.experimental import pallas as pl
from jax.experimental.pallas import tpu as pltpu

INPUT_DIM = 960
OUTPUT_DIM = 1280


def _round_up(x, m):
    return ((x + m - 1) // m) * m


def _cdiv(a, b):
    return -(-a // b)


def _linear_kernel(x_ref, w_ref, b_ref, o_ref, *, mxu_dtype):
    # x_ref: (tm, K) stored dtype   w_ref: (K, N) mxu_dtype
    # b_ref: (1, N) f32             o_ref: (tm, N) out dtype
    x = x_ref[...]
    if x.dtype != jnp.dtype(mxu_dtype):
        # Cast after the HBM->VMEM DMA so x crosses HBM exactly once.
        x = x.astype(mxu_dtype)
    acc = jnp.dot(x, w_ref[...], preferred_element_type=jnp.float32)
    o_ref[...] = (acc + b_ref[...]).astype(o_ref.dtype)


def embedding_projection(x, w_t, b, *, tm=512, compute_dtype=None, out_dtype=None):
    """y = x @ w_t + b over the last dim of x.

    x:   [..., K]  (any float dtype; streamed as stored, cast in-kernel)
    w_t: [K, N]    transpose of the torch Linear weight. Its *stored* dtype is
                   the MXU compute dtype -- pre-cast it once at init (see
                   init_params(dtype=...)) rather than per call.
    b:   [N]       bias (bias add is always f32 inside the kernel).
    compute_dtype: optional override; if it differs from w_t.dtype the weight
                   is cast here as a fallback (costs one extra HBM pass --
                   prefer storing the weight pre-cast).
    out_dtype:     output dtype (default: x.dtype). bf16 output cuts HBM
                   writeback ~2x on the bf16 path.
    """
    orig_shape = x.shape
    K = orig_shape[-1]
    N = w_t.shape[1]
    if out_dtype is None:
        out_dtype = x.dtype

    if compute_dtype is not None and w_t.dtype != jnp.dtype(compute_dtype):
        # Fallback only; store the weight in the compute dtype to avoid this.
        w_t = w_t.astype(compute_dtype)
    mxu_dtype = w_t.dtype

    x2 = x.reshape(-1, K)
    M = x2.shape[0]
    b2 = b.reshape(1, N).astype(jnp.float32)

    # Tile height: sublane-aligned for the MXU dtype (16 rows/vreg for bf16).
    sublane = 16 if jnp.dtype(mxu_dtype).itemsize < 4 else 8
    tm_eff = max(sublane, min(_round_up(tm, sublane), _round_up(max(M, 1), sublane)))
    num_tiles = _cdiv(max(M, 1), tm_eff)
    # v7x has 2 TensorCores: make sure medium batches produce >=2 grid steps
    # so the "parallel" M axis actually shards across both cores.
    if num_tiles == 1 and M > 128:
        tm_eff = _round_up(_cdiv(M, 2), sublane)
        num_tiles = _cdiv(M, tm_eff)

    itemsize = lambda d: jnp.dtype(d).itemsize
    w_bytes = K * N * itemsize(mxu_dtype)
    b_bytes = N * 4
    x_tile_bytes = tm_eff * K * itemsize(x2.dtype)
    o_tile_bytes = tm_eff * N * itemsize(out_dtype)
    # weight/bias single-buffered, x/out double-buffered, + compiler headroom.
    vmem_needed = w_bytes + b_bytes + 2 * (x_tile_bytes + o_tile_bytes) + (8 << 20)
    vmem_limit = int(min(max(vmem_needed, 32 << 20), 64 << 20))

    cost = pl.CostEstimate(
        flops=2 * M * K * N,
        transcendentals=0,
        bytes_accessed=(M * K * itemsize(x2.dtype) + w_bytes + b_bytes
                        + M * N * itemsize(out_dtype)),
    )

    kernel = functools.partial(_linear_kernel, mxu_dtype=mxu_dtype)

    out2 = pl.pallas_call(
        kernel,
        out_shape=jax.ShapeDtypeStruct((M, N), out_dtype),
        grid_spec=pltpu.PrefetchScalarGridSpec(
            num_scalar_prefetch=0,
            grid=(num_tiles,),
            in_specs=[
                # x tile streams over M (partial edge block masked by Pallas).
                pl.BlockSpec((tm_eff, K), lambda i: (i, 0)),
                # Weight & bias resident in VMEM, constant index -> 1 buffer.
                pl.BlockSpec((K, N), lambda i: (0, 0),
                             pipeline_mode=pl.Buffered(1)),
                pl.BlockSpec((1, N), lambda i: (0, 0),
                             pipeline_mode=pl.Buffered(1)),
            ],
            out_specs=pl.BlockSpec((tm_eff, N), lambda i: (i, 0)),
        ),
        compiler_params=pltpu.CompilerParams(
            dimension_semantics=("parallel",),
            vmem_limit_bytes=vmem_limit,
        ),
        cost_estimate=cost,
    )(x2, w_t, b2)

    return out2.reshape(*orig_shape[:-1], N)


def init_params(key, input_dim=INPUT_DIM, output_dim=OUTPUT_DIM, dtype=jnp.float32):
    # torch.nn.init.orthogonal_ on the (output_dim, input_dim) weight,
    # reproduced via QR of a Gaussian matrix with torch's sign convention.
    g = jax.random.normal(key, (output_dim, input_dim), dtype=jnp.float32)
    q, r = jnp.linalg.qr(g)                       # q: (output_dim, input_dim)
    q = q * jnp.sign(jnp.diagonal(r))[None, :]
    weight_t = q.T.astype(dtype)                  # (in, out), pre-cast ONCE here
    bias = jnp.zeros((output_dim,), dtype=jnp.float32)
    return weight_t, bias


if __name__ == "__main__":
    key = jax.random.PRNGKey(0)
    k_w, k_x = jax.random.split(key)

    # f32 weights (reference path) + a one-time bf16 copy (compute path).
    w_t, b = init_params(k_w)                     # f32 (960, 1280)
    w_bf16 = w_t.astype(jnp.bfloat16)             # stored once, reused per call

    # small batch of speaker embeddings: (batch=2, seq=4, 960) -> M=8
    x = jax.random.normal(k_x, (2, 4, INPUT_DIM), dtype=jnp.float32)
    y_ref = jnp.einsum("bsk,kn->bsn", x, w_t) + b

    # f32 path
    y = embedding_projection(x, w_t, b)
    y = jax.block_until_ready(y)
    assert y.shape == (2, 4, OUTPUT_DIM)
    assert jnp.allclose(y, y_ref, atol=1e-4, rtol=1e-4)

    # bf16-resident weight, in-kernel x cast, f32 accumulation, bf16 output
    y_bf = embedding_projection(x, w_bf16, b, out_dtype=jnp.bfloat16)
    y_bf = jax.block_until_ready(y_bf)
    assert y_bf.dtype == jnp.bfloat16
    assert jnp.allclose(y_bf.astype(jnp.float32), y_ref, atol=2e-1, rtol=2e-1)

    # non-multiple M (partial edge block, no padding): (3, 37, 960) -> M=111
    x2 = jax.random.normal(jax.random.PRNGKey(1), (3, 37, INPUT_DIM), dtype=jnp.float32)
    y2 = embedding_projection(x2, w_t, b)
    y2 = jax.block_until_ready(y2)
    y2_ref = jnp.einsum("bsk,kn->bsn", x2, w_t) + b
    assert jnp.allclose(y2, y2_ref, atol=1e-4, rtol=1e-4)

    # medium M (grid splits into >=2 steps so both v7x TensorCores are used)
    x3 = jax.random.normal(jax.random.PRNGKey(2), (2, 150, INPUT_DIM), dtype=jnp.float32)
    y3 = embedding_projection(x3, w_bf16, b)
    y3 = jax.block_until_ready(y3)
    y3_ref = jnp.einsum("bsk,kn->bsn", x3, w_t) + b
    assert jnp.allclose(y3.astype(jnp.float32), y3_ref, atol=2e-1, rtol=2e-1)

    print("KERNEL_OK")
</pallas_src>

<mosaic_0001>
module attributes {stable_mosaic.version = 11 : i64} {
  func.func @_linear_kernel(%arg0: i32, %arg1: memref<8x960xf32, #tpu.memory_space<vmem>>, %arg2: memref<960x1280xf32, #tpu.memory_space<vmem>>, %arg3: memref<1x1280xf32, #tpu.memory_space<vmem>>, %arg4: memref<8x1280xf32, #tpu.memory_space<vmem>>) attributes {dimension_semantics = [#tpu.dimension_semantics<parallel>], iteration_bounds = array<i64: 1>, scalar_prefetch = 0 : i64, scratch_operands = 0 : i64, tpu.core_type = #tpu.core_type<tc>, window_params = [{transform_indices = @transform_0, window_bounds = array<i64: 8, 960>}, {pipeline_mode = #tpu.pipeline_mode<synchronous>, transform_indices = @transform_1, window_bounds = array<i64: 960, 1280>}, {pipeline_mode = #tpu.pipeline_mode<synchronous>, transform_indices = @transform_2, window_bounds = array<i64: 1, 1280>}, {transform_indices = @transform_3, window_bounds = array<i64: 8, 1280>}]} {
    %c0 = arith.constant 0 : index
    %c0_0 = arith.constant 0 : index
    %0 = vector.load %arg1[%c0, %c0_0] : memref<8x960xf32, #tpu.memory_space<vmem>>, vector<8x960xf32>
    %c0_1 = arith.constant 0 : index
    %c0_2 = arith.constant 0 : index
    %1 = vector.load %arg2[%c0_1, %c0_2] : memref<960x1280xf32, #tpu.memory_space<vmem>>, vector<960x1280xf32>
    %cst = arith.constant dense<0.000000e+00> : vector<8x1280xf32>
    %2 = tpu.matmul %0, %1, %cst {dimension_numbers = #tpu.dot_dimension_numbers<[1], [0], [0], [1], [0, 0, 1, 1], [], []>} : vector<8x960xf32>, vector<960x1280xf32>, vector<8x1280xf32> -> vector<8x1280xf32>
    %c0_3 = arith.constant 0 : index
    %c0_4 = arith.constant 0 : index
    %3 = vector.load %arg3[%c0_3, %c0_4] : memref<1x1280xf32, #tpu.memory_space<vmem>>, vector<1x1280xf32>
    %4 = vector.broadcast %3 : vector<1x1280xf32> to vector<8x1280xf32>
    %5 = arith.addf %2, %4 : vector<8x1280xf32>
    %c0_5 = arith.constant 0 : index
    %c0_6 = arith.constant 0 : index
    %6 = vector.load %arg4[%c0_5, %c0_6] : memref<8x1280xf32, #tpu.memory_space<vmem>>, vector<8x1280xf32>
    tpu.vector_store %arg4[%c0_5, %c0_6], %5 {strides = array<i32>} : memref<8x1280xf32, #tpu.memory_space<vmem>>, vector<8x1280xf32>,
    return
  }
  func.func @transform_0(%arg0: i32) -> (i32, i32) {
    %c0_i32 = arith.constant 0 : i32
    %c0_i32_0 = arith.constant 0 : i32
    return %arg0, %c0_i32 : i32, i32
  }
  func.func @transform_1(%arg0: i32) -> (i32, i32) {
    %c0_i32 = arith.constant 0 : i32
    %c0_i32_0 = arith.constant 0 : i32
    %c0_i32_1 = arith.constant 0 : i32
    return %c0_i32, %c0_i32_0 : i32, i32
  }
  func.func @transform_2(%arg0: i32) -> (i32, i32) {
    %c0_i32 = arith.constant 0 : i32
    %c0_i32_0 = arith.constant 0 : i32
    %c0_i32_1 = arith.constant 0 : i32
    return %c0_i32, %c0_i32_0 : i32, i32
  }
  func.func @transform_3(%arg0: i32) -> (i32, i32) {
    %c0_i32 = arith.constant 0 : i32
    %c0_i32_0 = arith.constant 0 : i32
    return %arg0, %c0_i32 : i32, i32
  }
}

</mosaic_0001>

<bundles_post_ra>
// kernel: tpu_custom_call.1
= control target key start
LH: loop header
LB: loop body
LE: loop exit
PB: predicated region body
PF: predicated region fallthrough
CT: control target
= control target key end

     0   :  { %8 = vsyncpa [#allocation3], 0  ;;  %s4273_s0 = inlined_call_operand.hbm [shape: f32[8,960], index: 0, kind: input, shape index: {}]   ;;  %s4274_s1 = inlined_call_operand.hbm [shape: f32[960,1280], index: 1, kind: input, shape index: {}]   ;;  %s4275_s2 = inlined_call_operand.hbm [shape: f32[1,1280], index: 2, kind: input, shape index: {}]   ;;  %s4276_s3 = inlined_call_operand.hbm [shape: f32[8,1280], index: 3, kind: output, shape index: {}]  }
   0x1   :  { %9 = vsyncpa [#allocation6], 0 }
   0x2   :  { %10 = vsyncpa [#allocation4], 0  ;;  %s4124_s12 = smov [#allocation5]   ;;  %s4030_s16 = scalar_lea.hbm %s4274_s1, 153600 }
   0x3   :  { %s26_s13 = sshll.u32 %s4124_s12, 4  ;;  %p4031_p0 = scmp.ne.s32.totalorder %s4274_s1, %s4030_s16  ;;  %s27_s13 = int_to_ptr.vmem [resolvable:$true] %s26_s13 }
   0x4   :  { %p4034_p1 = scmp.lt.u32.totalorder %s4030_s16, %s4274_s1 }
   0x6   :  { %p4036_p2 = pnand %p4034_p1, %p4031_p0 }
   0x8   :  { %4039 = shalt.err (!%p4036_p2)
}
   0x9   :  { %s4040_s21 = scalar_lea.vmem %s27_s13, 153600  ;;  %p4045_p4 = scmp.lt.s32.totalorder %s27_s13, %s27_s13 }
   0xa   :  { %p4041_p3 = scmp.ne.s32.totalorder %s27_s13, %s4040_s21  ;;  %p4046_p5 = scmp.lt.s32.totalorder %s4040_s21, %s4040_s21 }
   0xc   :  { %p4047_p6 = por %p4046_p5, %p4045_p4 }
   0xe   :  { %p4048_p7 = pnand %p4047_p6, %p4041_p3 }
  0x10   :  { %4051 = shalt.err (!%p4048_p7)
}
  0x11   :  { %s4125_s22 = smov 1280   ;;  %s4126_s23 = smov 80  }
  0x12   :  { %32 = dma.hbm_to_vmem [thread:$0]  %s4274_s1, 153600, %s27_s13, [#allocation6], %s4125_s22, %s4125_s22, %s4126_s23  }
  0x13   :  { %s4127_s26 = smov [#allocation2]   ;;  %s4128_s28 = smov [#allocation7]  }
  0x14   :  { %s17_s27 = sshll.u32 %s4127_s26, 4  ;;  %s39_s29 = sshll.u32 %s4128_s28, 4  ;;  %s18_s27 = int_to_ptr.vmem [resolvable:$true] %s17_s27  ;;  %s40_s29 = int_to_ptr.vmem [resolvable:$true] %s39_s29 }
  0x15   :  { %s4052_s5 = scalar_lea.hbm %s4273_s0, 1024 }
  0x16   :  { %p4053_p8 = scmp.ne.s32.totalorder %s4273_s0, %s4052_s5  ;;  %p4056_p9 = scmp.lt.u32.totalorder %s4052_s5, %s4273_s0 }
  0x18   :  { %p4058_p10 = pnand %p4056_p9, %p4053_p8 }
  0x1a   :  { %4061 = shalt.err (!%p4058_p10)
}
  0x1b   :  { %s4062_s1 = scalar_lea.vmem %s18_s27, 1024  ;;  %p4067_p12 = scmp.lt.s32.totalorder %s18_s27, %s18_s27 }
  0x1c   :  { %p4063_p11 = scmp.ne.s32.totalorder %s18_s27, %s4062_s1  ;;  %p4068_p13 = scmp.lt.s32.totalorder %s4062_s1, %s4062_s1 }
  0x1e   :  { %p4069_p0 = por %p4068_p13, %p4067_p12 }
  0x20   :  { %p4070_p1 = pnand %p4069_p0, %p4063_p11 }
  0x22   :  { %4073 = shalt.err (!%p4070_p1)
}
  0x23   :  { %20 = dma.hbm_to_vmem [thread:$0]  %s4273_s0, 1024, %s18_s27, [#allocation3]  }
  0x24   :  { %s4074_s14 = scalar_lea.hbm %s4275_s2, 160 }
  0x25   :  { %p4075_p2 = scmp.ne.s32.totalorder %s4275_s2, %s4074_s14  ;;  %p4078_p3 = scmp.lt.u32.totalorder %s4074_s14, %s4275_s2 }
  0x27   :  { %p4080_p4 = pnand %p4078_p3, %p4075_p2 }
  0x29   :  { %4083 = shalt.err (!%p4080_p4)
}
  0x2a   :  { %s4084_s19 = scalar_lea.vmem %s40_s29, 160  ;;  %p4089_p6 = scmp.lt.s32.totalorder %s40_s29, %s40_s29 }
  0x2b   :  { %p4085_p5 = scmp.ne.s32.totalorder %s40_s29, %s4084_s19  ;;  %p4090_p7 = scmp.lt.s32.totalorder %s4084_s19, %s4084_s19 }
  0x2d   :  { %p4091_p8 = por %p4090_p7, %p4089_p6 }
  0x2f   :  { %p4092_p9 = pnand %p4091_p8, %p4085_p5 }
  0x31   :  { %4095 = shalt.err (!%p4092_p9)
}
  0x32   :  { %42 = dma.hbm_to_vmem [thread:$0]  %s4275_s2, 160, %s40_s29, [#allocation6]  }
  0x33   :  { %4118 = dma.done.wait [#allocation3], 1024  }
  0x34   :  { %4119 = vsyncadd [#allocation3], 4294966272 }
  0x35   :  { %4120 = dma.done.wait [#allocation6], 153760  }
  0x36   :  { %4121 = vsyncadd [#allocation6], 4294813536  ;;  %v61_v0 = vld [vmem:[#allocation5 + $0x8] sm:$0xff]  ;;  %v71_v1 = vld [vmem:[#allocation5 + $0x58] sm:$0xff]  ;;  %vm1314_vm0 = vcmask 523264   ;;  %s4129_s2 = smov [#allocation8]  }
  0x37   :  { %v701_v2 = vld [vmem:[#allocation5 + $0x1408] sm:$0xff]  ;;  %v2769_v3 = vpack.c.bf16 %v71_v1, %v61_v0  ;;  %v711_v4 = vld [vmem:[#allocation5 + $0x1458] sm:$0xff]  ;;  %v60_v5 = vld [vmem:[#allocation5] sm:$0xff]  ;;  %s2754_s21 = sshll.u32 %s4129_s2, 4  ;;  %s2755_s21 = int_to_ptr.vmem [resolvable:$true] %s2754_s21 }
  0x38   :  { %v70_v6 = vld [vmem:[#allocation5 + $0x50] sm:$0xff]  ;;  %v2897_v7 = vpack.c.bf16 %v711_v4, %v701_v2  ;;  %v700_v9 = vld [vmem:[#allocation5 + $0x1400] sm:$0xff]  ;;  %v81_v11 = vld [vmem:[#allocation5 + $0xa8] sm:$0xff]  ;;  %s4096_s22 = scalar_lea.vmem %s2755_s21, 1280  ;;  %p4101_p11 = scmp.lt.s32.totalorder %s2755_s21, %s2755_s21 }
  0x39   :  { %v2771_v8 = vpack.c.bf16 %v70_v6, %v60_v5  ;;  %v710_v10 = vld [vmem:[#allocation5 + $0x1450] sm:$0xff]  ;;  %2770 = vmatprep.subr.bf16.mxu1 %v2769_v3  ;;  %v91_v13 = vld [vmem:[#allocation5 + $0xf8] sm:$0xff]  ;;  %v721_v14 = vld [vmem:[#allocation5 + $0x14a8] sm:$0xff]  ;;  %p4097_p10 = scmp.ne.s32.totalorder %s2755_s21, %s4096_s22  ;;  %p4102_p12 = scmp.lt.s32.totalorder %s4096_s22, %s4096_s22 }
  0x3a   :  { %v2899_v12 = vpack.c.bf16 %v710_v10, %v700_v9  ;;  %v731_v15 = vld [vmem:[#allocation5 + $0x14f8] sm:$0xff]  ;;  %2898 = vmatprep.subr.bf16.mxu0 %v2897_v7  ;;  %v2773_v16 = vpack.c.bf16 %v91_v13, %v81_v11  ;;  %v80_v18 = vld [vmem:[#allocation5 + $0xa0] sm:$0xff]  ;;  %v90_v19 = vld [vmem:[#allocation5 + $0xf0] sm:$0xff] }
  0x3b   :  { %2772 = vmatpush1.bf16.msra.mxu1 %v2771_v8  ;;  %v2901_v17 = vpack.c.bf16 %v731_v15, %v721_v14  ;;  %v720_v20 = vld [vmem:[#allocation5 + $0x14a0] sm:$0xff]  ;;  %v2775_v21 = vpack.c.bf16 %v90_v19, %v80_v18  ;;  %v730_v22 = vld [vmem:[#allocation5 + $0x14f0] sm:$0xff]  ;;  %v101_v23 = vld [vmem:[#allocation5 + $0x148] sm:$0xff]  ;;  %p4103_p13 = por %p4102_p12, %p4101_p11 }
  0x3c   :  { %2900 = vmatpush1.bf16.msra.mxu0 %v2899_v12  ;;  %v111_v24 = vld [vmem:[#allocation5 + $0x198] sm:$0xff]  ;;  %2774 = vmatprep.subr.bf16.mxu1 %v2773_v16  ;;  %v2903_v25 = vpack.c.bf16 %v730_v22, %v720_v20  ;;  %v741_v27 = vld [vmem:[#allocation5 + $0x1548] sm:$0xff]  ;;  %v100_v29 = vld [vmem:[#allocation5 + $0x140] sm:$0xff] }
  0x3d   :  { %2902 = vmatprep.subr.bf16.mxu0 %v2901_v17  ;;  %v2777_v26 = vpack.c.bf16 %v111_v24, %v101_v23  ;;  %v751_v28 = vld [vmem:[#allocation5 + $0x1598] sm:$0xff]  ;;  %v110_v31 = vld [vmem:[#allocation5 + $0x190] sm:$0xff]  ;;  %v740_v32 = vld [vmem:[#allocation5 + $0x1540] sm:$0xff]  ;;  %p4104_p0 = pnand %p4103_p13, %p4097_p10 }
  0x3e   :  { %v2905_v30 = vpack.c.bf16 %v751_v28, %v741_v27  ;;  %v750_v33 = vld [vmem:[#allocation5 + $0x1590] sm:$0xff]  ;;  %v2779_v34 = vpack.c.bf16 %v110_v31, %v100_v29  ;;  %v121_v35 = vld [vmem:[#allocation5 + $0x1e8] sm:$0xff]  ;;  %v131_v36 = vld [vmem:[#allocation5 + $0x238] sm:$0xff] }
  0x3f   :  { %2776 = vmatpush1.bf16.msra.mxu1 %v2775_v21  ;;  %v761_v37 = vld [vmem:[#allocation5 + $0x15e8] sm:$0xff]  ;;  %v2907_v38 = vpack.c.bf16 %v750_v33, %v740_v32  ;;  %v2781_v39 = vpack.c.bf16 %v131_v36, %v121_v35  ;;  %v771_v40 = vld [vmem:[#allocation5 + $0x1638] sm:$0xff]  ;;  %v120_v41 = vld [vmem:[#allocation5 + $0x1e0] sm:$0xff] }
  0x40   :  { %2904 = vmatpush1.bf16.msra.mxu0 %v2903_v25  ;;  %2778 = vmatprep.subr.bf16.mxu1 %v2777_v26  ;;  %v130_v42 = vld [vmem:[#allocation5 + $0x230] sm:$0xff]  ;;  %v2909_v43 = vpack.c.bf16 %v771_v40, %v761_v37  ;;  %v760_v44 = vld [vmem:[#allocation5 + $0x15e0] sm:$0xff]  ;;  %v141_v46 = vld [vmem:[#allocation5 + $0x288] sm:$0xff] }
  0x41   :  { %2906 = vmatprep.subr.bf16.mxu0 %v2905_v30  ;;  %v770_v45 = vld [vmem:[#allocation5 + $0x1630] sm:$0xff]  ;;  %v151_v47 = vld [vmem:[#allocation5 + $0x2d8] sm:$0xff]  ;;  %v781_v48 = vld [vmem:[#allocation5 + $0x1688] sm:$0xff]  ;;  %v2783_v50 = vpack.c.bf16 %v130_v42, %v120_v41 }
  0x42   :  { %v791_v49 = vld [vmem:[#allocation5 + $0x16d8] sm:$0xff]  ;;  %v2911_v51 = vpack.c.bf16 %v770_v45, %v760_v44  ;;  %v2785_v52 = vpack.c.bf16 %v151_v47, %v141_v46  ;;  %v140_v53 = vld [vmem:[#allocation5 + $0x280] sm:$0xff]  ;;  %v150_v54 = vld [vmem:[#allocation5 + $0x2d0] sm:$0xff] }
  0x43   :  { %2780 = vmatpush1.bf16.msra.mxu1 %v2779_v34  ;;  %v780_v55 = vld [vmem:[#allocation5 + $0x1680] sm:$0xff]  ;;  %v2913_v56 = vpack.c.bf16 %v791_v49, %v781_v48  ;;  %v790_v57 = vld [vmem:[#allocation5 + $0x16d0] sm:$0xff]  ;;  %v161_v58 = vld [vmem:[#allocation5 + $0x328] sm:$0xff]  ;;  %v2787_v62 = vpack.c.bf16 %v150_v54, %v140_v53 }
  0x44   :  { %2908 = vmatpush1.bf16.msra.mxu0 %v2907_v38  ;;  %2782 = vmatprep.subr.bf16.mxu1 %v2781_v39  ;;  %v171_v59 = vld [vmem:[#allocation5 + $0x378] sm:$0xff]  ;;  %v801_v60 = vld [vmem:[#allocation5 + $0x1728] sm:$0xff]  ;;  %v2915_v63 = vpack.c.bf16 %v790_v57, %v780_v55  ;;  %v160_v1 = vld [vmem:[#allocation5 + $0x320] sm:$0xff] }
  0x45   :  { %2910 = vmatprep.subr.bf16.mxu0 %v2909_v43  ;;  %v811_v61 = vld [vmem:[#allocation5 + $0x1778] sm:$0xff]  ;;  %v2789_v0 = vpack.c.bf16 %v171_v59, %v161_v58  ;;  %v170_v2 = vld [vmem:[#allocation5 + $0x370] sm:$0xff]  ;;  %v800_v3 = vld [vmem:[#allocation5 + $0x1720] sm:$0xff] }
  0x46   :  { %v2917_v4 = vpack.c.bf16 %v811_v61, %v801_v60  ;;  %v810_v5 = vld [vmem:[#allocation5 + $0x1770] sm:$0xff]  ;;  %v181_v6 = vld [vmem:[#allocation5 + $0x3c8] sm:$0xff]  ;;  %v191_v7 = vld [vmem:[#allocation5 + $0x418] sm:$0xff]  ;;  %v2791_v10 = vpack.c.bf16 %v170_v2, %v160_v1 }
  0x47   :  { %2784 = vmatpush1.bf16.msra.mxu1 %v2783_v50  ;;  %v821_v8 = vld [vmem:[#allocation5 + $0x17c8] sm:$0xff]  ;;  %v831_v9 = vld [vmem:[#allocation5 + $0x1818] sm:$0xff]  ;;  %v2919_v11 = vpack.c.bf16 %v810_v5, %v800_v3  ;;  %v2793_v12 = vpack.c.bf16 %v191_v7, %v181_v6  ;;  %v180_v13 = vld [vmem:[#allocation5 + $0x3c0] sm:$0xff] }
  0x48   :  { %2912 = vmatpush1.bf16.msra.mxu0 %v2911_v51  ;;  %2786 = vmatprep.subr.bf16.mxu1 %v2785_v52  ;;  %v190_v14 = vld [vmem:[#allocation5 + $0x410] sm:$0xff]  ;;  %v820_v15 = vld [vmem:[#allocation5 + $0x17c0] sm:$0xff]  ;;  %v2921_v16 = vpack.c.bf16 %v831_v9, %v821_v8  ;;  %v201_v18 = vld [vmem:[#allocation5 + $0x468] sm:$0xff] }
  0x49   :  { %2914 = vmatprep.subr.bf16.mxu0 %v2913_v56  ;;  %v830_v17 = vld [vmem:[#allocation5 + $0x1810] sm:$0xff]  ;;  %v211_v19 = vld [vmem:[#allocation5 + $0x4b8] sm:$0xff]  ;;  %v841_v20 = vld [vmem:[#allocation5 + $0x1868] sm:$0xff]  ;;  %v2795_v22 = vpack.c.bf16 %v190_v14, %v180_v13 }
  0x4a   :  { %v851_v21 = vld [vmem:[#allocation5 + $0x18b8] sm:$0xff]  ;;  %v2923_v23 = vpack.c.bf16 %v830_v17, %v820_v15  ;;  %v2797_v24 = vpack.c.bf16 %v211_v19, %v201_v18  ;;  %v200_v25 = vld [vmem:[#allocation5 + $0x460] sm:$0xff]  ;;  %v210_v26 = vld [vmem:[#allocation5 + $0x4b0] sm:$0xff] }
  0x4b   :  { %2788 = vmatpush1.bf16.msra.mxu1 %v2787_v62  ;;  %v840_v27 = vld [vmem:[#allocation5 + $0x1860] sm:$0xff]  ;;  %v2925_v28 = vpack.c.bf16 %v851_v21, %v841_v20  ;;  %v850_v29 = vld [vmem:[#allocation5 + $0x18b0] sm:$0xff]  ;;  %v221_v30 = vld [vmem:[#allocation5 + $0x508] sm:$0xff]  ;;  %v2799_v34 = vpack.c.bf16 %v210_v26, %v200_v25 }
  0x4c   :  { %2916 = vmatpush1.bf16.msra.mxu0 %v2915_v63  ;;  %2790 = vmatprep.subr.bf16.mxu1 %v2789_v0  ;;  %v231_v31 = vld [vmem:[#allocation5 + $0x558] sm:$0xff]  ;;  %v861_v32 = vld [vmem:[#allocation5 + $0x1908] sm:$0xff]  ;;  %v2927_v35 = vpack.c.bf16 %v850_v29, %v840_v27  ;;  %v220_v37 = vld [vmem:[#allocation5 + $0x500] sm:$0xff] }
  0x4d   :  { %2918 = vmatprep.subr.bf16.mxu0 %v2917_v4  ;;  %v871_v33 = vld [vmem:[#allocation5 + $0x1958] sm:$0xff]  ;;  %v2801_v36 = vpack.c.bf16 %v231_v31, %v221_v30  ;;  %v230_v38 = vld [vmem:[#allocation5 + $0x550] sm:$0xff]  ;;  %v860_v39 = vld [vmem:[#allocation5 + $0x1900] sm:$0xff] }
  0x4e   :  { %v2929_v40 = vpack.c.bf16 %v871_v33, %v861_v32  ;;  %v870_v41 = vld [vmem:[#allocation5 + $0x1950] sm:$0xff]  ;;  %v241_v42 = vld [vmem:[#allocation5 + $0x5a8] sm:$0xff]  ;;  %v251_v43 = vld [vmem:[#allocation5 + $0x5f8] sm:$0xff]  ;;  %v2803_v46 = vpack.c.bf16 %v230_v38, %v220_v37 }
  0x4f   :  { %2792 = vmatpush1.bf16.msra.mxu1 %v2791_v10  ;;  %v881_v44 = vld [vmem:[#allocation5 + $0x19a8] sm:$0xff]  ;;  %v891_v45 = vld [vmem:[#allocation5 + $0x19f8] sm:$0xff]  ;;  %v2931_v47 = vpack.c.bf16 %v870_v41, %v860_v39  ;;  %v2805_v48 = vpack.c.bf16 %v251_v43, %v241_v42  ;;  %v240_v49 = vld [vmem:[#allocation5 + $0x5a0] sm:$0xff] }
  0x50   :  { %2920 = vmatpush1.bf16.msra.mxu0 %v2919_v11  ;;  %2794 = vmatprep.subr.bf16.mxu1 %v2793_v12  ;;  %v250_v50 = vld [vmem:[#allocation5 + $0x5f0] sm:$0xff]  ;;  %v880_v51 = vld [vmem:[#allocation5 + $0x19a0] sm:$0xff]  ;;  %v2933_v52 = vpack.c.bf16 %v891_v45, %v881_v44  ;;  %v261_v54 = vld [vmem:[#allocation5 + $0x648] sm:$0xff] }
  0x51   :  { %2922 = vmatprep.subr.bf16.mxu0 %v2921_v16  ;;  %v890_v53 = vld [vmem:[#allocation5 + $0x19f0] sm:$0xff]  ;;  %v271_v55 = vld [vmem:[#allocation5 + $0x698] sm:$0xff]  ;;  %v901_v56 = vld [vmem:[#allocation5 + $0x1a48] sm:$0xff]  ;;  %v2807_v58 = vpack.c.bf16 %v250_v50, %v240_v49 }
  0x52   :  { %v911_v57 = vld [vmem:[#allocation5 + $0x1a98] sm:$0xff]  ;;  %v2935_v59 = vpack.c.bf16 %v890_v53, %v880_v51  ;;  %v2809_v60 = vpack.c.bf16 %v271_v55, %v261_v54  ;;  %v260_v61 = vld [vmem:[#allocation5 + $0x640] sm:$0xff]  ;;  %v270_v62 = vld [vmem:[#allocation5 + $0x690] sm:$0xff] }
  0x53   :  { %2796 = vmatpush1.bf16.msra.mxu1 %v2795_v22  ;;  %v900_v63 = vld [vmem:[#allocation5 + $0x1a40] sm:$0xff]  ;;  %v2937_v0 = vpack.c.bf16 %v911_v57, %v901_v56  ;;  %v910_v1 = vld [vmem:[#allocation5 + $0x1a90] sm:$0xff]  ;;  %v281_v2 = vld [vmem:[#allocation5 + $0x6e8] sm:$0xff]  ;;  %v2811_v6 = vpack.c.bf16 %v270_v62, %v260_v61 }
  0x54   :  { %2924 = vmatpush1.bf16.msra.mxu0 %v2923_v23  ;;  %2798 = vmatprep.subr.bf16.mxu1 %v2797_v24  ;;  %v291_v3 = vld [vmem:[#allocation5 + $0x738] sm:$0xff]  ;;  %v921_v4 = vld [vmem:[#allocation5 + $0x1ae8] sm:$0xff]  ;;  %v280_v7 = vld [vmem:[#allocation5 + $0x6e0] sm:$0xff]  ;;  %v2939_v8 = vpack.c.bf16 %v910_v1, %v900_v63 }
  0x55   :  { %2926 = vmatprep.subr.bf16.mxu0 %v2925_v28  ;;  %v931_v5 = vld [vmem:[#allocation5 + $0x1b38] sm:$0xff]  ;;  %v2813_v9 = vpack.c.bf16 %v291_v3, %v281_v2  ;;  %v290_v10 = vld [vmem:[#allocation5 + $0x730] sm:$0xff]  ;;  %v920_v11 = vld [vmem:[#allocation5 + $0x1ae0] sm:$0xff] }
  0x56   :  { %v930_v12 = vld [vmem:[#allocation5 + $0x1b30] sm:$0xff]  ;;  %v2941_v13 = vpack.c.bf16 %v931_v5, %v921_v4  ;;  %v301_v14 = vld [vmem:[#allocation5 + $0x788] sm:$0xff]  ;;  %v311_v15 = vld [vmem:[#allocation5 + $0x7d8] sm:$0xff]  ;;  %v2815_v20 = vpack.c.bf16 %v290_v10, %v280_v7 }
  0x57   :  { %2800 = vmatpush1.bf16.msra.mxu1 %v2799_v34  ;;  %v4186_v16 = vld [vmem:[#allocation2 + $0x8] sm:$0xff]  ;;  %v951_v18 = vld [vmem:[#allocation5 + $0x1bd8] sm:$0xff]  ;;  %v2943_v21 = vpack.c.bf16 %v930_v12, %v920_v11  ;;  %v2817_v22 = vpack.c.bf16 %v311_v15, %v301_v14  ;;  %v300_v23 = vld [vmem:[#allocation5 + $0x780] sm:$0xff] }
  0x58   :  { %2928 = vmatpush1.bf16.msra.mxu0 %v2927_v35  ;;  %2802 = vmatprep.subr.bf16.mxu1 %v2801_v36  ;;  %v941_v17 = vld [vmem:[#allocation5 + $0x1b88] sm:$0xff]  ;;  %v310_v24 = vld [vmem:[#allocation5 + $0x7d0] sm:$0xff]  ;;  %v940_v25 = vld [vmem:[#allocation5 + $0x1b80] sm:$0xff] }
  0x59   :  { %2930 = vmatprep.subr.bf16.mxu0 %v2929_v40  ;;  %1382 = vmatprep.mubr.f32.mxu1 %v4186_v16  ;;  %v57_v19 = vld [vmem:[#allocation2 + $0x28] sm:$0xff]  ;;  %v2945_v26 = vpack.c.bf16 %v951_v18, %v941_v17  ;;  %v950_v27 = vld [vmem:[#allocation5 + $0x1bd0] sm:$0xff]  ;;  %v331_v29 = vld [vmem:[#allocation5 + $0x878] sm:$0xff]  ;;  %v2819_v32 = vpack.c.bf16 %v310_v24, %v300_v23 }
  0x5a   :  { %1524 = vmatprep.mubr.f32.mxu0 %v57_v19  ;;  %v321_v28 = vld [vmem:[#allocation5 + $0x828] sm:$0xff]  ;;  %v971_v31 = vld [vmem:[#allocation5 + $0x1c78] sm:$0xff]  ;;  %v2947_v33 = vpack.c.bf16 %v950_v27, %v940_v25  ;;  %v320_v35 = vld [vmem:[#allocation5 + $0x820] sm:$0xff] }
  0x5b   :  { %2804 = vmatpush1.bf16.msra.mxu1 %v2803_v46  ;;  %v961_v30 = vld [vmem:[#allocation5 + $0x1c28] sm:$0xff]  ;;  %v2821_v34 = vpack.c.bf16 %v331_v29, %v321_v28  ;;  %v330_v36 = vld [vmem:[#allocation5 + $0x870] sm:$0xff]  ;;  %v960_v37 = vld [vmem:[#allocation5 + $0x1c20] sm:$0xff] }
  0x5c   :  { %2932 = vmatpush1.bf16.msra.mxu0 %v2931_v47  ;;  %2806 = vmatprep.subr.bf16.mxu1 %v2805_v48  ;;  %v2949_v38 = vpack.c.bf16 %v971_v31, %v961_v30  ;;  %v970_v39 = vld [vmem:[#allocation5 + $0x1c70] sm:$0xff]  ;;  %v341_v40 = vld [vmem:[#allocation5 + $0x8c8] sm:$0xff]  ;;  %v351_v41 = vld [vmem:[#allocation5 + $0x918] sm:$0xff]  ;;  %v2823_v44 = vpack.c.bf16 %v330_v36, %v320_v35 }
  0x5d   :  { %2934 = vmatprep.subr.bf16.mxu0 %v2933_v52  ;;  %v981_v42 = vld [vmem:[#allocation5 + $0x1cc8] sm:$0xff]  ;;  %v991_v43 = vld [vmem:[#allocation5 + $0x1d18] sm:$0xff]  ;;  %v2951_v45 = vpack.c.bf16 %v970_v39, %v960_v37  ;;  %v2825_v46 = vpack.c.bf16 %v351_v41, %v341_v40  ;;  %v340_v47 = vld [vmem:[#allocation5 + $0x8c0] sm:$0xff] }
  0x5e   :  { %v350_v48 = vld [vmem:[#allocation5 + $0x910] sm:$0xff]  ;;  %v980_v49 = vld [vmem:[#allocation5 + $0x1cc0] sm:$0xff]  ;;  %v2953_v50 = vpack.c.bf16 %v991_v43, %v981_v42  ;;  %v361_v52 = vld [vmem:[#allocation5 + $0x968] sm:$0xff] }
  0x5f   :  { %2808 = vmatpush1.bf16.msra.mxu1 %v2807_v58  ;;  %v990_v51 = vld [vmem:[#allocation5 + $0x1d10] sm:$0xff]  ;;  %v371_v53 = vld [vmem:[#allocation5 + $0x9b8] sm:$0xff]  ;;  %v1001_v54 = vld [vmem:[#allocation5 + $0x1d68] sm:$0xff]  ;;  %v2827_v56 = vpack.c.bf16 %v350_v48, %v340_v47 }
  0x60   :  { %2936 = vmatpush1.bf16.msra.mxu0 %v2935_v59  ;;  %2810 = vmatprep.subr.bf16.mxu1 %v2809_v60  ;;  %v1011_v55 = vld [vmem:[#allocation5 + $0x1db8] sm:$0xff]  ;;  %v2955_v57 = vpack.c.bf16 %v990_v51, %v980_v49  ;;  %v2829_v58 = vpack.c.bf16 %v371_v53, %v361_v52  ;;  %v360_v59 = vld [vmem:[#allocation5 + $0x960] sm:$0xff]  ;;  %v370_v60 = vld [vmem:[#allocation5 + $0x9b0] sm:$0xff] }
  0x61   :  { %2938 = vmatprep.subr.bf16.mxu0 %v2937_v0  ;;  %v1000_v61 = vld [vmem:[#allocation5 + $0x1d60] sm:$0xff]  ;;  %v2957_v62 = vpack.c.bf16 %v1011_v55, %v1001_v54  ;;  %v1010_v63 = vld [vmem:[#allocation5 + $0x1db0] sm:$0xff]  ;;  %v381_v0 = vld [vmem:[#allocation5 + $0xa08] sm:$0xff]  ;;  %v2831_v4 = vpack.c.bf16 %v370_v60, %v360_v59 }
  0x62   :  { %v391_v1 = vld [vmem:[#allocation5 + $0xa58] sm:$0xff]  ;;  %v1021_v2 = vld [vmem:[#allocation5 + $0x1e08] sm:$0xff]  ;;  %v2959_v5 = vpack.c.bf16 %v1010_v63, %v1000_v61  ;;  %v380_v7 = vld [vmem:[#allocation5 + $0xa00] sm:$0xff] }
  0x63   :  { %2812 = vmatpush1.bf16.msra.mxu1 %v2811_v6  ;;  %v1031_v3 = vld [vmem:[#allocation5 + $0x1e58] sm:$0xff]  ;;  %v2833_v6 = vpack.c.bf16 %v391_v1, %v381_v0  ;;  %v1030_v11 = vld [vmem:[#allocation5 + $0x1e50] sm:$0xff]  ;;  %v401_v12 = vld [vmem:[#allocation5 + $0xaa8] sm:$0xff] }
  0x64   :  { %2940 = vmatpush1.bf16.msra.mxu0 %v2939_v8  ;;  %2814 = vmatprep.subr.bf16.mxu1 %v2813_v9  ;;  %v390_v8 = vld [vmem:[#allocation5 + $0xa50] sm:$0xff]  ;;  %v1020_v9 = vld [vmem:[#allocation5 + $0x1e00] sm:$0xff]  ;;  %v2961_v10 = vpack.c.bf16 %v1031_v3, %v1021_v2  ;;  %v1041_v14 = vld [vmem:[#allocation5 + $0x1ea8] sm:$0xff] }
  0x65   :  { %2942 = vmatprep.subr.bf16.mxu0 %v2941_v13  ;;  %v411_v13 = vld [vmem:[#allocation5 + $0xaf8] sm:$0xff]  ;;  %v4189_v17 = vld [vmem:[#allocation2] sm:$0xff]  ;;  %v2835_v18 = vpack.c.bf16 %v390_v8, %v380_v7  ;;  %v410_v23 = vld [vmem:[#allocation5 + $0xaf0] sm:$0xff] }
  0x66   :  { %v1051_v15 = vld [vmem:[#allocation5 + $0x1ef8] sm:$0xff]  ;;  %v56_v19 = vld [vmem:[#allocation2 + $0x20] sm:$0xff]  ;;  %v421_v27 = vld [vmem:[#allocation5 + $0xb48] sm:$0xff] }
  0x67   :  { %2816 = vmatpush1.bf16.msra.mxu1 %v2815_v20  ;;  %v2963_v20 = vpack.c.bf16 %v1030_v11, %v1020_v9  ;;  %v1040_v24 = vld [vmem:[#allocation5 + $0x1ea0] sm:$0xff]  ;;  %v2965_v25 = vpack.c.bf16 %v1051_v15, %v1041_v14  ;;  %v431_v28 = vld [vmem:[#allocation5 + $0xb98] sm:$0xff]  ;;  %v1061_v29 = vld [vmem:[#allocation5 + $0x1f48] sm:$0xff] }
  0x68   :  { %2944 = vmatpush1.bf16.msra.mxu0 %v2943_v21  ;;  %2818 = vmatprep.subr.bf16.mxu1 %v2817_v22  ;;  %v2837_v21 = vpack.c.bf16 %v411_v13, %v401_v12  ;;  %v400_v22 = vld [vmem:[#allocation5 + $0xaa0] sm:$0xff]  ;;  %v1071_v30 = vld [vmem:[#allocation5 + $0x1f98] sm:$0xff]  ;;  %v430_v35 = vld [vmem:[#allocation5 + $0xb90] sm:$0xff] }
  0x69   :  { %2946 = vmatprep.subr.bf16.mxu0 %v2945_v26  ;;  %v1050_v26 = vld [vmem:[#allocation5 + $0x1ef0] sm:$0xff]  ;;  %v2839_v31 = vpack.c.bf16 %v410_v23, %v400_v22  ;;  %v1060_v36 = vld [vmem:[#allocation5 + $0x1f40] sm:$0xff]  ;;  %v2969_v37 = vpack.c.bf16 %v1071_v30, %v1061_v29  ;;  %v441_v39 = vld [vmem:[#allocation5 + $0xbe8] sm:$0xff] }
  0x6a   :  { %v451_v40 = vld [vmem:[#allocation5 + $0xc38] sm:$0xff]  ;;  %v1081_v41 = vld [vmem:[#allocation5 + $0x1fe8] sm:$0xff]  ;;  %v450_v47 = vld [vmem:[#allocation5 + $0xc30] sm:$0xff] }
  0x6b   :  { %2820 = vmatpush1.bf16.msra.mxu1 %v2819_v32  ;;  %v2967_v32 = vpack.c.bf16 %v1050_v26, %v1040_v24  ;;  %v1091_v42 = vld [vmem:[#allocation5 + $0x2038] sm:$0xff]  ;;  %v1080_v48 = vld [vmem:[#allocation5 + $0x1fe0] sm:$0xff]  ;;  %v461_v51 = vld [vmem:[#allocation5 + $0xc88] sm:$0xff] }
  0x6c   :  { %2948 = vmatpush1.bf16.msra.mxu0 %v2947_v33  ;;  %2822 = vmatprep.subr.bf16.mxu1 %v2821_v34  ;;  %v2841_v33 = vpack.c.bf16 %v431_v28, %v421_v27  ;;  %v420_v34 = vld [vmem:[#allocation5 + $0xb40] sm:$0xff]  ;;  %v2973_v49 = vpack.c.bf16 %v1091_v42, %v1081_v41  ;;  %v471_v52 = vld [vmem:[#allocation5 + $0xcd8] sm:$0xff]  ;;  %v1101_v53 = vld [vmem:[#allocation5 + $0x2088] sm:$0xff] }
  0x6d   :  { %2950 = vmatprep.subr.bf16.mxu0 %v2949_v38  ;;  %v1070_v38 = vld [vmem:[#allocation5 + $0x1f90] sm:$0xff]  ;;  %v2843_v43 = vpack.c.bf16 %v430_v35, %v420_v34  ;;  %v1111_v54 = vld [vmem:[#allocation5 + $0x20d8] sm:$0xff]  ;;  %v460_v59 = vld [vmem:[#allocation5 + $0xc80] sm:$0xff] }
  0x6e   :  { %v470_v60 = vld [vmem:[#allocation5 + $0xcd0] sm:$0xff]  ;;  %v1100_v61 = vld [vmem:[#allocation5 + $0x2080] sm:$0xff]  ;;  %v481_v0 = vld [vmem:[#allocation5 + $0xd28] sm:$0xff] }
  0x6f   :  { %2824 = vmatpush1.bf16.msra.mxu1 %v2823_v44  ;;  %v2971_v44 = vpack.c.bf16 %v1070_v38, %v1060_v36  ;;  %v1110_v63 = vld [vmem:[#allocation5 + $0x20d0] sm:$0xff]  ;;  %v491_v1 = vld [vmem:[#allocation5 + $0xd78] sm:$0xff]  ;;  %v1121_v2 = vld [vmem:[#allocation5 + $0x2128] sm:$0xff] }
  0x70   :  { %2952 = vmatpush1.bf16.msra.mxu0 %v2951_v45  ;;  %2826 = vmatprep.subr.bf16.mxu1 %v2825_v46  ;;  %v2845_v45 = vpack.c.bf16 %v451_v40, %v441_v39  ;;  %v440_v46 = vld [vmem:[#allocation5 + $0xbe0] sm:$0xff]  ;;  %v1131_v3 = vld [vmem:[#allocation5 + $0x2178] sm:$0xff]  ;;  %v490_v8 = vld [vmem:[#allocation5 + $0xd70] sm:$0xff] }
  0x71   :  { %2954 = vmatprep.subr.bf16.mxu0 %v2953_v50  ;;  %v1090_v50 = vld [vmem:[#allocation5 + $0x2030] sm:$0xff]  ;;  %v2847_v55 = vpack.c.bf16 %v450_v47, %v440_v46  ;;  %v480_v7 = vld [vmem:[#allocation5 + $0xd20] sm:$0xff]  ;;  %v501_v12 = vld [vmem:[#allocation5 + $0xdc8] sm:$0xff] }
  0x72   :  { %v1120_v9 = vld [vmem:[#allocation5 + $0x2120] sm:$0xff]  ;;  %v1130_v11 = vld [vmem:[#allocation5 + $0x2170] sm:$0xff]  ;;  %v511_v13 = vld [vmem:[#allocation5 + $0xe18] sm:$0xff] }
  0x73   :  { %2828 = vmatpush1.bf16.msra.mxu1 %v2827_v56  ;;  %v59_v56 = vld [vmem:[#allocation2 + $0x38] sm:$0xff]  ;;  %v1141_v14 = vld [vmem:[#allocation5 + $0x21c8] sm:$0xff]  ;;  %v510_v22 = vld [vmem:[#allocation5 + $0xe10] sm:$0xff] }
  0x74   :  { %2956 = vmatpush1.bf16.msra.mxu0 %v2955_v57  ;;  %2830 = vmatprep.subr.bf16.mxu1 %v2829_v58  ;;  %v2975_v57 = vpack.c.bf16 %v1090_v50, %v1080_v48  ;;  %v2849_v58 = vpack.c.bf16 %v471_v52, %v461_v51  ;;  %v1151_v15 = vld [vmem:[#allocation5 + $0x2218] sm:$0xff]  ;;  %v1140_v23 = vld [vmem:[#allocation5 + $0x21c0] sm:$0xff]  ;;  %v521_v26 = vld [vmem:[#allocation5 + $0xe68] sm:$0xff] }
  0x75   :  { %2958 = vmatprep.subr.bf16.mxu0 %v2957_v62  ;;  %v2977_v62 = vpack.c.bf16 %v1111_v54, %v1101_v53  ;;  %v2985_v24 = vpack.c.bf16 %v1151_v15, %v1141_v14  ;;  %v531_v27 = vld [vmem:[#allocation5 + $0xeb8] sm:$0xff]  ;;  %v1161_v28 = vld [vmem:[#allocation5 + $0x2268] sm:$0xff]  ;;  %v520_v34 = vld [vmem:[#allocation5 + $0xe60] sm:$0xff] }
  0x76   :  { %v1171_v29 = vld [vmem:[#allocation5 + $0x22b8] sm:$0xff]  ;;  %v530_v35 = vld [vmem:[#allocation5 + $0xeb0] sm:$0xff]  ;;  %v1160_v36 = vld [vmem:[#allocation5 + $0x2260] sm:$0xff] }
  0x77   :  { %2832 = vmatpush1.bf16.msra.mxu1 %v2831_v4  ;;  %v2851_v4 = vpack.c.bf16 %v470_v60, %v460_v59  ;;  %v4193_v30 = vld [vmem:[#allocation2 + $0x18] sm:$0xff]  ;;  %v1170_v38 = vld [vmem:[#allocation5 + $0x22b0] sm:$0xff]  ;;  %v541_v39 = vld [vmem:[#allocation5 + $0xf08] sm:$0xff] }
  0x78   :  { %2960 = vmatpush1.bf16.msra.mxu0 %v2959_v5  ;;  %2834 = vmatprep.subr.bf16.mxu1 %v2833_v6  ;;  %v2979_v5 = vpack.c.bf16 %v1110_v63, %v1100_v61  ;;  %v2853_v6 = vpack.c.bf16 %v491_v1, %v481_v0  ;;  %v551_v40 = vld [vmem:[#allocation5 + $0xf58] sm:$0xff]  ;;  %v1181_v41 = vld [vmem:[#allocation5 + $0x2308] sm:$0xff]  ;;  %v540_v46 = vld [vmem:[#allocation5 + $0xf00] sm:$0xff] }
  0x79   :  { %2962 = vmatprep.subr.bf16.mxu0 %v2961_v10  ;;  %v2981_v10 = vpack.c.bf16 %v1131_v3, %v1121_v2  ;;  %v1191_v42 = vld [vmem:[#allocation5 + $0x2358] sm:$0xff]  ;;  %v550_v47 = vld [vmem:[#allocation5 + $0xf50] sm:$0xff]  ;;  %v1180_v48 = vld [vmem:[#allocation5 + $0x2300] sm:$0xff] }
  0x7a   :  { %1383 = vmatmul.mubr.f32.vlgmr.msra.gmra.mrb[0].mxu1 %v4189_v17  ;;  %v1190_v50 = vld [vmem:[#allocation5 + $0x2350] sm:$0xff]  ;;  %v561_v51 = vld [vmem:[#allocation5 + $0xfa8] sm:$0xff]  ;;  %v571_v52 = vld [vmem:[#allocation5 + $0xff8] sm:$0xff] }
  0x7b   :  { %2836 = vmatpush1.bf16.msra.mxu1 %v2835_v18  ;;  %1525 = vmatmul.mubr.f32.vlgmr.msra.gmra.mrb[0].mxu0 %v56_v19  ;;  %v2855_v18 = vpack.c.bf16 %v490_v8, %v480_v7  ;;  %v2983_v19 = vpack.c.bf16 %v1130_v11, %v1120_v9  ;;  %v1201_v53 = vld [vmem:[#allocation5 + $0x23a8] sm:$0xff]  ;;  %v1211_v54 = vld [vmem:[#allocation5 + $0x23f8] sm:$0xff]  ;;  %v570_v59 = vld [vmem:[#allocation5 + $0xff0] sm:$0xff] }
  0x7c   :  { %2964 = vmatpush1.bf16.msra.mxu0 %v2963_v20  ;;  %2838 = vmatprep.subr.bf16.mxu1 %v2837_v21  ;;  %v2857_v20 = vpack.c.bf16 %v511_v13, %v501_v12  ;;  %v500_v21 = vld [vmem:[#allocation5 + $0xdc0] sm:$0xff]  ;;  %v2997_v61 = vpack.c.bf16 %v1211_v54, %v1201_v53  ;;  %v581_v63 = vld [vmem:[#allocation5 + $0x1048] sm:$0xff]  ;;  %v591_v0 = vld [vmem:[#allocation5 + $0x1098] sm:$0xff] }
  0x7d   :  { %2966 = vmatprep.subr.bf16.mxu0 %v2965_v25  ;;  %2764 = vmatprep.mubr.msk.f32.mxu0 %vm1314_vm0, %v59_v56  ;;  %v1150_v25 = vld [vmem:[#allocation5 + $0x2210] sm:$0xff]  ;;  %v2995_v56 = vpack.c.bf16 %v1190_v50, %v1180_v48  ;;  %v1200_v60 = vld [vmem:[#allocation5 + $0x23a0] sm:$0xff]  ;;  %v1221_v1 = vld [vmem:[#allocation5 + $0x2448] sm:$0xff] }
  0x7e   :  { %1453 = vmatprep.mubr.f32.mxu1 %v4193_v30  ;;  %v1231_v2 = vld [vmem:[#allocation5 + $0x2498] sm:$0xff]  ;;  %v590_v7 = vld [vmem:[#allocation5 + $0x1090] sm:$0xff]  ;;  %v1220_v8 = vld [vmem:[#allocation5 + $0x2440] sm:$0xff] }
  0x7f   :  { %2840 = vmatpush1.bf16.msra.mxu1 %v2839_v31  ;;  %v2859_v31 = vpack.c.bf16 %v510_v22, %v500_v21  ;;  %v3001_v9 = vpack.c.bf16 %v1231_v2, %v1221_v1  ;;  %v601_v11 = vld [vmem:[#allocation5 + $0x10e8] sm:$0xff]  ;;  %v611_v12 = vld [vmem:[#allocation5 + $0x1138] sm:$0xff]  ;;  %v610_v21 = vld [vmem:[#allocation5 + $0x1130] sm:$0xff] }
  0x80   :  { %2968 = vmatpush1.bf16.msra.mxu0 %v2967_v32  ;;  %2842 = vmatprep.subr.bf16.mxu1 %v2841_v33  ;;  %v2987_v32 = vpack.c.bf16 %v1150_v25, %v1140_v23  ;;  %v2861_v33 = vpack.c.bf16 %v531_v27, %v521_v26  ;;  %v1241_v13 = vld [vmem:[#allocation5 + $0x24e8] sm:$0xff]  ;;  %v1251_v14 = vld [vmem:[#allocation5 + $0x2538] sm:$0xff]  ;;  %v1240_v22 = vld [vmem:[#allocation5 + $0x24e0] sm:$0xff] }
  0x81   :  { %2970 = vmatprep.subr.bf16.mxu0 %v2969_v37  ;;  %v2989_v37 = vpack.c.bf16 %v1171_v29, %v1161_v28  ;;  %v3005_v23 = vpack.c.bf16 %v1251_v14, %v1241_v13  ;;  %v621_v25 = vld [vmem:[#allocation5 + $0x1188] sm:$0xff]  ;;  %v631_v26 = vld [vmem:[#allocation5 + $0x11d8] sm:$0xff]  ;;  %v84_v48 = vld [vmem:[#allocation5 + $0xc0] sm:$0xff] }
  0x82   :  { %v65_v27 = vld [vmem:[#allocation5 + $0x28] sm:$0xff]  ;;  %v75_v28 = vld [vmem:[#allocation5 + $0x78] sm:$0xff]  ;;  %v94_v50 = vld [vmem:[#allocation5 + $0x110] sm:$0xff] }
  0x83   :  { %2844 = vmatpush1.bf16.msra.mxu1 %v2843_v43  ;;  %v2863_v43 = vpack.c.bf16 %v530_v35, %v520_v34  ;;  %v630_v34 = vld [vmem:[#allocation5 + $0x11d0] sm:$0xff]  ;;  %v64_v35 = vld [vmem:[#allocation5 + $0x20] sm:$0xff]  ;;  %v105_v53 = vld [vmem:[#allocation5 + $0x168] sm:$0xff] }
  0x84   :  { %2972 = vmatpush1.bf16.msra.mxu0 %v2971_v44  ;;  %2846 = vmatprep.subr.bf16.mxu1 %v2845_v45  ;;  %v2991_v44 = vpack.c.bf16 %v1170_v38, %v1160_v36  ;;  %v2865_v45 = vpack.c.bf16 %v551_v40, %v541_v39  ;;  %v3249_v36 = vpack.c.bf16 %v75_v28, %v65_v27  ;;  %v641_v38 = vld [vmem:[#allocation5 + $0x1228] sm:$0xff]  ;;  %v651_v39 = vld [vmem:[#allocation5 + $0x1278] sm:$0xff] }
  0x85   :  { %2974 = vmatprep.subr.bf16.mxu0 %v2973_v49  ;;  %v2993_v49 = vpack.c.bf16 %v1191_v42, %v1181_v41  ;;  %v85_v40 = vld [vmem:[#allocation5 + $0xc8] sm:$0xff]  ;;  %v95_v41 = vld [vmem:[#allocation5 + $0x118] sm:$0xff]  ;;  %v58_v42 = vld [vmem:[#allocation2 + $0x30] sm:$0xff] }
  0x86   :  { %v115_v54 = vld [vmem:[#allocation5 + $0x1b8] sm:$0xff]  ;;  %v125_v1 = vld [vmem:[#allocation5 + $0x208] sm:$0xff] }
  0x87   :  { %2848 = vmatpush1.bf16.msra.mxu1 %v2847_v55  ;;  %v2867_v55 = vpack.c.bf16 %v550_v47, %v540_v46  ;;  %v640_v46 = vld [vmem:[#allocation5 + $0x1220] sm:$0xff]  ;;  %v650_v47 = vld [vmem:[#allocation5 + $0x1270] sm:$0xff]  ;;  %v135_v2 = vld [vmem:[#allocation5 + $0x258] sm:$0xff] }
  0x88   :  { %2976 = vmatpush1.bf16.msra.mxu0 %v2975_v57  ;;  %2850 = vmatprep.subr.bf16.mxu1 %v2849_v58  ;;  %v2869_v57 = vpack.c.bf16 %v571_v52, %v561_v51  ;;  %v560_v58 = vld [vmem:[#allocation5 + $0xfa0] sm:$0xff]  ;;  %v661_v51 = vld [vmem:[#allocation5 + $0x12c8] sm:$0xff]  ;;  %v671_v52 = vld [vmem:[#allocation5 + $0x1318] sm:$0xff] }
  0x89   :  { %2978 = vmatprep.subr.bf16.mxu0 %v2977_v62  ;;  %v1210_v62 = vld [vmem:[#allocation5 + $0x23f0] sm:$0xff]  ;;  %v2871_v3 = vpack.c.bf16 %v570_v59, %v560_v58  ;;  %v660_v58 = vld [vmem:[#allocation5 + $0x12c0] sm:$0xff]  ;;  %v145_v13 = vld [vmem:[#allocation5 + $0x2a8] sm:$0xff] }
  0x8a   :  { %v670_v59 = vld [vmem:[#allocation5 + $0x1310] sm:$0xff]  ;;  %v155_v14 = vld [vmem:[#allocation5 + $0x2f8] sm:$0xff]  ;;  %v165_v27 = vld [vmem:[#allocation5 + $0x348] sm:$0xff] }
  0x8b   :  { %2852 = vmatpush1.bf16.msra.mxu1 %v2851_v4  ;;  %v2999_v4 = vpack.c.bf16 %v1210_v62, %v1200_v60  ;;  %v104_v60 = vld [vmem:[#allocation5 + $0x160] sm:$0xff]  ;;  %v114_v62 = vld [vmem:[#allocation5 + $0x1b0] sm:$0xff]  ;;  %v175_v28 = vld [vmem:[#allocation5 + $0x398] sm:$0xff] }
  0x8c   :  { %2980 = vmatpush1.bf16.msra.mxu0 %v2979_v5  ;;  %2854 = vmatprep.subr.bf16.mxu1 %v2853_v6  ;;  %v2873_v5 = vpack.c.bf16 %v591_v0, %v581_v63  ;;  %v580_v6 = vld [vmem:[#allocation5 + $0x1040] sm:$0xff]  ;;  %v681_v63 = vld [vmem:[#allocation5 + $0x1368] sm:$0xff]  ;;  %v691_v0 = vld [vmem:[#allocation5 + $0x13b8] sm:$0xff] }
  0x8d   :  { %2982 = vmatprep.subr.bf16.mxu0 %v2981_v10  ;;  %v1230_v10 = vld [vmem:[#allocation5 + $0x2490] sm:$0xff]  ;;  %v2875_v15 = vpack.c.bf16 %v590_v7, %v580_v6  ;;  %v680_v6 = vld [vmem:[#allocation5 + $0x1360] sm:$0xff] }
  0x8e   :  { %v690_v7 = vld [vmem:[#allocation5 + $0x13b0] sm:$0xff] }
  0x8f   :  { %2856 = vmatpush1.bf16.msra.mxu1 %v2855_v18  ;;  %v3003_v18 = vpack.c.bf16 %v1230_v10, %v1220_v8  ;;  %v124_v8 = vld [vmem:[#allocation5 + $0x200] sm:$0xff]  ;;  %v134_v10 = vld [vmem:[#allocation5 + $0x250] sm:$0xff] }
  0x90   :  { %2984 = vmatpush1.bf16.msra.mxu0 %v2983_v19  ;;  %2858 = vmatprep.subr.bf16.mxu1 %v2857_v20  ;;  %v2877_v19 = vpack.c.bf16 %v611_v12, %v601_v11  ;;  %v600_v20 = vld [vmem:[#allocation5 + $0x10e0] sm:$0xff]  ;;  %v63_v11 = vld [vmem:[#allocation5 + $0x18] sm:$0xff]  ;;  %v73_v12 = vld [vmem:[#allocation5 + $0x68] sm:$0xff] }
  0x91   :  { %2986 = vmatprep.subr.bf16.mxu0 %v2985_v24  ;;  %v1250_v24 = vld [vmem:[#allocation5 + $0x2530] sm:$0xff]  ;;  %v2879_v29 = vpack.c.bf16 %v610_v21, %v600_v20  ;;  %v72_v21 = vld [vmem:[#allocation5 + $0x60] sm:$0xff] }
  0x92   :  { %v62_v20 = vld [vmem:[#allocation5 + $0x10] sm:$0xff] }
  0x93   :  { %2860 = vmatpush1.bf16.msra.mxu1 %v2859_v31  ;;  %v3007_v31 = vpack.c.bf16 %v1250_v24, %v1240_v22  ;;  %v144_v22 = vld [vmem:[#allocation5 + $0x2a0] sm:$0xff]  ;;  %v154_v24 = vld [vmem:[#allocation5 + $0x2f0] sm:$0xff] }
  0x94   :  { %2988 = vmatpush1.bf16.msra.mxu0 %v2987_v32  ;;  %2862 = vmatprep.subr.bf16.mxu1 %v2861_v33  ;;  %v2881_v32 = vpack.c.bf16 %v631_v26, %v621_v25  ;;  %v620_v33 = vld [vmem:[#allocation5 + $0x1180] sm:$0xff]  ;;  %v83_v25 = vld [vmem:[#allocation5 + $0xb8] sm:$0xff]  ;;  %v93_v26 = vld [vmem:[#allocation5 + $0x108] sm:$0xff] }
  0x95   :  { %2990 = vmatprep.subr.bf16.mxu0 %v2989_v37  ;;  %v74_v37 = vld [vmem:[#allocation5 + $0x70] sm:$0xff] }
  0x97   :  { %2864 = vmatpush1.bf16.msra.mxu1 %v2863_v43  ;;  %v2883_v43 = vpack.c.bf16 %v630_v34, %v620_v33  ;;  %v3013_v33 = vpack.c.bf16 %v93_v26, %v83_v25  ;;  %v82_v34 = vld [vmem:[#allocation5 + $0xb0] sm:$0xff]  ;;  %v193_v25 = vld [vmem:[#allocation5 + $0x428] sm:$0xff] }
  0x98   :  { %2992 = vmatpush1.bf16.msra.mxu0 %v2991_v44  ;;  %2866 = vmatprep.subr.bf16.mxu1 %v2865_v45  ;;  %v3251_v44 = vpack.c.bf16 %v74_v37, %v64_v35  ;;  %v2885_v45 = vpack.c.bf16 %v651_v39, %v641_v38  ;;  %v92_v35 = vld [vmem:[#allocation5 + $0x100] sm:$0xff]  ;;  %v3269_v37 = vpack.c.bf16 %v175_v28, %v165_v27  ;;  %v174_v38 = vld [vmem:[#allocation5 + $0x390] sm:$0xff]  ;;  %v103_v39 = vld [vmem:[#allocation5 + $0x158] sm:$0xff] }
  0x99   :  { %2994 = vmatprep.subr.bf16.mxu0 %v2993_v49  ;;  %v3253_v49 = vpack.c.bf16 %v95_v41, %v85_v40  ;;  %v113_v40 = vld [vmem:[#allocation5 + $0x1a8] sm:$0xff]  ;;  %v275_v27 = vld [vmem:[#allocation5 + $0x6b8] sm:$0xff] }
  0x9a   :  { %v185_v41 = vld [vmem:[#allocation5 + $0x3e8] sm:$0xff] }
  0x9b   :  { %2868 = vmatpush1.bf16.msra.mxu1 %v2867_v55  ;;  %v2887_v55 = vpack.c.bf16 %v650_v47, %v640_v46  ;;  %v102_v46 = vld [vmem:[#allocation5 + $0x150] sm:$0xff]  ;;  %v112_v47 = vld [vmem:[#allocation5 + $0x1a0] sm:$0xff]  ;;  %v265_v26 = vld [vmem:[#allocation5 + $0x668] sm:$0xff] }
  0x9c   :  { %2996 = vmatpush1.bf16.msra.mxu0 %v2995_v56  ;;  %2870 = vmatprep.subr.bf16.mxu1 %v2869_v57  ;;  %v3255_v56 = vpack.c.bf16 %v94_v50, %v84_v48  ;;  %v2889_v57 = vpack.c.bf16 %v671_v52, %v661_v51  ;;  %v184_v48 = vld [vmem:[#allocation5 + $0x3e0] sm:$0xff]  ;;  %v194_v50 = vld [vmem:[#allocation5 + $0x430] sm:$0xff]  ;;  %v123_v51 = vld [vmem:[#allocation5 + $0x1f8] sm:$0xff] }
  0x9d   :  { %2998 = vmatprep.subr.bf16.mxu0 %v2997_v61  ;;  %v3257_v61 = vpack.c.bf16 %v115_v54, %v105_v53  ;;  %v133_v52 = vld [vmem:[#allocation5 + $0x248] sm:$0xff]  ;;  %v215_v54 = vld [vmem:[#allocation5 + $0x4d8] sm:$0xff] }
  0x9e   :  { %v205_v53 = vld [vmem:[#allocation5 + $0x488] sm:$0xff] }
  0x9f   :  { %2872 = vmatpush1.bf16.msra.mxu1 %v2871_v3  ;;  %v2891_v3 = vpack.c.bf16 %v670_v59, %v660_v58  ;;  %v132_v58 = vld [vmem:[#allocation5 + $0x240] sm:$0xff] }
  0xa0   :  { %3000 = vmatpush1.bf16.msra.mxu0 %v2999_v4  ;;  %2874 = vmatprep.subr.bf16.mxu1 %v2873_v5  ;;  %v3259_v4 = vpack.c.bf16 %v114_v62, %v104_v60  ;;  %v2893_v5 = vpack.c.bf16 %v691_v0, %v681_v63  ;;  %v204_v59 = vld [vmem:[#allocation5 + $0x480] sm:$0xff]  ;;  %v3277_v60 = vpack.c.bf16 %v215_v54, %v205_v53  ;;  %v143_v62 = vld [vmem:[#allocation5 + $0x298] sm:$0xff]  ;;  %v153_v63 = vld [vmem:[#allocation5 + $0x2e8] sm:$0xff] }
  0xa1   :  { %3002 = vmatprep.subr.bf16.mxu0 %v3001_v9  ;;  %v3261_v9 = vpack.c.bf16 %v135_v2, %v125_v1  ;;  %v225_v0 = vld [vmem:[#allocation5 + $0x528] sm:$0xff]  ;;  %v235_v1 = vld [vmem:[#allocation5 + $0x578] sm:$0xff] }
  0xa2   :  { %v315_v53 = vld [vmem:[#allocation5 + $0x7f8] sm:$0xff] }
  0xa3   :  { %2876 = vmatpush1.bf16.msra.mxu1 %v2875_v15  ;;  %v2895_v15 = vpack.c.bf16 %v690_v7, %v680_v6  ;;  %v152_v6 = vld [vmem:[#allocation5 + $0x2e0] sm:$0xff] }
  0xa4   :  { %3004 = vmatpush1.bf16.msra.mxu0 %v3003_v18  ;;  %2878 = vmatprep.subr.bf16.mxu1 %v2877_v19  ;;  %v3263_v18 = vpack.c.bf16 %v134_v10, %v124_v8  ;;  %v3009_v19 = vpack.c.bf16 %v73_v12, %v63_v11  ;;  %v224_v7 = vld [vmem:[#allocation5 + $0x520] sm:$0xff]  ;;  %v3281_v8 = vpack.c.bf16 %v235_v1, %v225_v0  ;;  %v163_v10 = vld [vmem:[#allocation5 + $0x338] sm:$0xff]  ;;  %v173_v11 = vld [vmem:[#allocation5 + $0x388] sm:$0xff] }
  0xa5   :  { %3006 = vmatprep.subr.bf16.mxu0 %v3005_v23  ;;  %v3265_v23 = vpack.c.bf16 %v155_v14, %v145_v13  ;;  %v245_v12 = vld [vmem:[#allocation5 + $0x5c8] sm:$0xff]  ;;  %v255_v13 = vld [vmem:[#allocation5 + $0x618] sm:$0xff] }
  0xa6   :  { %v335_v0 = vld [vmem:[#allocation5 + $0x898] sm:$0xff] }
  0xa7   :  { %2880 = vmatpush1.bf16.msra.mxu1 %v2879_v29  ;;  %v4197_v29 = vld [vmem:[#allocation2 + $0x10] sm:$0xff] }
  0xa8   :  { %3008 = vmatpush1.bf16.msra.mxu0 %v3007_v31  ;;  %2882 = vmatprep.subr.bf16.mxu1 %v2881_v32  ;;  %v3011_v31 = vpack.c.bf16 %v72_v21, %v62_v20  ;;  %v3267_v32 = vpack.c.bf16 %v154_v24, %v144_v22  ;;  %v172_v20 = vld [vmem:[#allocation5 + $0x380] sm:$0xff]  ;;  %v3285_v22 = vpack.c.bf16 %v255_v13, %v245_v12  ;;  %v183_v24 = vld [vmem:[#allocation5 + $0x3d8] sm:$0xff] }
  0xa9   :  { %3250 = vmatprep.subr.bf16.mxu0 %v3249_v36  ;;  %v164_v36 = vld [vmem:[#allocation5 + $0x340] sm:$0xff]  ;;  %v355_v12 = vld [vmem:[#allocation5 + $0x938] sm:$0xff] }
  0xaa   :  { %v244_v21 = vld [vmem:[#allocation5 + $0x5c0] sm:$0xff] }
  0xab   :  { %1596 = vmatmul.mubr.f32.vlgmr.msra.gmra.mrb[0].mxu0 %v58_v42  ;;  %2884 = vmatpush1.bf16.msra.mxu1 %v2883_v43  ;;  %v195_v42 = vld [vmem:[#allocation5 + $0x438] sm:$0xff]  ;;  %v3015_v43 = vpack.c.bf16 %v92_v35, %v82_v34  ;;  %v192_v34 = vld [vmem:[#allocation5 + $0x420] sm:$0xff] }
  0xac   :  { %3252 = vmatpush1.bf16.msra.mxu0 %v3251_v44  ;;  %2886 = vmatprep.subr.bf16.mxu1 %v2885_v45  ;;  %v3271_v44 = vpack.c.bf16 %v174_v38, %v164_v36  ;;  %v3017_v45 = vpack.c.bf16 %v113_v40, %v103_v39  ;;  %v264_v35 = vld [vmem:[#allocation5 + $0x660] sm:$0xff]  ;;  %v3289_v36 = vpack.c.bf16 %v275_v27, %v265_v26  ;;  %v203_v38 = vld [vmem:[#allocation5 + $0x478] sm:$0xff]  ;;  %v213_v39 = vld [vmem:[#allocation5 + $0x4c8] sm:$0xff] }
  0xad   :  { %3254 = vmatprep.subr.bf16.mxu0 %v3253_v49  ;;  %1950 = vmatprep.mubr.f32.mxu0 %v4186_v16  ;;  %v3273_v49 = vpack.c.bf16 %v195_v42, %v185_v41  ;;  %v285_v40 = vld [vmem:[#allocation5 + $0x708] sm:$0xff]  ;;  %v295_v41 = vld [vmem:[#allocation5 + $0x758] sm:$0xff] }
  0xae   :  { %v375_v26 = vld [vmem:[#allocation5 + $0x9d8] sm:$0xff] }
  0xaf   :  { %2888 = vmatpush1.bf16.msra.mxu1 %v2887_v55  ;;  %v3019_v55 = vpack.c.bf16 %v112_v47, %v102_v46  ;;  %v212_v46 = vld [vmem:[#allocation5 + $0x4c0] sm:$0xff] }
  0xb0   :  { %3256 = vmatpush1.bf16.msra.mxu0 %v3255_v56  ;;  %2890 = vmatprep.subr.bf16.mxu1 %v2889_v57  ;;  %v3275_v56 = vpack.c.bf16 %v194_v50, %v184_v48  ;;  %v122_v57 = vld [vmem:[#allocation5 + $0x1f0] sm:$0xff]  ;;  %v284_v47 = vld [vmem:[#allocation5 + $0x700] sm:$0xff]  ;;  %v3293_v48 = vpack.c.bf16 %v295_v41, %v285_v40  ;;  %v223_v50 = vld [vmem:[#allocation5 + $0x518] sm:$0xff] }
  0xb1   :  { %3258 = vmatprep.subr.bf16.mxu0 %v3257_v61  ;;  %v214_v61 = vld [vmem:[#allocation5 + $0x4d0] sm:$0xff]  ;;  %v3023_v2 = vpack.c.bf16 %v132_v58, %v122_v57  ;;  %v232_v57 = vld [vmem:[#allocation5 + $0x560] sm:$0xff]  ;;  %v395_v40 = vld [vmem:[#allocation5 + $0xa78] sm:$0xff] }
  0xb2   :  { %v304_v58 = vld [vmem:[#allocation5 + $0x7a0] sm:$0xff] }
  0xb3   :  { %2892 = vmatpush1.bf16.msra.mxu1 %v2891_v3  ;;  %v3279_v3 = vpack.c.bf16 %v214_v61, %v204_v59  ;;  %v243_v61 = vld [vmem:[#allocation5 + $0x5b8] sm:$0xff] }
  0xb4   :  { %3260 = vmatpush1.bf16.msra.mxu0 %v3259_v4  ;;  %2894 = vmatprep.subr.bf16.mxu1 %v2893_v5  ;;  %v3025_v4 = vpack.c.bf16 %v153_v63, %v143_v62  ;;  %v142_v5 = vld [vmem:[#allocation5 + $0x290] sm:$0xff]  ;;  %v253_v62 = vld [vmem:[#allocation5 + $0x608] sm:$0xff] }
  0xb5   :  { %3262 = vmatprep.subr.bf16.mxu0 %v3261_v9  ;;  %v234_v9 = vld [vmem:[#allocation5 + $0x570] sm:$0xff]  ;;  %v3027_v14 = vpack.c.bf16 %v152_v6, %v142_v5  ;;  %v325_v63 = vld [vmem:[#allocation5 + $0x848] sm:$0xff]  ;;  %v252_v5 = vld [vmem:[#allocation5 + $0x600] sm:$0xff] }
  0xb6   :  { %v324_v6 = vld [vmem:[#allocation5 + $0x840] sm:$0xff] }
  0xb7   :  { %2896 = vmatpush1.bf16.msra.mxu1 %v2895_v15  ;;  %v3283_v15 = vpack.c.bf16 %v234_v9, %v224_v7  ;;  %v3301_v7 = vpack.c.bf16 %v335_v0, %v325_v63  ;;  %v263_v9 = vld [vmem:[#allocation5 + $0x658] sm:$0xff] }
  0xb8   :  { %3264 = vmatpush1.bf16.msra.mxu0 %v3263_v18  ;;  %3010 = vmatprep.subr.bf16.mxu1 %v3009_v19  ;;  %v3029_v18 = vpack.c.bf16 %v173_v11, %v163_v10  ;;  %v162_v19 = vld [vmem:[#allocation5 + $0x330] sm:$0xff]  ;;  %v273_v10 = vld [vmem:[#allocation5 + $0x6a8] sm:$0xff]  ;;  %v435_v63 = vld [vmem:[#allocation5 + $0xbb8] sm:$0xff] }
  0xb9   :  { %3266 = vmatprep.subr.bf16.mxu0 %v3265_v23  ;;  %v254_v23 = vld [vmem:[#allocation5 + $0x610] sm:$0xff]  ;;  %v3031_v28 = vpack.c.bf16 %v172_v20, %v162_v19  ;;  %v345_v11 = vld [vmem:[#allocation5 + $0x8e8] sm:$0xff]  ;;  %v272_v19 = vld [vmem:[#allocation5 + $0x6a0] sm:$0xff] }
  0xba   :  { %1454 = vmatmul.mubr.f32.vlgmr.msra.gmra.mrb[0].mxu1 %v4197_v29  ;;  %v344_v20 = vld [vmem:[#allocation5 + $0x8e0] sm:$0xff] }
  0xbb   :  { %3012 = vmatpush1.bf16.msra.mxu1 %v3011_v31  ;;  %1666 = vmatprep.mubr.f32.mxu1 %v4186_v16  ;;  %v3021_v16 = vpack.c.bf16 %v133_v52, %v123_v51  ;;  %v3287_v31 = vpack.c.bf16 %v254_v23, %v244_v21  ;;  %v233_v51 = vld [vmem:[#allocation5 + $0x568] sm:$0xff]  ;;  %v3305_v21 = vpack.c.bf16 %v355_v12, %v345_v11  ;;  %v283_v23 = vld [vmem:[#allocation5 + $0x6f8] sm:$0xff] }
  0xbc   :  { %3268 = vmatpush1.bf16.msra.mxu0 %v3267_v32  ;;  %3014 = vmatprep.subr.bf16.mxu1 %v3013_v33  ;;  %v3033_v32 = vpack.c.bf16 %v193_v25, %v183_v24  ;;  %v182_v33 = vld [vmem:[#allocation5 + $0x3d0] sm:$0xff]  ;;  %v305_v52 = vld [vmem:[#allocation5 + $0x7a8] sm:$0xff]  ;;  %v455_v11 = vld [vmem:[#allocation5 + $0xc58] sm:$0xff] }
  0xbd   :  { %3270 = vmatprep.subr.bf16.mxu0 %v3269_v37  ;;  %v274_v37 = vld [vmem:[#allocation5 + $0x6b0] sm:$0xff]  ;;  %v3035_v42 = vpack.c.bf16 %v192_v34, %v182_v33  ;;  %v3297_v59 = vpack.c.bf16 %v315_v53, %v305_v52  ;;  %v293_v24 = vld [vmem:[#allocation5 + $0x748] sm:$0xff]  ;;  %v292_v33 = vld [vmem:[#allocation5 + $0x740] sm:$0xff] }
  0xbe   :  { %v365_v25 = vld [vmem:[#allocation5 + $0x988] sm:$0xff]  ;;  %v364_v34 = vld [vmem:[#allocation5 + $0x980] sm:$0xff]  ;;  %v415_v52 = vld [vmem:[#allocation5 + $0xb18] sm:$0xff] }
  0xbf   :  { %3016 = vmatpush1.bf16.msra.mxu1 %v3015_v43  ;;  %v3291_v43 = vpack.c.bf16 %v274_v37, %v264_v35  ;;  %v3309_v35 = vpack.c.bf16 %v375_v26, %v365_v25  ;;  %v303_v37 = vld [vmem:[#allocation5 + $0x798] sm:$0xff] }
  0xc0   :  { %3272 = vmatpush1.bf16.msra.mxu0 %v3271_v44  ;;  %3018 = vmatprep.subr.bf16.mxu1 %v3017_v45  ;;  %v3037_v44 = vpack.c.bf16 %v213_v39, %v203_v38  ;;  %v202_v45 = vld [vmem:[#allocation5 + $0x470] sm:$0xff]  ;;  %v313_v38 = vld [vmem:[#allocation5 + $0x7e8] sm:$0xff] }
  0xc1   :  { %3274 = vmatprep.subr.bf16.mxu0 %v3273_v49  ;;  %v294_v49 = vld [vmem:[#allocation5 + $0x750] sm:$0xff]  ;;  %v3039_v54 = vpack.c.bf16 %v212_v46, %v202_v45  ;;  %v385_v39 = vld [vmem:[#allocation5 + $0xa28] sm:$0xff]  ;;  %v312_v45 = vld [vmem:[#allocation5 + $0x7e0] sm:$0xff] }
  0xc2   :  { %v384_v46 = vld [vmem:[#allocation5 + $0xa20] sm:$0xff] }
  0xc3   :  { %3020 = vmatpush1.bf16.msra.mxu1 %v3019_v55  ;;  %v3295_v55 = vpack.c.bf16 %v294_v49, %v284_v47  ;;  %v3313_v47 = vpack.c.bf16 %v395_v40, %v385_v39  ;;  %v323_v49 = vld [vmem:[#allocation5 + $0x838] sm:$0xff] }
  0xc4   :  { %3276 = vmatpush1.bf16.msra.mxu0 %v3275_v56  ;;  %3022 = vmatprep.subr.bf16.mxu1 %v3021_v16  ;;  %v3041_v56 = vpack.c.bf16 %v233_v51, %v223_v50  ;;  %v222_v16 = vld [vmem:[#allocation5 + $0x510] sm:$0xff]  ;;  %v333_v50 = vld [vmem:[#allocation5 + $0x888] sm:$0xff] }
  0xc5   :  { %3278 = vmatprep.subr.bf16.mxu0 %v3277_v60  ;;  %v314_v60 = vld [vmem:[#allocation5 + $0x7f0] sm:$0xff]  ;;  %v3043_v1 = vpack.c.bf16 %v232_v57, %v222_v16  ;;  %v405_v51 = vld [vmem:[#allocation5 + $0xac8] sm:$0xff]  ;;  %v332_v16 = vld [vmem:[#allocation5 + $0x880] sm:$0xff] }
  0xc6   :  { %v404_v57 = vld [vmem:[#allocation5 + $0xac0] sm:$0xff] }
  0xc7   :  { %3024 = vmatpush1.bf16.msra.mxu1 %v3023_v2  ;;  %v3299_v2 = vpack.c.bf16 %v314_v60, %v304_v58  ;;  %v3317_v58 = vpack.c.bf16 %v415_v52, %v405_v51  ;;  %v343_v60 = vld [vmem:[#allocation5 + $0x8d8] sm:$0xff] }
  0xc8   :  { %3280 = vmatpush1.bf16.msra.mxu0 %v3279_v3  ;;  %3026 = vmatprep.subr.bf16.mxu1 %v3025_v4  ;;  %v3045_v3 = vpack.c.bf16 %v253_v62, %v243_v61  ;;  %v242_v4 = vld [vmem:[#allocation5 + $0x5b0] sm:$0xff]  ;;  %v353_v61 = vld [vmem:[#allocation5 + $0x928] sm:$0xff]  ;;  %v515_v51 = vld [vmem:[#allocation5 + $0xe38] sm:$0xff] }
  0xc9   :  { %3282 = vmatprep.subr.bf16.mxu0 %v3281_v8  ;;  %v334_v8 = vld [vmem:[#allocation5 + $0x890] sm:$0xff]  ;;  %v3047_v13 = vpack.c.bf16 %v252_v5, %v242_v4  ;;  %v425_v62 = vld [vmem:[#allocation5 + $0xb68] sm:$0xff]  ;;  %v352_v4 = vld [vmem:[#allocation5 + $0x920] sm:$0xff] }
  0xca   :  { %v424_v5 = vld [vmem:[#allocation5 + $0xb60] sm:$0xff] }
  0xcb   :  { %3028 = vmatpush1.bf16.msra.mxu1 %v3027_v14  ;;  %v3303_v14 = vpack.c.bf16 %v334_v8, %v324_v6  ;;  %v3321_v6 = vpack.c.bf16 %v435_v63, %v425_v62  ;;  %v363_v8 = vld [vmem:[#allocation5 + $0x978] sm:$0xff] }
  0xcc   :  { %3284 = vmatpush1.bf16.msra.mxu0 %v3283_v15  ;;  %3030 = vmatprep.subr.bf16.mxu1 %v3029_v18  ;;  %v3049_v15 = vpack.c.bf16 %v273_v10, %v263_v9  ;;  %v262_v18 = vld [vmem:[#allocation5 + $0x650] sm:$0xff]  ;;  %v373_v9 = vld [vmem:[#allocation5 + $0x9c8] sm:$0xff]  ;;  %v535_v62 = vld [vmem:[#allocation5 + $0xed8] sm:$0xff] }
  0xcd   :  { %3286 = vmatprep.subr.bf16.mxu0 %v3285_v22  ;;  %v354_v22 = vld [vmem:[#allocation5 + $0x930] sm:$0xff]  ;;  %v3051_v27 = vpack.c.bf16 %v272_v19, %v262_v18  ;;  %v445_v10 = vld [vmem:[#allocation5 + $0xc08] sm:$0xff]  ;;  %v444_v18 = vld [vmem:[#allocation5 + $0xc00] sm:$0xff] }
  0xce   :  { %v3325_v19 = vpack.c.bf16 %v455_v11, %v445_v10 }
  0xcf   :  { %3032 = vmatpush1.bf16.msra.mxu1 %v3031_v28  ;;  %v3307_v28 = vpack.c.bf16 %v354_v22, %v344_v20  ;;  %v454_v20 = vld [vmem:[#allocation5 + $0xc50] sm:$0xff]  ;;  %v393_v22 = vld [vmem:[#allocation5 + $0xa68] sm:$0xff] }
  0xd0   :  { %3288 = vmatpush1.bf16.msra.mxu0 %v3287_v31  ;;  %3034 = vmatprep.subr.bf16.mxu1 %v3033_v32  ;;  %v3053_v31 = vpack.c.bf16 %v293_v24, %v283_v23  ;;  %v282_v32 = vld [vmem:[#allocation5 + $0x6f0] sm:$0xff]  ;;  %v465_v23 = vld [vmem:[#allocation5 + $0xca8] sm:$0xff]  ;;  %v475_v24 = vld [vmem:[#allocation5 + $0xcf8] sm:$0xff]  ;;  %v3327_v26 = vpack.c.bf16 %v454_v20, %v444_v18 }
  0xd1   :  { %3290 = vmatprep.subr.bf16.mxu0 %v3289_v36  ;;  %v374_v36 = vld [vmem:[#allocation5 + $0x9d0] sm:$0xff]  ;;  %v3055_v41 = vpack.c.bf16 %v292_v33, %v282_v32  ;;  %v464_v32 = vld [vmem:[#allocation5 + $0xca0] sm:$0xff]  ;;  %v3329_v33 = vpack.c.bf16 %v475_v24, %v465_v23  ;;  %v493_v20 = vld [vmem:[#allocation5 + $0xd88] sm:$0xff] }
  0xd2   :  { %v554_v18 = vld [vmem:[#allocation5 + $0xf70] sm:$0xff] }
  0xd3   :  { %3036 = vmatpush1.bf16.msra.mxu1 %v3035_v42  ;;  %v3311_v42 = vpack.c.bf16 %v374_v36, %v364_v34  ;;  %v474_v34 = vld [vmem:[#allocation5 + $0xcf0] sm:$0xff]  ;;  %v413_v36 = vld [vmem:[#allocation5 + $0xb08] sm:$0xff] }
  0xd4   :  { %3292 = vmatpush1.bf16.msra.mxu0 %v3291_v43  ;;  %3038 = vmatprep.subr.bf16.mxu1 %v3037_v44  ;;  %v3057_v43 = vpack.c.bf16 %v313_v38, %v303_v37  ;;  %v302_v44 = vld [vmem:[#allocation5 + $0x790] sm:$0xff]  ;;  %v485_v37 = vld [vmem:[#allocation5 + $0xd48] sm:$0xff]  ;;  %v495_v38 = vld [vmem:[#allocation5 + $0xd98] sm:$0xff]  ;;  %v3331_v40 = vpack.c.bf16 %v474_v34, %v464_v32 }
  0xd5   :  { %3294 = vmatprep.subr.bf16.mxu0 %v3293_v48  ;;  %v394_v48 = vld [vmem:[#allocation5 + $0xa70] sm:$0xff]  ;;  %v3059_v53 = vpack.c.bf16 %v312_v45, %v302_v44  ;;  %v484_v44 = vld [vmem:[#allocation5 + $0xd40] sm:$0xff]  ;;  %v3333_v45 = vpack.c.bf16 %v495_v38, %v485_v37  ;;  %v513_v34 = vld [vmem:[#allocation5 + $0xe28] sm:$0xff] }
  0xd6   :  { %v574_v32 = vld [vmem:[#allocation5 + $0x1010] sm:$0xff] }
  0xd7   :  { %3040 = vmatpush1.bf16.msra.mxu1 %v3039_v54  ;;  %v3315_v54 = vpack.c.bf16 %v394_v48, %v384_v46  ;;  %v494_v46 = vld [vmem:[#allocation5 + $0xd90] sm:$0xff]  ;;  %v433_v48 = vld [vmem:[#allocation5 + $0xba8] sm:$0xff] }
  0xd8   :  { %3296 = vmatpush1.bf16.msra.mxu0 %v3295_v55  ;;  %3042 = vmatprep.subr.bf16.mxu1 %v3041_v56  ;;  %v3061_v55 = vpack.c.bf16 %v333_v50, %v323_v49  ;;  %v322_v56 = vld [vmem:[#allocation5 + $0x830] sm:$0xff]  ;;  %v4015_v49 = vld [vmem:[#allocation2] sm:$0xff]  ;;  %v505_v50 = vld [vmem:[#allocation5 + $0xde8] sm:$0xff] }
  0xd9   :  { %3298 = vmatprep.subr.bf16.mxu0 %v3297_v59  ;;  %v414_v59 = vld [vmem:[#allocation5 + $0xb10] sm:$0xff]  ;;  %v3063_v0 = vpack.c.bf16 %v332_v16, %v322_v56  ;;  %v432_v56 = vld [vmem:[#allocation5 + $0xba0] sm:$0xff] }
  0xda   :  { %v504_v16 = vld [vmem:[#allocation5 + $0xde0] sm:$0xff] }
  0xdb   :  { %3044 = vmatpush1.bf16.msra.mxu1 %v3043_v1  ;;  %v3319_v1 = vpack.c.bf16 %v414_v59, %v404_v57  ;;  %v3337_v57 = vpack.c.bf16 %v515_v51, %v505_v50  ;;  %v443_v59 = vld [vmem:[#allocation5 + $0xbf8] sm:$0xff] }
  0xdc   :  { %3300 = vmatpush1.bf16.msra.mxu0 %v3299_v2  ;;  %3046 = vmatprep.subr.bf16.mxu1 %v3045_v3  ;;  %v3065_v2 = vpack.c.bf16 %v353_v61, %v343_v60  ;;  %v342_v3 = vld [vmem:[#allocation5 + $0x8d0] sm:$0xff]  ;;  %v453_v60 = vld [vmem:[#allocation5 + $0xc48] sm:$0xff] }
  0xdd   :  { %3302 = vmatprep.subr.bf16.mxu0 %v3301_v7  ;;  %v434_v7 = vld [vmem:[#allocation5 + $0xbb0] sm:$0xff]  ;;  %v3067_v12 = vpack.c.bf16 %v352_v4, %v342_v3  ;;  %v525_v61 = vld [vmem:[#allocation5 + $0xe88] sm:$0xff]  ;;  %v524_v3 = vld [vmem:[#allocation5 + $0xe80] sm:$0xff] }
  0xde   :  { %v3341_v4 = vpack.c.bf16 %v535_v62, %v525_v61 }
  0xdf   :  { %3048 = vmatpush1.bf16.msra.mxu1 %v3047_v13  ;;  %v3069_v13 = vpack.c.bf16 %v373_v9, %v363_v8  ;;  %v545_v8 = vld [vmem:[#allocation5 + $0xf28] sm:$0xff]  ;;  %v555_v9 = vld [vmem:[#allocation5 + $0xf78] sm:$0xff] }
  0xe0   :  { %3304 = vmatpush1.bf16.msra.mxu0 %v3303_v14  ;;  %3050 = vmatprep.subr.bf16.mxu1 %v3049_v15  ;;  %v362_v14 = vld [vmem:[#allocation5 + $0x970] sm:$0xff]  ;;  %v372_v15 = vld [vmem:[#allocation5 + $0x9c0] sm:$0xff] }
  0xe1   :  { %3306 = vmatprep.subr.bf16.mxu0 %v3305_v21  ;;  %v383_v21 = vld [vmem:[#allocation5 + $0xa18] sm:$0xff]  ;;  %v3071_v25 = vpack.c.bf16 %v372_v15, %v362_v14  ;;  %v544_v14 = vld [vmem:[#allocation5 + $0xf20] sm:$0xff]  ;;  %v3345_v15 = vpack.c.bf16 %v555_v9, %v545_v8 }
  0xe2   :  { %v3347_v24 = vpack.c.bf16 %v554_v18, %v544_v14  ;;  %v583_v14 = vld [vmem:[#allocation5 + $0x1058] sm:$0xff]  ;;  %v665_v18 = vld [vmem:[#allocation5 + $0x12e8] sm:$0xff] }
  0xe3   :  { %3052 = vmatpush1.bf16.msra.mxu1 %v3051_v27  ;;  %v3073_v27 = vpack.c.bf16 %v393_v22, %v383_v21  ;;  %v565_v21 = vld [vmem:[#allocation5 + $0xfc8] sm:$0xff]  ;;  %v575_v22 = vld [vmem:[#allocation5 + $0x1018] sm:$0xff] }
  0xe4   :  { %3308 = vmatpush1.bf16.msra.mxu0 %v3307_v28  ;;  %3054 = vmatprep.subr.bf16.mxu1 %v3053_v31  ;;  %v382_v28 = vld [vmem:[#allocation5 + $0xa10] sm:$0xff]  ;;  %v392_v31 = vld [vmem:[#allocation5 + $0xa60] sm:$0xff] }
  0xe5   :  { %3310 = vmatprep.subr.bf16.mxu0 %v3309_v35  ;;  %v403_v35 = vld [vmem:[#allocation5 + $0xab8] sm:$0xff]  ;;  %v3075_v39 = vpack.c.bf16 %v392_v31, %v382_v28  ;;  %v564_v28 = vld [vmem:[#allocation5 + $0xfc0] sm:$0xff]  ;;  %v3349_v31 = vpack.c.bf16 %v575_v22, %v565_v21 }
  0xe6   :  { %v3351_v38 = vpack.c.bf16 %v574_v32, %v564_v28  ;;  %v603_v28 = vld [vmem:[#allocation5 + $0x10f8] sm:$0xff]  ;;  %v685_v32 = vld [vmem:[#allocation5 + $0x1388] sm:$0xff] }
  0xe7   :  { %3056 = vmatpush1.bf16.msra.mxu1 %v3055_v41  ;;  %v3077_v41 = vpack.c.bf16 %v413_v36, %v403_v35  ;;  %v585_v35 = vld [vmem:[#allocation5 + $0x1068] sm:$0xff]  ;;  %v595_v36 = vld [vmem:[#allocation5 + $0x10b8] sm:$0xff] }
  0xe8   :  { %3312 = vmatpush1.bf16.msra.mxu0 %v3311_v42  ;;  %3058 = vmatprep.subr.bf16.mxu1 %v3057_v43  ;;  %v402_v42 = vld [vmem:[#allocation5 + $0xab0] sm:$0xff]  ;;  %v412_v43 = vld [vmem:[#allocation5 + $0xb00] sm:$0xff] }
  0xe9   :  { %3314 = vmatprep.subr.bf16.mxu0 %v3313_v47  ;;  %v423_v47 = vld [vmem:[#allocation5 + $0xb58] sm:$0xff]  ;;  %v3079_v52 = vpack.c.bf16 %v412_v43, %v402_v42  ;;  %v584_v42 = vld [vmem:[#allocation5 + $0x1060] sm:$0xff]  ;;  %v3353_v43 = vpack.c.bf16 %v595_v36, %v585_v35 }
  0xeb   :  { %3060 = vmatpush1.bf16.msra.mxu1 %v3059_v53  ;;  %1951 = vmatmul.mubr.f32.vlgmr.msra.gmra.mrb[2].mxu0 %v4189_v17  ;;  %v3323_v17 = vpack.c.bf16 %v434_v7, %v424_v5  ;;  %v3335_v53 = vpack.c.bf16 %v494_v46, %v484_v44  ;;  %v534_v5 = vld [vmem:[#allocation5 + $0xed0] sm:$0xff]  ;;  %v473_v7 = vld [vmem:[#allocation5 + $0xce8] sm:$0xff] }
  0xec   :  { %3316 = vmatpush1.bf16.msra.mxu0 %v3315_v54  ;;  %3062 = vmatprep.subr.bf16.mxu1 %v3061_v55  ;;  %v3081_v54 = vpack.c.bf16 %v433_v48, %v423_v47  ;;  %v422_v55 = vld [vmem:[#allocation5 + $0xb50] sm:$0xff]  ;;  %v3343_v11 = vpack.c.bf16 %v534_v5, %v524_v3  ;;  %v533_v46 = vld [vmem:[#allocation5 + $0xec8] sm:$0xff]  ;;  %v615_v48 = vld [vmem:[#allocation5 + $0x1158] sm:$0xff] }
  0xed   :  { %3318 = vmatprep.subr.bf16.mxu0 %v3317_v58  ;;  %2021 = vmatprep.mubr.f32.mxu0 %v4193_v30  ;;  %v514_v58 = vld [vmem:[#allocation5 + $0xe30] sm:$0xff]  ;;  %v3083_v63 = vpack.c.bf16 %v432_v56, %v422_v55  ;;  %v605_v47 = vld [vmem:[#allocation5 + $0x1108] sm:$0xff]  ;;  %v563_v3 = vld [vmem:[#allocation5 + $0xfb8] sm:$0xff] }
  0xee   :  { %v594_v44 = vld [vmem:[#allocation5 + $0x10b0] sm:$0xff]  ;;  %v3357_v55 = vpack.c.bf16 %v615_v48, %v605_v47  ;;  %v645_v5 = vld [vmem:[#allocation5 + $0x1248] sm:$0xff] }
  0xef   :  { %3064 = vmatpush1.bf16.msra.mxu1 %v3063_v0  ;;  %v3339_v0 = vpack.c.bf16 %v514_v58, %v504_v16  ;;  %v3355_v50 = vpack.c.bf16 %v594_v44, %v584_v42  ;;  %v614_v56 = vld [vmem:[#allocation5 + $0x1150] sm:$0xff]  ;;  %v543_v16 = vld [vmem:[#allocation5 + $0xf18] sm:$0xff]  ;;  %v625_v58 = vld [vmem:[#allocation5 + $0x11a8] sm:$0xff] }
  0xf0   :  { %3320 = vmatpush1.bf16.msra.mxu0 %v3319_v1  ;;  %3066 = vmatprep.subr.bf16.mxu1 %v3065_v2  ;;  %v442_v1 = vld [vmem:[#allocation5 + $0xbf0] sm:$0xff]  ;;  %v452_v2 = vld [vmem:[#allocation5 + $0xc40] sm:$0xff]  ;;  %v623_v42 = vld [vmem:[#allocation5 + $0x1198] sm:$0xff] }
  0xf1   :  { %3322 = vmatprep.subr.bf16.mxu0 %v3321_v6  ;;  %v463_v6 = vld [vmem:[#allocation5 + $0xc98] sm:$0xff]  ;;  %v3087_v10 = vpack.c.bf16 %v452_v2, %v442_v1  ;;  %v634_v2 = vld [vmem:[#allocation5 + $0x11f0] sm:$0xff]  ;;  %v705_v44 = vld [vmem:[#allocation5 + $0x1428] sm:$0xff] }
  0xf3   :  { %3068 = vmatpush1.bf16.msra.mxu1 %v3067_v12  ;;  %v3089_v12 = vpack.c.bf16 %v473_v7, %v463_v6  ;;  %v655_v6 = vld [vmem:[#allocation5 + $0x1298] sm:$0xff] }
  0xf4   :  { %3324 = vmatpush1.bf16.msra.mxu0 %v3323_v17  ;;  %3070 = vmatprep.subr.bf16.mxu1 %v3069_v13  ;;  %v462_v17 = vld [vmem:[#allocation5 + $0xc90] sm:$0xff]  ;;  %v472_v13 = vld [vmem:[#allocation5 + $0xce0] sm:$0xff] }
  0xf5   :  { %3326 = vmatprep.subr.bf16.mxu0 %v3325_v19  ;;  %v483_v19 = vld [vmem:[#allocation5 + $0xd38] sm:$0xff]  ;;  %v3091_v23 = vpack.c.bf16 %v472_v13, %v462_v17  ;;  %v3365_v17 = vpack.c.bf16 %v655_v6, %v645_v5  ;;  %v654_v13 = vld [vmem:[#allocation5 + $0x1290] sm:$0xff] }
  0xf7   :  { %3072 = vmatpush1.bf16.msra.mxu1 %v3071_v25  ;;  %v3093_v25 = vpack.c.bf16 %v493_v20, %v483_v19  ;;  %v675_v19 = vld [vmem:[#allocation5 + $0x1338] sm:$0xff] }
  0xf8   :  { %3328 = vmatpush1.bf16.msra.mxu0 %v3327_v26  ;;  %3074 = vmatprep.subr.bf16.mxu1 %v3073_v27  ;;  %v482_v26 = vld [vmem:[#allocation5 + $0xd30] sm:$0xff]  ;;  %v492_v27 = vld [vmem:[#allocation5 + $0xd80] sm:$0xff] }
  0xf9   :  { %3330 = vmatprep.subr.bf16.mxu0 %v3329_v33  ;;  %v503_v33 = vld [vmem:[#allocation5 + $0xdd8] sm:$0xff]  ;;  %v3095_v37 = vpack.c.bf16 %v492_v27, %v482_v26  ;;  %v3369_v26 = vpack.c.bf16 %v675_v19, %v665_v18  ;;  %v674_v27 = vld [vmem:[#allocation5 + $0x1330] sm:$0xff] }
  0xfa   :  { %1667 = vmatmul.mubr.f32.vlgmr.msra.gmra.mrb[2].mxu1 %v4015_v49 }
  0xfb   :  { %3076 = vmatpush1.bf16.msra.mxu1 %v3075_v39  ;;  %1737 = vmatprep.mubr.f32.mxu1 %v4193_v30  ;;  %v3085_v30 = vpack.c.bf16 %v453_v60, %v443_v59  ;;  %v3097_v39 = vpack.c.bf16 %v513_v34, %v503_v33  ;;  %v635_v59 = vld [vmem:[#allocation5 + $0x11f8] sm:$0xff] }
  0xfc   :  { %3332 = vmatpush1.bf16.msra.mxu0 %v3331_v40  ;;  %3078 = vmatprep.subr.bf16.mxu1 %v3077_v41  ;;  %v502_v40 = vld [vmem:[#allocation5 + $0xdd0] sm:$0xff]  ;;  %v512_v41 = vld [vmem:[#allocation5 + $0xe20] sm:$0xff]  ;;  %v3361_v1 = vpack.c.bf16 %v635_v59, %v625_v58  ;;  %v695_v33 = vld [vmem:[#allocation5 + $0x13d8] sm:$0xff] }
  0xfd   :  { %3334 = vmatprep.subr.bf16.mxu0 %v3333_v45  ;;  %v523_v45 = vld [vmem:[#allocation5 + $0xe78] sm:$0xff]  ;;  %v3099_v49 = vpack.c.bf16 %v512_v41, %v502_v40  ;;  %v3373_v40 = vpack.c.bf16 %v695_v33, %v685_v32  ;;  %v694_v41 = vld [vmem:[#allocation5 + $0x13d0] sm:$0xff] }
  0xfe   :  { %v3101_v51 = vpack.c.bf16 %v533_v46, %v523_v45  ;;  %v715_v45 = vld [vmem:[#allocation5 + $0x1478] sm:$0xff] }
  0xff   :  { %3080 = vmatpush1.bf16.msra.mxu1 %v3079_v52  ;;  %v522_v52 = vld [vmem:[#allocation5 + $0xe70] sm:$0xff] }
 0x100   :  { %3336 = vmatpush1.bf16.msra.mxu0 %v3335_v53  ;;  %3082 = vmatprep.subr.bf16.mxu1 %v3081_v54  ;;  %v532_v53 = vld [vmem:[#allocation5 + $0xec0] sm:$0xff] }
 0x101   :  { %3338 = vmatprep.subr.bf16.mxu0 %v3337_v57  ;;  %v604_v54 = vld [vmem:[#allocation5 + $0x1100] sm:$0xff]  ;;  %v553_v57 = vld [vmem:[#allocation5 + $0xf68] sm:$0xff]  ;;  %v3103_v60 = vpack.c.bf16 %v532_v53, %v522_v52  ;;  %v3377_v52 = vpack.c.bf16 %v715_v45, %v705_v44  ;;  %v714_v53 = vld [vmem:[#allocation5 + $0x1470] sm:$0xff] }
 0x102   :  { %v3359_v61 = vpack.c.bf16 %v614_v56, %v604_v54  ;;  %v3105_v62 = vpack.c.bf16 %v553_v57, %v543_v16  ;;  %v643_v54 = vld [vmem:[#allocation5 + $0x1238] sm:$0xff]  ;;  %v725_v56 = vld [vmem:[#allocation5 + $0x14c8] sm:$0xff] }
 0x103   :  { %3084 = vmatpush1.bf16.msra.mxu1 %v3083_v63  ;;  %v542_v63 = vld [vmem:[#allocation5 + $0xf10] sm:$0xff]  ;;  %v735_v16 = vld [vmem:[#allocation5 + $0x1518] sm:$0xff] }
 0x104   :  { %3340 = vmatpush1.bf16.msra.mxu0 %v3339_v0  ;;  %3086 = vmatprep.subr.bf16.mxu1 %v3085_v30  ;;  %v552_v0 = vld [vmem:[#allocation5 + $0xf60] sm:$0xff] }
 0x105   :  { %3342 = vmatprep.subr.bf16.mxu0 %v3341_v4  ;;  %v624_v30 = vld [vmem:[#allocation5 + $0x11a0] sm:$0xff]  ;;  %v573_v4 = vld [vmem:[#allocation5 + $0x1008] sm:$0xff]  ;;  %v3107_v7 = vpack.c.bf16 %v552_v0, %v542_v63  ;;  %v3381_v63 = vpack.c.bf16 %v735_v16, %v725_v56  ;;  %v734_v0 = vld [vmem:[#allocation5 + $0x1510] sm:$0xff] }
 0x106   :  { %v3363_v8 = vpack.c.bf16 %v634_v2, %v624_v30  ;;  %v3109_v9 = vpack.c.bf16 %v573_v4, %v563_v3  ;;  %v663_v30 = vld [vmem:[#allocation5 + $0x12d8] sm:$0xff]  ;;  %v745_v2 = vld [vmem:[#allocation5 + $0x1568] sm:$0xff] }
 0x107   :  { %3088 = vmatpush1.bf16.msra.mxu1 %v3087_v10  ;;  %v562_v10 = vld [vmem:[#allocation5 + $0xfb0] sm:$0xff]  ;;  %v755_v3 = vld [vmem:[#allocation5 + $0x15b8] sm:$0xff] }
 0x108   :  { %3344 = vmatpush1.bf16.msra.mxu0 %v3343_v11  ;;  %3090 = vmatprep.subr.bf16.mxu1 %v3089_v12  ;;  %v572_v11 = vld [vmem:[#allocation5 + $0x1000] sm:$0xff] }
 0x109   :  { %3346 = vmatprep.subr.bf16.mxu0 %v3345_v15  ;;  %v644_v12 = vld [vmem:[#allocation5 + $0x1240] sm:$0xff]  ;;  %v593_v15 = vld [vmem:[#allocation5 + $0x10a8] sm:$0xff]  ;;  %v3111_v20 = vpack.c.bf16 %v572_v11, %v562_v10  ;;  %v3385_v10 = vpack.c.bf16 %v755_v3, %v745_v2  ;;  %v754_v11 = vld [vmem:[#allocation5 + $0x15b0] sm:$0xff] }
 0x10a   :  { %v3367_v21 = vpack.c.bf16 %v654_v13, %v644_v12  ;;  %v3113_v22 = vpack.c.bf16 %v593_v15, %v583_v14  ;;  %v683_v12 = vld [vmem:[#allocation5 + $0x1378] sm:$0xff]  ;;  %v4016_v13 = vld [vmem:[#allocation2 + $0x28] sm:$0xff] }
 0x10b   :  { %3092 = vmatpush1.bf16.msra.mxu1 %v3091_v23  ;;  %v582_v23 = vld [vmem:[#allocation5 + $0x1050] sm:$0xff]  ;;  %v765_v14 = vld [vmem:[#allocation5 + $0x1608] sm:$0xff]  ;;  %v775_v15 = vld [vmem:[#allocation5 + $0x1658] sm:$0xff] }
 0x10c   :  { %3348 = vmatpush1.bf16.msra.mxu0 %v3347_v24  ;;  %3094 = vmatprep.subr.bf16.mxu1 %v3093_v25  ;;  %v592_v24 = vld [vmem:[#allocation5 + $0x10a0] sm:$0xff] }
 0x10d   :  { %3350 = vmatprep.subr.bf16.mxu0 %v3349_v31  ;;  %v664_v25 = vld [vmem:[#allocation5 + $0x12e0] sm:$0xff]  ;;  %v613_v31 = vld [vmem:[#allocation5 + $0x1148] sm:$0xff]  ;;  %v3115_v34 = vpack.c.bf16 %v592_v24, %v582_v23  ;;  %v3389_v23 = vpack.c.bf16 %v775_v15, %v765_v14  ;;  %v774_v24 = vld [vmem:[#allocation5 + $0x1650] sm:$0xff] }
 0x10e   :  { %v3371_v35 = vpack.c.bf16 %v674_v27, %v664_v25  ;;  %v3117_v36 = vpack.c.bf16 %v613_v31, %v603_v28  ;;  %v703_v25 = vld [vmem:[#allocation5 + $0x1418] sm:$0xff]  ;;  %v785_v27 = vld [vmem:[#allocation5 + $0x16a8] sm:$0xff] }
 0x10f   :  { %3096 = vmatpush1.bf16.msra.mxu1 %v3095_v37  ;;  %v602_v37 = vld [vmem:[#allocation5 + $0x10f0] sm:$0xff]  ;;  %v795_v28 = vld [vmem:[#allocation5 + $0x16f8] sm:$0xff] }
 0x110   :  { %3352 = vmatpush1.bf16.msra.mxu0 %v3351_v38  ;;  %3098 = vmatprep.subr.bf16.mxu1 %v3097_v39  ;;  %v612_v38 = vld [vmem:[#allocation5 + $0x1140] sm:$0xff] }
 0x111   :  { %3354 = vmatprep.subr.bf16.mxu0 %v3353_v43  ;;  %v684_v39 = vld [vmem:[#allocation5 + $0x1380] sm:$0xff]  ;;  %v633_v43 = vld [vmem:[#allocation5 + $0x11e8] sm:$0xff]  ;;  %v3119_v46 = vpack.c.bf16 %v612_v38, %v602_v37  ;;  %v3393_v37 = vpack.c.bf16 %v795_v28, %v785_v27  ;;  %v794_v38 = vld [vmem:[#allocation5 + $0x16f0] sm:$0xff] }
 0x112   :  { %v3375_v47 = vpack.c.bf16 %v694_v41, %v684_v39  ;;  %v3121_v48 = vpack.c.bf16 %v633_v43, %v623_v42  ;;  %v723_v39 = vld [vmem:[#allocation5 + $0x14b8] sm:$0xff]  ;;  %v805_v41 = vld [vmem:[#allocation5 + $0x1748] sm:$0xff] }
 0x113   :  { %3100 = vmatpush1.bf16.msra.mxu1 %v3099_v49  ;;  %v622_v49 = vld [vmem:[#allocation5 + $0x1190] sm:$0xff]  ;;  %v815_v42 = vld [vmem:[#allocation5 + $0x1798] sm:$0xff] }
 0x114   :  { %3356 = vmatpush1.bf16.msra.mxu0 %v3355_v50  ;;  %3102 = vmatprep.subr.bf16.mxu1 %v3101_v51  ;;  %v632_v50 = vld [vmem:[#allocation5 + $0x11e0] sm:$0xff] }
 0x115   :  { %3358 = vmatprep.subr.bf16.mxu0 %v3357_v55  ;;  %v704_v51 = vld [vmem:[#allocation5 + $0x1420] sm:$0xff]  ;;  %v653_v55 = vld [vmem:[#allocation5 + $0x1288] sm:$0xff]  ;;  %v3123_v57 = vpack.c.bf16 %v632_v50, %v622_v49  ;;  %v3397_v49 = vpack.c.bf16 %v815_v42, %v805_v41  ;;  %v814_v50 = vld [vmem:[#allocation5 + $0x1790] sm:$0xff] }
 0x116   :  { %v3379_v58 = vpack.c.bf16 %v714_v53, %v704_v51  ;;  %v3125_v59 = vpack.c.bf16 %v653_v55, %v643_v54  ;;  %v743_v51 = vld [vmem:[#allocation5 + $0x1558] sm:$0xff]  ;;  %v4017_v53 = vld [vmem:[#allocation2 + $0x10] sm:$0xff]  ;;  %v825_v54 = vld [vmem:[#allocation5 + $0x17e8] sm:$0xff] }
 0x117   :  { %3104 = vmatpush1.bf16.msra.mxu1 %v3103_v60  ;;  %v642_v60 = vld [vmem:[#allocation5 + $0x1230] sm:$0xff]  ;;  %v835_v55 = vld [vmem:[#allocation5 + $0x1838] sm:$0xff] }
 0x118   :  { %3360 = vmatpush1.bf16.msra.mxu0 %v3359_v61  ;;  %3106 = vmatprep.subr.bf16.mxu1 %v3105_v62  ;;  %v652_v61 = vld [vmem:[#allocation5 + $0x1280] sm:$0xff] }
 0x119   :  { %3362 = vmatprep.subr.bf16.mxu0 %v3361_v1  ;;  %v724_v62 = vld [vmem:[#allocation5 + $0x14c0] sm:$0xff]  ;;  %v673_v1 = vld [vmem:[#allocation5 + $0x1328] sm:$0xff]  ;;  %v3127_v4 = vpack.c.bf16 %v652_v61, %v642_v60  ;;  %v3401_v61 = vpack.c.bf16 %v835_v55, %v825_v54  ;;  %v842_v55 = vld [vmem:[#allocation5 + $0x1870] sm:$0xff] }
 0x11a   :  { %v3383_v5 = vpack.c.bf16 %v734_v0, %v724_v62  ;;  %v3129_v6 = vpack.c.bf16 %v673_v1, %v663_v30  ;;  %v824_v60 = vld [vmem:[#allocation5 + $0x17e0] sm:$0xff]  ;;  %v834_v62 = vld [vmem:[#allocation5 + $0x1830] sm:$0xff]  ;;  %v773_v0 = vld [vmem:[#allocation5 + $0x1648] sm:$0xff] }
 0x11b   :  { %3108 = vmatpush1.bf16.msra.mxu1 %v3107_v7  ;;  %v662_v7 = vld [vmem:[#allocation5 + $0x12d0] sm:$0xff]  ;;  %v845_v30 = vld [vmem:[#allocation5 + $0x1888] sm:$0xff]  ;;  %v855_v1 = vld [vmem:[#allocation5 + $0x18d8] sm:$0xff]  ;;  %v3403_v3 = vpack.c.bf16 %v834_v62, %v824_v60 }
 0x11c   :  { %3364 = vmatpush1.bf16.msra.mxu0 %v3363_v8  ;;  %3110 = vmatprep.subr.bf16.mxu1 %v3109_v9  ;;  %v672_v8 = vld [vmem:[#allocation5 + $0x1320] sm:$0xff]  ;;  %v873_v60 = vld [vmem:[#allocation5 + $0x1968] sm:$0xff]  ;;  %v955_v62 = vld [vmem:[#allocation5 + $0x1bf8] sm:$0xff] }
 0x11d   :  { %3366 = vmatprep.subr.bf16.mxu0 %v3365_v17  ;;  %v744_v9 = vld [vmem:[#allocation5 + $0x1560] sm:$0xff]  ;;  %v693_v17 = vld [vmem:[#allocation5 + $0x13c8] sm:$0xff]  ;;  %v3131_v18 = vpack.c.bf16 %v672_v8, %v662_v7  ;;  %v3405_v8 = vpack.c.bf16 %v855_v1, %v845_v30  ;;  %v862_v1 = vld [vmem:[#allocation5 + $0x1910] sm:$0xff] }
 0x11e   :  { %v3133_v19 = vpack.c.bf16 %v693_v17, %v683_v12  ;;  %v844_v7 = vld [vmem:[#allocation5 + $0x1880] sm:$0xff]  ;;  %v865_v12 = vld [vmem:[#allocation5 + $0x1928] sm:$0xff]  ;;  %v875_v17 = vld [vmem:[#allocation5 + $0x1978] sm:$0xff] }
 0x11f   :  { %3112 = vmatpush1.bf16.msra.mxu1 %v3111_v20  ;;  %v682_v20 = vld [vmem:[#allocation5 + $0x1370] sm:$0xff] }
 0x120   :  { %3368 = vmatpush1.bf16.msra.mxu0 %v3367_v21  ;;  %3114 = vmatprep.subr.bf16.mxu1 %v3113_v22  ;;  %v692_v21 = vld [vmem:[#allocation5 + $0x13c0] sm:$0xff] }
 0x121   :  { %3370 = vmatprep.subr.bf16.mxu0 %v3369_v26  ;;  %v764_v22 = vld [vmem:[#allocation5 + $0x1600] sm:$0xff]  ;;  %v713_v26 = vld [vmem:[#allocation5 + $0x1468] sm:$0xff]  ;;  %v3135_v31 = vpack.c.bf16 %v692_v21, %v682_v20  ;;  %v3409_v20 = vpack.c.bf16 %v875_v17, %v865_v12  ;;  %v874_v21 = vld [vmem:[#allocation5 + $0x1970] sm:$0xff] }
 0x122   :  { %v3391_v32 = vpack.c.bf16 %v774_v24, %v764_v22  ;;  %v3137_v33 = vpack.c.bf16 %v713_v26, %v703_v25  ;;  %v803_v22 = vld [vmem:[#allocation5 + $0x1738] sm:$0xff]  ;;  %v885_v24 = vld [vmem:[#allocation5 + $0x19c8] sm:$0xff]  ;;  %v882_v17 = vld [vmem:[#allocation5 + $0x19b0] sm:$0xff] }
 0x123   :  { %3116 = vmatpush1.bf16.msra.mxu1 %v3115_v34  ;;  %v702_v34 = vld [vmem:[#allocation5 + $0x1410] sm:$0xff]  ;;  %v895_v25 = vld [vmem:[#allocation5 + $0x1a18] sm:$0xff] }
 0x124   :  { %3372 = vmatpush1.bf16.msra.mxu0 %v3371_v35  ;;  %3118 = vmatprep.subr.bf16.mxu1 %v3117_v36  ;;  %v712_v35 = vld [vmem:[#allocation5 + $0x1460] sm:$0xff] }
 0x125   :  { %3374 = vmatprep.subr.bf16.mxu0 %v3373_v40  ;;  %v784_v36 = vld [vmem:[#allocation5 + $0x16a0] sm:$0xff]  ;;  %v733_v40 = vld [vmem:[#allocation5 + $0x1508] sm:$0xff]  ;;  %v3139_v43 = vpack.c.bf16 %v712_v35, %v702_v34  ;;  %v3413_v34 = vpack.c.bf16 %v895_v25, %v885_v24  ;;  %v894_v35 = vld [vmem:[#allocation5 + $0x1a10] sm:$0xff] }
 0x126   :  { %v3395_v44 = vpack.c.bf16 %v794_v38, %v784_v36  ;;  %v3141_v45 = vpack.c.bf16 %v733_v40, %v723_v39  ;;  %v823_v36 = vld [vmem:[#allocation5 + $0x17d8] sm:$0xff]  ;;  %v905_v38 = vld [vmem:[#allocation5 + $0x1a68] sm:$0xff]  ;;  %v902_v25 = vld [vmem:[#allocation5 + $0x1a50] sm:$0xff] }
 0x127   :  { %3120 = vmatpush1.bf16.msra.mxu1 %v3119_v46  ;;  %v722_v46 = vld [vmem:[#allocation5 + $0x14b0] sm:$0xff]  ;;  %v915_v39 = vld [vmem:[#allocation5 + $0x1ab8] sm:$0xff] }
 0x128   :  { %3376 = vmatpush1.bf16.msra.mxu0 %v3375_v47  ;;  %3122 = vmatprep.subr.bf16.mxu1 %v3121_v48  ;;  %v732_v47 = vld [vmem:[#allocation5 + $0x1500] sm:$0xff] }
 0x129   :  { %3378 = vmatprep.subr.bf16.mxu0 %v3377_v52  ;;  %v804_v48 = vld [vmem:[#allocation5 + $0x1740] sm:$0xff]  ;;  %v753_v52 = vld [vmem:[#allocation5 + $0x15a8] sm:$0xff]  ;;  %v3143_v56 = vpack.c.bf16 %v732_v47, %v722_v46  ;;  %v3417_v46 = vpack.c.bf16 %v915_v39, %v905_v38  ;;  %v914_v47 = vld [vmem:[#allocation5 + $0x1ab0] sm:$0xff] }
 0x12a   :  { %v3399_v16 = vpack.c.bf16 %v814_v50, %v804_v48  ;;  %v843_v48 = vld [vmem:[#allocation5 + $0x1878] sm:$0xff]  ;;  %v925_v50 = vld [vmem:[#allocation5 + $0x1b08] sm:$0xff]  ;;  %v922_v39 = vld [vmem:[#allocation5 + $0x1af0] sm:$0xff] }
 0x12b   :  { %3124 = vmatpush1.bf16.msra.mxu1 %v3123_v57  ;;  %2022 = vmatmul.mubr.f32.vlgmr.msra.gmra.mrb[2].mxu0 %v4197_v29  ;;  %v3387_v29 = vpack.c.bf16 %v754_v11, %v744_v9  ;;  %v3145_v57 = vpack.c.bf16 %v753_v52, %v743_v51  ;;  %v854_v9 = vld [vmem:[#allocation5 + $0x18d0] sm:$0xff]  ;;  %v793_v11 = vld [vmem:[#allocation5 + $0x16e8] sm:$0xff]  ;;  %v935_v51 = vld [vmem:[#allocation5 + $0x1b58] sm:$0xff] }
 0x12c   :  { %3380 = vmatpush1.bf16.msra.mxu0 %v3379_v58  ;;  %3126 = vmatprep.subr.bf16.mxu1 %v3125_v59  ;;  %v742_v58 = vld [vmem:[#allocation5 + $0x1550] sm:$0xff]  ;;  %v752_v59 = vld [vmem:[#allocation5 + $0x15a0] sm:$0xff]  ;;  %v3407_v14 = vpack.c.bf16 %v854_v9, %v844_v7  ;;  %v893_v7 = vld [vmem:[#allocation5 + $0x1a08] sm:$0xff] }
 0x12d   :  { %3382 = vmatprep.subr.bf16.mxu0 %v3381_v63  ;;  %2092 = vmatprep.mubr.f32.mxu0 %v4016_v13  ;;  %v763_v63 = vld [vmem:[#allocation5 + $0x15f8] sm:$0xff]  ;;  %v3147_v2 = vpack.c.bf16 %v752_v59, %v742_v58  ;;  %v934_v58 = vld [vmem:[#allocation5 + $0x1b50] sm:$0xff] }
 0x12e   :  { %v863_v59 = vld [vmem:[#allocation5 + $0x1918] sm:$0xff] }
 0x12f   :  { %3128 = vmatpush1.bf16.msra.mxu1 %v3127_v4  ;;  %v3149_v4 = vpack.c.bf16 %v773_v0, %v763_v63  ;;  %v3169_v30 = vpack.c.bf16 %v873_v60, %v863_v59  ;;  %v975_v9 = vld [vmem:[#allocation5 + $0x1c98] sm:$0xff] }
 0x130   :  { %3384 = vmatpush1.bf16.msra.mxu0 %v3383_v5  ;;  %3130 = vmatprep.subr.bf16.mxu1 %v3129_v6  ;;  %v762_v5 = vld [vmem:[#allocation5 + $0x15f0] sm:$0xff]  ;;  %v772_v6 = vld [vmem:[#allocation5 + $0x1640] sm:$0xff] }
 0x131   :  { %3386 = vmatprep.subr.bf16.mxu0 %v3385_v10  ;;  %v783_v10 = vld [vmem:[#allocation5 + $0x1698] sm:$0xff] }
 0x132   :  { %v3153_v15 = vpack.c.bf16 %v793_v11, %v783_v10 }
 0x133   :  { %3132 = vmatpush1.bf16.msra.mxu1 %v3131_v18  ;;  %v782_v18 = vld [vmem:[#allocation5 + $0x1690] sm:$0xff] }
 0x134   :  { %3388 = vmatpush1.bf16.msra.mxu0 %v3387_v29  ;;  %3134 = vmatprep.subr.bf16.mxu1 %v3133_v19  ;;  %v792_v29 = vld [vmem:[#allocation5 + $0x16e0] sm:$0xff] }
 0x135   :  { %3390 = vmatprep.subr.bf16.mxu0 %v3389_v23  ;;  %v864_v19 = vld [vmem:[#allocation5 + $0x1920] sm:$0xff]  ;;  %v813_v23 = vld [vmem:[#allocation5 + $0x1788] sm:$0xff]  ;;  %v3155_v26 = vpack.c.bf16 %v792_v29, %v782_v18  ;;  %v974_v18 = vld [vmem:[#allocation5 + $0x1c90] sm:$0xff] }
 0x136   :  { %v3411_v27 = vpack.c.bf16 %v874_v21, %v864_v19  ;;  %v3157_v28 = vpack.c.bf16 %v813_v23, %v803_v22  ;;  %v903_v29 = vld [vmem:[#allocation5 + $0x1a58] sm:$0xff]  ;;  %v913_v19 = vld [vmem:[#allocation5 + $0x1aa8] sm:$0xff] }
 0x137   :  { %3136 = vmatpush1.bf16.msra.mxu1 %v3135_v31  ;;  %v802_v31 = vld [vmem:[#allocation5 + $0x1730] sm:$0xff]  ;;  %v995_v21 = vld [vmem:[#allocation5 + $0x1d38] sm:$0xff]  ;;  %v3177_v24 = vpack.c.bf16 %v913_v19, %v903_v29  ;;  %v1085_v29 = vld [vmem:[#allocation5 + $0x2008] sm:$0xff] }
 0x138   :  { %3392 = vmatpush1.bf16.msra.mxu0 %v3391_v32  ;;  %3138 = vmatprep.subr.bf16.mxu1 %v3137_v33  ;;  %v812_v32 = vld [vmem:[#allocation5 + $0x1780] sm:$0xff]  ;;  %v1095_v19 = vld [vmem:[#allocation5 + $0x2058] sm:$0xff] }
 0x139   :  { %3394 = vmatprep.subr.bf16.mxu0 %v3393_v37  ;;  %v884_v33 = vld [vmem:[#allocation5 + $0x19c0] sm:$0xff]  ;;  %v833_v37 = vld [vmem:[#allocation5 + $0x1828] sm:$0xff]  ;;  %v3159_v40 = vpack.c.bf16 %v812_v32, %v802_v31  ;;  %v994_v31 = vld [vmem:[#allocation5 + $0x1d30] sm:$0xff] }
 0x13a   :  { %1738 = vmatmul.mubr.f32.vlgmr.msra.gmra.mrb[2].mxu1 %v4017_v53  ;;  %v3415_v41 = vpack.c.bf16 %v894_v35, %v884_v33  ;;  %v3161_v42 = vpack.c.bf16 %v833_v37, %v823_v36  ;;  %v923_v32 = vld [vmem:[#allocation5 + $0x1af8] sm:$0xff]  ;;  %v933_v33 = vld [vmem:[#allocation5 + $0x1b48] sm:$0xff] }
 0x13b   :  { %3140 = vmatpush1.bf16.msra.mxu1 %v3139_v43  ;;  %1808 = vmatprep.mubr.f32.mxu1 %v4016_v13  ;;  %v3151_v13 = vpack.c.bf16 %v772_v6, %v762_v5  ;;  %v822_v43 = vld [vmem:[#allocation5 + $0x17d0] sm:$0xff]  ;;  %v883_v6 = vld [vmem:[#allocation5 + $0x19b8] sm:$0xff]  ;;  %v3181_v38 = vpack.c.bf16 %v933_v33, %v923_v32  ;;  %v1105_v32 = vld [vmem:[#allocation5 + $0x20a8] sm:$0xff] }
 0x13c   :  { %3396 = vmatpush1.bf16.msra.mxu0 %v3395_v44  ;;  %3142 = vmatprep.subr.bf16.mxu1 %v3141_v45  ;;  %v832_v44 = vld [vmem:[#allocation5 + $0x1820] sm:$0xff]  ;;  %v954_v5 = vld [vmem:[#allocation5 + $0x1bf0] sm:$0xff]  ;;  %v3173_v12 = vpack.c.bf16 %v893_v7, %v883_v6  ;;  %v1015_v35 = vld [vmem:[#allocation5 + $0x1dd8] sm:$0xff] }
 0x13d   :  { %3398 = vmatprep.subr.bf16.mxu0 %v3397_v49  ;;  %v904_v45 = vld [vmem:[#allocation5 + $0x1a60] sm:$0xff]  ;;  %v853_v49 = vld [vmem:[#allocation5 + $0x18c8] sm:$0xff]  ;;  %v3163_v52 = vpack.c.bf16 %v832_v44, %v822_v43  ;;  %v1014_v43 = vld [vmem:[#allocation5 + $0x1dd0] sm:$0xff] }
 0x13e   :  { %v3419_v53 = vpack.c.bf16 %v914_v47, %v904_v45  ;;  %v3165_v54 = vpack.c.bf16 %v853_v49, %v843_v48  ;;  %v943_v44 = vld [vmem:[#allocation5 + $0x1b98] sm:$0xff]  ;;  %v953_v45 = vld [vmem:[#allocation5 + $0x1be8] sm:$0xff]  ;;  %v4205_v6 = vld [vmem:[#allocation2 + $0x20] sm:$0xff] }
 0x13f   :  { %3144 = vmatpush1.bf16.msra.mxu1 %v3143_v56  ;;  %v852_v56 = vld [vmem:[#allocation5 + $0x18c0] sm:$0xff]  ;;  %v1035_v47 = vld [vmem:[#allocation5 + $0x1e78] sm:$0xff] }
 0x140   :  { %3400 = vmatpush1.bf16.msra.mxu0 %v3399_v16  ;;  %3146 = vmatprep.subr.bf16.mxu1 %v3145_v57  ;;  %v924_v16 = vld [vmem:[#allocation5 + $0x1b00] sm:$0xff]  ;;  %v3421_v57 = vpack.c.bf16 %v935_v51, %v925_v50  ;;  %v3167_v63 = vpack.c.bf16 %v852_v56, %v842_v55  ;;  %v3185_v50 = vpack.c.bf16 %v953_v45, %v943_v44  ;;  %v942_v51 = vld [vmem:[#allocation5 + $0x1b90] sm:$0xff]  ;;  %v963_v56 = vld [vmem:[#allocation5 + $0x1c38] sm:$0xff] }
 0x141   :  { %3402 = vmatprep.subr.bf16.mxu0 %v3401_v61  ;;  %v945_v61 = vld [vmem:[#allocation5 + $0x1ba8] sm:$0xff]  ;;  %v3423_v0 = vpack.c.bf16 %v934_v58, %v924_v16  ;;  %v1034_v55 = vld [vmem:[#allocation5 + $0x1e70] sm:$0xff]  ;;  %v1055_v58 = vld [vmem:[#allocation5 + $0x1f18] sm:$0xff] }
 0x142   :  { %v973_v16 = vld [vmem:[#allocation5 + $0x1c88] sm:$0xff]  ;;  %v1115_v33 = vld [vmem:[#allocation5 + $0x20f8] sm:$0xff] }
 0x143   :  { %3148 = vmatpush1.bf16.msra.mxu1 %v3147_v2  ;;  %v872_v2 = vld [vmem:[#allocation5 + $0x1960] sm:$0xff]  ;;  %v1125_v44 = vld [vmem:[#allocation5 + $0x2148] sm:$0xff]  ;;  %v1135_v45 = vld [vmem:[#allocation5 + $0x2198] sm:$0xff] }
 0x144   :  { %3404 = vmatpush1.bf16.msra.mxu0 %v3403_v3  ;;  %3150 = vmatprep.subr.bf16.mxu1 %v3149_v4  ;;  %v944_v3 = vld [vmem:[#allocation5 + $0x1ba0] sm:$0xff]  ;;  %v3425_v4 = vpack.c.bf16 %v955_v62, %v945_v61  ;;  %v3171_v10 = vpack.c.bf16 %v872_v2, %v862_v1  ;;  %v3189_v61 = vpack.c.bf16 %v973_v16, %v963_v56  ;;  %v962_v62 = vld [vmem:[#allocation5 + $0x1c30] sm:$0xff]  ;;  %v983_v2 = vld [vmem:[#allocation5 + $0x1cd8] sm:$0xff] }
 0x145   :  { %3406 = vmatprep.subr.bf16.mxu0 %v3405_v8  ;;  %v965_v8 = vld [vmem:[#allocation5 + $0x1c48] sm:$0xff]  ;;  %v3427_v11 = vpack.c.bf16 %v954_v5, %v944_v3  ;;  %v1054_v1 = vld [vmem:[#allocation5 + $0x1f10] sm:$0xff]  ;;  %v1075_v5 = vld [vmem:[#allocation5 + $0x1fb8] sm:$0xff] }
 0x146   :  { %v993_v3 = vld [vmem:[#allocation5 + $0x1d28] sm:$0xff]  ;;  %v1155_v16 = vld [vmem:[#allocation5 + $0x2238] sm:$0xff] }
 0x147   :  { %3152 = vmatpush1.bf16.msra.mxu1 %v3151_v13  ;;  %v892_v13 = vld [vmem:[#allocation5 + $0x1a00] sm:$0xff]  ;;  %v1145_v56 = vld [vmem:[#allocation5 + $0x21e8] sm:$0xff] }
 0x148   :  { %3408 = vmatpush1.bf16.msra.mxu0 %v3407_v14  ;;  %3154 = vmatprep.subr.bf16.mxu1 %v3153_v15  ;;  %v964_v14 = vld [vmem:[#allocation5 + $0x1c40] sm:$0xff]  ;;  %v3429_v15 = vpack.c.bf16 %v975_v9, %v965_v8  ;;  %v3175_v22 = vpack.c.bf16 %v892_v13, %v882_v17  ;;  %v3193_v9 = vpack.c.bf16 %v993_v3, %v983_v2  ;;  %v1074_v13 = vld [vmem:[#allocation5 + $0x1fb0] sm:$0xff]  ;;  %v1165_v3 = vld [vmem:[#allocation5 + $0x2288] sm:$0xff] }
 0x149   :  { %3410 = vmatprep.subr.bf16.mxu0 %v3409_v20  ;;  %v985_v20 = vld [vmem:[#allocation5 + $0x1ce8] sm:$0xff]  ;;  %v3431_v23 = vpack.c.bf16 %v974_v18, %v964_v14  ;;  %v1003_v14 = vld [vmem:[#allocation5 + $0x1d78] sm:$0xff] }
 0x14a   :  { %v4019_v18 = vld [vmem:[#allocation2 + $0x38] sm:$0xff] }
 0x14b   :  { %3156 = vmatpush1.bf16.msra.mxu1 %v3155_v26  ;;  %v912_v26 = vld [vmem:[#allocation5 + $0x1aa0] sm:$0xff] }
 0x14c   :  { %3412 = vmatpush1.bf16.msra.mxu0 %v3411_v27  ;;  %3158 = vmatprep.subr.bf16.mxu1 %v3157_v28  ;;  %v984_v27 = vld [vmem:[#allocation5 + $0x1ce0] sm:$0xff]  ;;  %v3433_v28 = vpack.c.bf16 %v995_v21, %v985_v20  ;;  %v3179_v36 = vpack.c.bf16 %v912_v26, %v902_v25  ;;  %v3453_v26 = vpack.c.bf16 %v1095_v19, %v1085_v29  ;;  %v1195_v29 = vld [vmem:[#allocation5 + $0x2378] sm:$0xff] }
 0x14d   :  { %3414 = vmatprep.subr.bf16.mxu0 %v3413_v34  ;;  %v1005_v34 = vld [vmem:[#allocation5 + $0x1d88] sm:$0xff]  ;;  %v3435_v37 = vpack.c.bf16 %v994_v31, %v984_v27  ;;  %v1084_v25 = vld [vmem:[#allocation5 + $0x2000] sm:$0xff]  ;;  %v1094_v27 = vld [vmem:[#allocation5 + $0x2050] sm:$0xff] }
 0x14e   :  { %v1033_v31 = vld [vmem:[#allocation5 + $0x1e68] sm:$0xff] }
 0x14f   :  { %3160 = vmatpush1.bf16.msra.mxu1 %v3159_v40  ;;  %v932_v40 = vld [vmem:[#allocation5 + $0x1b40] sm:$0xff] }
 0x150   :  { %3416 = vmatpush1.bf16.msra.mxu0 %v3415_v41  ;;  %3162 = vmatprep.subr.bf16.mxu1 %v3161_v42  ;;  %v1004_v41 = vld [vmem:[#allocation5 + $0x1d80] sm:$0xff]  ;;  %v3437_v42 = vpack.c.bf16 %v1015_v35, %v1005_v34  ;;  %v3183_v48 = vpack.c.bf16 %v932_v40, %v922_v39  ;;  %v3455_v35 = vpack.c.bf16 %v1094_v27, %v1084_v25  ;;  %v1194_v27 = vld [vmem:[#allocation5 + $0x2370] sm:$0xff] }
 0x151   :  { %3418 = vmatprep.subr.bf16.mxu0 %v3417_v46  ;;  %v1025_v46 = vld [vmem:[#allocation5 + $0x1e28] sm:$0xff]  ;;  %v3439_v49 = vpack.c.bf16 %v1014_v43, %v1004_v41  ;;  %v1104_v39 = vld [vmem:[#allocation5 + $0x20a0] sm:$0xff]  ;;  %v3457_v40 = vpack.c.bf16 %v1115_v33, %v1105_v32  ;;  %v1114_v41 = vld [vmem:[#allocation5 + $0x20f0] sm:$0xff] }
 0x152   :  { %v1053_v43 = vld [vmem:[#allocation5 + $0x1f08] sm:$0xff]  ;;  %v1184_v25 = vld [vmem:[#allocation5 + $0x2320] sm:$0xff] }
 0x153   :  { %3164 = vmatpush1.bf16.msra.mxu1 %v3163_v52  ;;  %v952_v52 = vld [vmem:[#allocation5 + $0x1be0] sm:$0xff]  ;;  %v1205_v33 = vld [vmem:[#allocation5 + $0x23c8] sm:$0xff] }
 0x154   :  { %3420 = vmatpush1.bf16.msra.mxu0 %v3419_v53  ;;  %3166 = vmatprep.subr.bf16.mxu1 %v3165_v54  ;;  %v1024_v53 = vld [vmem:[#allocation5 + $0x1e20] sm:$0xff]  ;;  %v3441_v54 = vpack.c.bf16 %v1035_v47, %v1025_v46  ;;  %v3187_v59 = vpack.c.bf16 %v952_v52, %v942_v51  ;;  %v3459_v47 = vpack.c.bf16 %v1114_v41, %v1104_v39 }
 0x155   :  { %3422 = vmatprep.subr.bf16.mxu0 %v3421_v57  ;;  %v1045_v57 = vld [vmem:[#allocation5 + $0x1ec8] sm:$0xff]  ;;  %v3443_v60 = vpack.c.bf16 %v1034_v55, %v1024_v53  ;;  %v1124_v51 = vld [vmem:[#allocation5 + $0x2140] sm:$0xff]  ;;  %v3461_v52 = vpack.c.bf16 %v1135_v45, %v1125_v44  ;;  %v1134_v53 = vld [vmem:[#allocation5 + $0x2190] sm:$0xff] }
 0x156   :  { %v1073_v55 = vld [vmem:[#allocation5 + $0x1fa8] sm:$0xff]  ;;  %v1132_v41 = vld [vmem:[#allocation5 + $0x2180] sm:$0xff]  ;;  %v1214_v44 = vld [vmem:[#allocation5 + $0x2410] sm:$0xff] }
 0x157   :  { %3168 = vmatpush1.bf16.msra.mxu1 %v3167_v63  ;;  %v972_v63 = vld [vmem:[#allocation5 + $0x1c80] sm:$0xff]  ;;  %v1143_v45 = vld [vmem:[#allocation5 + $0x21d8] sm:$0xff] }
 0x158   :  { %3424 = vmatpush1.bf16.msra.mxu0 %v3423_v0  ;;  %3170 = vmatprep.subr.bf16.mxu1 %v3169_v30  ;;  %v1044_v0 = vld [vmem:[#allocation5 + $0x1ec0] sm:$0xff]  ;;  %v3445_v30 = vpack.c.bf16 %v1055_v58, %v1045_v57  ;;  %v3191_v7 = vpack.c.bf16 %v972_v63, %v962_v62  ;;  %v3463_v58 = vpack.c.bf16 %v1134_v53, %v1124_v51 }
 0x159   :  { %3426 = vmatprep.subr.bf16.mxu0 %v3425_v4  ;;  %v1065_v4 = vld [vmem:[#allocation5 + $0x1f68] sm:$0xff]  ;;  %v3447_v8 = vpack.c.bf16 %v1054_v1, %v1044_v0  ;;  %v1144_v62 = vld [vmem:[#allocation5 + $0x21e0] sm:$0xff]  ;;  %v3465_v63 = vpack.c.bf16 %v1155_v16, %v1145_v56  ;;  %v1154_v0 = vld [vmem:[#allocation5 + $0x2230] sm:$0xff] }
 0x15a   :  { %v3449_v17 = vpack.c.bf16 %v1075_v5, %v1065_v4  ;;  %v1093_v1 = vld [vmem:[#allocation5 + $0x2048] sm:$0xff]  ;;  %v1175_v4 = vld [vmem:[#allocation5 + $0x22d8] sm:$0xff]  ;;  %v1264_v5 = vlaneseq  ;;  %v1224_v56 = vld [vmem:[#allocation5 + $0x2460] sm:$0xff] }
 0x15b   :  { %3172 = vmatpush1.bf16.msra.mxu1 %v3171_v10  ;;  %v982_v10 = vld [vmem:[#allocation5 + $0x1cd0] sm:$0xff] }
 0x15c   :  { %3428 = vmatpush1.bf16.msra.mxu0 %v3427_v11  ;;  %3174 = vmatprep.subr.bf16.mxu1 %v3173_v12  ;;  %v992_v11 = vld [vmem:[#allocation5 + $0x1d20] sm:$0xff]  ;;  %v4215_v19 = vshrl.u32 %v1264_v5, 7 }
 0x15d   :  { %3430 = vmatprep.subr.bf16.mxu0 %v3429_v15  ;;  %v1064_v12 = vld [vmem:[#allocation5 + $0x1f60] sm:$0xff]  ;;  %v1013_v15 = vld [vmem:[#allocation5 + $0x1dc8] sm:$0xff]  ;;  %v3195_v20 = vpack.c.bf16 %v992_v11, %v982_v10  ;;  %v1082_v10 = vld [vmem:[#allocation5 + $0x1ff0] sm:$0xff] }
 0x15e   :  { %v3451_v21 = vpack.c.bf16 %v1074_v13, %v1064_v12  ;;  %v1092_v11 = vld [vmem:[#allocation5 + $0x2040] sm:$0xff]  ;;  %v1174_v13 = vld [vmem:[#allocation5 + $0x22d0] sm:$0xff]  ;;  %v1266_v32 = vsub.s32 0, %v4215_v19 }
 0x15f   :  { %3176 = vmatpush1.bf16.msra.mxu1 %v3175_v22  ;;  %v3197_v22 = vpack.c.bf16 %v1013_v15, %v1003_v14  ;;  %v1164_v12 = vld [vmem:[#allocation5 + $0x2280] sm:$0xff]  ;;  %v1103_v14 = vld [vmem:[#allocation5 + $0x2098] sm:$0xff]  ;;  %v1113_v15 = vld [vmem:[#allocation5 + $0x20e8] sm:$0xff] }
 0x160   :  { %3432 = vmatpush1.bf16.msra.mxu0 %v3431_v23  ;;  %3178 = vmatprep.subr.bf16.mxu1 %v3177_v24  ;;  %v1002_v23 = vld [vmem:[#allocation5 + $0x1d70] sm:$0xff]  ;;  %v1012_v24 = vld [vmem:[#allocation5 + $0x1dc0] sm:$0xff] }
 0x161   :  { %3434 = vmatprep.subr.bf16.mxu0 %v3433_v28  ;;  %v1023_v28 = vld [vmem:[#allocation5 + $0x1e18] sm:$0xff]  ;;  %v3199_v34 = vpack.c.bf16 %v1012_v24, %v1002_v23  ;;  %v1102_v23 = vld [vmem:[#allocation5 + $0x2090] sm:$0xff]  ;;  %v1112_v24 = vld [vmem:[#allocation5 + $0x20e0] sm:$0xff] }
 0x163   :  { %3180 = vmatpush1.bf16.msra.mxu1 %v3179_v36  ;;  %v3201_v36 = vpack.c.bf16 %v1033_v31, %v1023_v28  ;;  %v1123_v28 = vld [vmem:[#allocation5 + $0x2138] sm:$0xff]  ;;  %v1133_v31 = vld [vmem:[#allocation5 + $0x2188] sm:$0xff] }
 0x164   :  { %3436 = vmatpush1.bf16.msra.mxu0 %v3435_v37  ;;  %3182 = vmatprep.subr.bf16.mxu1 %v3181_v38  ;;  %v1022_v37 = vld [vmem:[#allocation5 + $0x1e10] sm:$0xff]  ;;  %v1032_v38 = vld [vmem:[#allocation5 + $0x1e60] sm:$0xff]  ;;  %v3221_v39 = vpack.c.bf16 %v1133_v31, %v1123_v28 }
 0x165   :  { %3438 = vmatprep.subr.bf16.mxu0 %v3437_v42  ;;  %v1043_v42 = vld [vmem:[#allocation5 + $0x1eb8] sm:$0xff]  ;;  %v3203_v46 = vpack.c.bf16 %v1032_v38, %v1022_v37  ;;  %v1270_v37 = vsub.s32 1, %v4215_v19  ;;  %v3475_v38 = vpack.c.bf16 %v1194_v27, %v1184_v25  ;;  %v1213_v25 = vld [vmem:[#allocation5 + $0x2408] sm:$0xff] }
 0x166   :  { %v99_v27 = vld [vmem:[#allocation5 + $0x138] sm:$0xff] }
 0x167   :  { %3184 = vmatpush1.bf16.msra.mxu1 %v3183_v48  ;;  %v3205_v48 = vpack.c.bf16 %v1053_v43, %v1043_v42  ;;  %v1204_v42 = vld [vmem:[#allocation5 + $0x23c0] sm:$0xff] }
 0x168   :  { %3440 = vmatpush1.bf16.msra.mxu0 %v3439_v49  ;;  %3186 = vmatprep.subr.bf16.mxu1 %v3185_v50  ;;  %v1042_v49 = vld [vmem:[#allocation5 + $0x1eb0] sm:$0xff]  ;;  %v1052_v50 = vld [vmem:[#allocation5 + $0x1f00] sm:$0xff] }
 0x169   :  { %3442 = vmatprep.subr.bf16.mxu0 %v3441_v54  ;;  %v1063_v54 = vld [vmem:[#allocation5 + $0x1f58] sm:$0xff]  ;;  %v3207_v57 = vpack.c.bf16 %v1052_v50, %v1042_v49 }
 0x16a   :  { %v1235_v49 = vld [vmem:[#allocation5 + $0x24b8] sm:$0xff] }
 0x16b   :  { %3188 = vmatpush1.bf16.msra.mxu1 %v3187_v59  ;;  %2093 = vmatmul.mubr.f32.vlgmr.msra.gmra.mrb[2].mxu0 %v4205_v6  ;;  %v3209_v59 = vpack.c.bf16 %v1073_v55, %v1063_v54  ;;  %v1142_v54 = vld [vmem:[#allocation5 + $0x21d0] sm:$0xff]  ;;  %v1152_v55 = vld [vmem:[#allocation5 + $0x2220] sm:$0xff] }
 0x16c   :  { %3444 = vmatpush1.bf16.msra.mxu0 %v3443_v60  ;;  %3190 = vmatprep.subr.bf16.mxu1 %v3189_v61  ;;  %v1062_v60 = vld [vmem:[#allocation5 + $0x1f50] sm:$0xff]  ;;  %v1072_v61 = vld [vmem:[#allocation5 + $0x1fa0] sm:$0xff] }
 0x16d   :  { %3446 = vmatprep.subr.bf16.mxu0 %v3445_v30  ;;  %2766 = vmatprep.mubr.msk.f32.mxu0 %vm1314_vm0, %v4019_v18  ;;  %v1083_v30 = vld [vmem:[#allocation5 + $0x1ff8] sm:$0xff] }
 0x16f   :  { %3192 = vmatpush1.bf16.msra.mxu1 %v3191_v7  ;;  %v3211_v7 = vpack.c.bf16 %v1072_v61, %v1062_v60  ;;  %v1173_v60 = vld [vmem:[#allocation5 + $0x22c8] sm:$0xff] }
 0x170   :  { %3448 = vmatpush1.bf16.msra.mxu0 %v3447_v8  ;;  %3194 = vmatprep.subr.bf16.mxu1 %v3193_v9  ;;  %v3467_v8 = vpack.c.bf16 %v1154_v0, %v1144_v62  ;;  %v3213_v9 = vpack.c.bf16 %v1093_v1, %v1083_v30  ;;  %v1255_v0 = vld [vmem:[#allocation5 + $0x2558] sm:$0xff]  ;;  %v3227_v1 = vpack.c.bf16 %v1152_v55, %v1142_v54  ;;  %v1253_v54 = vld [vmem:[#allocation5 + $0x2548] sm:$0xff] }
 0x171   :  { %3450 = vmatprep.subr.bf16.mxu0 %v3449_v17  ;;  %v3469_v17 = vpack.c.bf16 %v1175_v4, %v1165_v3  ;;  %v4021_v55 = vld [vmem:[#allocation2 + $0x8] sm:$0xff] }
 0x173   :  { %3196 = vmatpush1.bf16.msra.mxu1 %v3195_v20  ;;  %v3215_v20 = vpack.c.bf16 %v1092_v11, %v1082_v10 }
 0x174   :  { %3452 = vmatpush1.bf16.msra.mxu0 %v3451_v21  ;;  %3198 = vmatprep.subr.bf16.mxu1 %v3197_v22  ;;  %v3471_v21 = vpack.c.bf16 %v1174_v13, %v1164_v12  ;;  %v3217_v22 = vpack.c.bf16 %v1113_v15, %v1103_v14  ;;  %v1254_v12 = vld [vmem:[#allocation5 + $0x2550] sm:$0xff]  ;;  %v1193_v13 = vld [vmem:[#allocation5 + $0x2368] sm:$0xff]  ;;  %v79_v15 = vld [vmem:[#allocation5 + $0x98] sm:$0xff] }
 0x175   :  { %3454 = vmatprep.subr.bf16.mxu0 %v3453_v26  ;;  %v69_v14 = vld [vmem:[#allocation5 + $0x48] sm:$0xff] }
 0x177   :  { %3200 = vmatpush1.bf16.msra.mxu1 %v3199_v34  ;;  %v1215_v34 = vld [vmem:[#allocation5 + $0x2418] sm:$0xff] }
 0x178   :  { %3456 = vmatpush1.bf16.msra.mxu0 %v3455_v35  ;;  %3202 = vmatprep.subr.bf16.mxu1 %v3201_v36  ;;  %v3219_v35 = vpack.c.bf16 %v1112_v24, %v1102_v23  ;;  %v1260_v36 = vld [vmem:[#allocation7] sm:$0xff]  ;;  %v3477_v43 = vpack.c.bf16 %v1215_v34, %v1205_v33  ;;  %v78_v23 = vld [vmem:[#allocation5 + $0x90] sm:$0xff]  ;;  %v1203_v24 = vld [vmem:[#allocation5 + $0x23b8] sm:$0xff] }
 0x179   :  { %3458 = vmatprep.subr.bf16.mxu0 %v3457_v40  ;;  %v1122_v40 = vld [vmem:[#allocation5 + $0x2130] sm:$0xff]  ;;  %v1271_v50 = vrot.slane %v1260_v36, %v1270_v37  ;;  %v3237_v33 = vpack.c.bf16 %v1213_v25, %v1203_v24  ;;  %v107_v25 = vld [vmem:[#allocation5 + $0x178] sm:$0xff] }
 0x17a   :  { %1809 = vmatmul.mubr.f32.vlgmr.msra.gmra.mrb[2].mxu1 %v4205_v6  ;;  %v3223_v51 = vpack.c.bf16 %v1132_v41, %v1122_v40  ;;  %v1202_v34 = vld [vmem:[#allocation5 + $0x23b0] sm:$0xff]  ;;  %v1223_v40 = vld [vmem:[#allocation5 + $0x2458] sm:$0xff]  ;;  %v1233_v41 = vld [vmem:[#allocation5 + $0x24a8] sm:$0xff] }
 0x17b   :  { %3204 = vmatpush1.bf16.msra.mxu1 %v3203_v46  ;;  %2765 = vmatprep.mubr.msk.f32.mxu1 %vm1314_vm0, %v4019_v18  ;;  %v1185_v18 = vld [vmem:[#allocation5 + $0x2328] sm:$0xff]  ;;  %v178_v24 = vld [vmem:[#allocation5 + $0x3b0] sm:$0xff] }
 0x17c   :  { %3460 = vmatpush1.bf16.msra.mxu0 %v3459_v47  ;;  %3206 = vmatprep.subr.bf16.mxu1 %v3205_v48  ;;  %v3473_v26 = vpack.c.bf16 %v1195_v29, %v1185_v18  ;;  %v1153_v46 = vld [vmem:[#allocation5 + $0x2228] sm:$0xff]  ;;  %v1267_v47 = vrot.slane %v1260_v36, %v1266_v32  ;;  %v88_v36 = vld [vmem:[#allocation5 + $0xe0] sm:$0xff] }
 0x17d   :  { %3462 = vmatprep.subr.bf16.mxu0 %v3461_v52  ;;  %v1225_v48 = vld [vmem:[#allocation5 + $0x2468] sm:$0xff]  ;;  %v3479_v52 = vpack.c.bf16 %v1214_v44, %v1204_v42  ;;  %v3225_v53 = vpack.c.bf16 %v1153_v46, %v1143_v45  ;;  %v4225_v44 = vld [vmem:[#allocation2 + $0x30] sm:$0xff] }
 0x17e   :  { %v4211_v2 = vpop.f32.mrb[0].mxu0  ;;  %v109_v42 = vld [vmem:[#allocation5 + $0x188] sm:$0xff] }
 0x17f   :  { %v4213_v6 = vpop.f32.mrb[1].mxu0  ;;  %3208 = vmatpush1.bf16.msra.mxu1 %v3207_v57  ;;  %v3481_v57 = vpack.c.bf16 %v1235_v49, %v1225_v48  ;;  %v1222_v48 = vld [vmem:[#allocation5 + $0x2450] sm:$0xff]  ;;  %v1232_v49 = vld [vmem:[#allocation5 + $0x24a0] sm:$0xff] }
 0x180   :  { %3464 = vmatpush1.bf16.msra.mxu0 %v3463_v58  ;;  %3210 = vmatprep.subr.bf16.mxu1 %v3209_v59  ;;  %v1234_v58 = vld [vmem:[#allocation5 + $0x24b0] sm:$0xff]  ;;  %v1163_v59 = vld [vmem:[#allocation5 + $0x2278] sm:$0xff] }
 0x181   :  { %3466 = vmatprep.subr.bf16.mxu0 %v3465_v63  ;;  %v1245_v63 = vld [vmem:[#allocation5 + $0x2508] sm:$0xff]  ;;  %v3483_v4 = vpack.c.bf16 %v1234_v58, %v1224_v56  ;;  %v3229_v5 = vpack.c.bf16 %v1173_v60, %v1163_v59  ;;  %v1242_v60 = vld [vmem:[#allocation5 + $0x24f0] sm:$0xff] }
 0x182   :  { %v3485_v11 = vpack.c.bf16 %v1255_v0, %v1245_v63  ;;  %v129_v56 = vld [vmem:[#allocation5 + $0x228] sm:$0xff]  ;;  %v138_v0 = vld [vmem:[#allocation5 + $0x270] sm:$0xff] }
 0x183   :  { %3212 = vmatpush1.bf16.msra.mxu1 %v3211_v7  ;;  %v1162_v7 = vld [vmem:[#allocation5 + $0x2270] sm:$0xff] }
 0x184   :  { %3468 = vmatpush1.bf16.msra.mxu0 %v3467_v8  ;;  %3214 = vmatprep.subr.bf16.mxu1 %v3213_v9  ;;  %v1172_v8 = vld [vmem:[#allocation5 + $0x22c0] sm:$0xff] }
 0x185   :  { %3470 = vmatprep.subr.bf16.mxu0 %v3469_v17  ;;  %v1244_v9 = vld [vmem:[#allocation5 + $0x2500] sm:$0xff]  ;;  %v1183_v17 = vld [vmem:[#allocation5 + $0x2318] sm:$0xff] }
 0x186   :  { %v3487_v18 = vpack.c.bf16 %v1254_v12, %v1244_v9  ;;  %v3233_v29 = vpack.c.bf16 %v1193_v13, %v1183_v17  ;;  %v66_v9 = vld [vmem:[#allocation5 + $0x30] sm:$0xff]  ;;  %v87_v13 = vld [vmem:[#allocation5 + $0xd8] sm:$0xff] }
 0x187   :  { %3216 = vmatpush1.bf16.msra.mxu1 %v3215_v20  ;;  %v1182_v20 = vld [vmem:[#allocation5 + $0x2310] sm:$0xff] }
 0x188   :  { %3472 = vmatpush1.bf16.msra.mxu0 %v3471_v21  ;;  %3218 = vmatprep.subr.bf16.mxu1 %v3217_v22  ;;  %v1192_v21 = vld [vmem:[#allocation5 + $0x2360] sm:$0xff]  ;;  %v158_v17 = vld [vmem:[#allocation5 + $0x310] sm:$0xff] }
 0x189   :  { %3474 = vmatprep.subr.bf16.mxu0 %v3473_v26  ;;  %v68_v22 = vld [vmem:[#allocation5 + $0x40] sm:$0xff]  ;;  %v89_v26 = vld [vmem:[#allocation5 + $0xe8] sm:$0xff]  ;;  %v3235_v28 = vpack.c.bf16 %v1192_v21, %v1182_v20  ;;  %v86_v21 = vld [vmem:[#allocation5 + $0xd0] sm:$0xff] }
 0x18a   :  { %v3731_v31 = vpack.c.bf16 %v78_v23, %v68_v22  ;;  %v96_v22 = vld [vmem:[#allocation5 + $0x120] sm:$0xff] }
 0x18b   :  { %3220 = vmatpush1.bf16.msra.mxu1 %v3219_v35  ;;  %v1212_v35 = vld [vmem:[#allocation5 + $0x2400] sm:$0xff] }
 0x18c   :  { %3476 = vmatpush1.bf16.msra.mxu0 %v3475_v38  ;;  %3222 = vmatprep.subr.bf16.mxu1 %v3221_v39  ;;  %v3733_v38 = vpack.c.bf16 %v99_v27, %v89_v26  ;;  %v98_v39 = vld [vmem:[#allocation5 + $0x130] sm:$0xff]  ;;  %v3239_v45 = vpack.c.bf16 %v1212_v35, %v1202_v34  ;;  %v117_v26 = vld [vmem:[#allocation5 + $0x1c8] sm:$0xff] }
 0x18d   :  { %v1455_v16 = vpop.f32.mrb[0].mxu1  ;;  %3478 = vmatprep.subr.bf16.mxu0 %v3477_v43  ;;  %v119_v43 = vld [vmem:[#allocation5 + $0x1d8] sm:$0xff]  ;;  %v3735_v46 = vpack.c.bf16 %v98_v39, %v88_v36  ;;  %v189_v27 = vld [vmem:[#allocation5 + $0x408] sm:$0xff]  ;;  %v3497_v34 = vpack.c.bf16 %v117_v26, %v107_v25  ;;  %v106_v35 = vld [vmem:[#allocation5 + $0x170] sm:$0xff] }
 0x18e   :  { %v3969_v61 = vadd.f32 %v1455_v16, %v1267_v47  ;;  %v1457_v62 = vpop.f32.mrb[1].mxu1  ;;  %v3241_v47 = vpack.c.bf16 %v1233_v41, %v1223_v40  ;;  %v139_v16 = vld [vmem:[#allocation5 + $0x278] sm:$0xff]  ;;  %v116_v36 = vld [vmem:[#allocation5 + $0x1c0] sm:$0xff]  ;;  %v198_v40 = vld [vmem:[#allocation5 + $0x450] sm:$0xff] }
 0x18f   :  { %v3971_v30 = vadd.f32 %v1457_v62, %v1271_v50  ;;  %3224 = vmatpush1.bf16.msra.mxu1 %v3223_v51  ;;  %v108_v50 = vld [vmem:[#allocation5 + $0x180] sm:$0xff]  ;;  %v3737_v51 = vpack.c.bf16 %v119_v43, %v109_v42  ;;  %v3741_v63 = vpack.c.bf16 %v139_v16, %v129_v56  ;;  %v127_v41 = vld [vmem:[#allocation5 + $0x218] sm:$0xff]  ;;  %v137_v42 = vld [vmem:[#allocation5 + $0x268] sm:$0xff] }
 0x190   :  { %v3970_v3 = vadd.f32 %v3969_v61, %v4211_v2  ;;  %3480 = vmatpush1.bf16.msra.mxu0 %v3479_v52  ;;  %3226 = vmatprep.subr.bf16.mxu1 %v3225_v53  ;;  %v3231_v2 = vpack.c.bf16 %v1172_v8, %v1162_v7  ;;  %v118_v52 = vld [vmem:[#allocation5 + $0x1d0] sm:$0xff]  ;;  %v1243_v53 = vld [vmem:[#allocation5 + $0x24f8] sm:$0xff]  ;;  %v1252_v61 = vld [vmem:[#allocation5 + $0x2540] sm:$0xff] }
 0x191   :  { %v3972_v10 = vadd.f32 %v3971_v30, %v4213_v6  ;;  %3482 = vmatprep.subr.bf16.mxu0 %v3481_v57  ;;  %v3729_v6 = vpack.c.bf16 %v79_v15, %v69_v14  ;;  %v3243_v57 = vpack.c.bf16 %v1232_v49, %v1222_v48  ;;  %v3739_v58 = vpack.c.bf16 %v118_v52, %v108_v50  ;;  %v128_v62 = vld [vmem:[#allocation5 + $0x220] sm:$0xff]  ;;  %v67_v30 = vld [vmem:[#allocation5 + $0x38] sm:$0xff]  ;;  %v97_v14 = vld [vmem:[#allocation5 + $0x128] sm:$0xff] }
 0x192   :  { %2738 = vst [vmem:[#allocation8] sm:$0xff] %v3970_v3  ;;  %v3245_v59 = vpack.c.bf16 %v1253_v54, %v1243_v53  ;;  %v149_v3 = vld [vmem:[#allocation5 + $0x2c8] sm:$0xff]  ;;  %v3743_v7 = vpack.c.bf16 %v138_v0, %v128_v62  ;;  %v3493_v20 = vpack.c.bf16 %v97_v14, %v87_v13  ;;  %v126_v48 = vld [vmem:[#allocation5 + $0x210] sm:$0xff]  ;;  %v136_v49 = vld [vmem:[#allocation5 + $0x260] sm:$0xff] }
 0x193   :  { %2739 = vst [vmem:[#allocation8 + $0x8] sm:$0xff] %v3972_v10  ;;  %3228 = vmatpush1.bf16.msra.mxu1 %v3227_v1  ;;  %v77_v1 = vld [vmem:[#allocation5 + $0x88] sm:$0xff]  ;;  %v76_v10 = vld [vmem:[#allocation5 + $0x80] sm:$0xff]  ;;  %v218_v52 = vld [vmem:[#allocation5 + $0x4f0] sm:$0xff]  ;;  %v3503_v16 = vpack.c.bf16 %v136_v49, %v126_v48 }
 0x194   :  { %3484 = vmatpush1.bf16.msra.mxu0 %v3483_v4  ;;  %3230 = vmatprep.subr.bf16.mxu1 %v3229_v5  ;;  %v159_v4 = vld [vmem:[#allocation5 + $0x318] sm:$0xff]  ;;  %v3247_v5 = vpack.c.bf16 %v1252_v61, %v1242_v60  ;;  %v3489_v8 = vpack.c.bf16 %v77_v1, %v67_v30  ;;  %v169_v15 = vld [vmem:[#allocation5 + $0x368] sm:$0xff]  ;;  %v208_v50 = vld [vmem:[#allocation5 + $0x4a0] sm:$0xff] }
 0x195   :  { %3486 = vmatprep.subr.bf16.mxu0 %v3485_v11  ;;  %v148_v11 = vld [vmem:[#allocation5 + $0x2c0] sm:$0xff]  ;;  %v3745_v12 = vpack.c.bf16 %v159_v4, %v149_v3  ;;  %v209_v43 = vld [vmem:[#allocation5 + $0x4a8] sm:$0xff]  ;;  %v147_v53 = vld [vmem:[#allocation5 + $0x2b8] sm:$0xff] }
 0x196   :  { %v157_v54 = vld [vmem:[#allocation5 + $0x308] sm:$0xff]  ;;  %v239_v56 = vld [vmem:[#allocation5 + $0x598] sm:$0xff]  ;;  %v156_v60 = vld [vmem:[#allocation5 + $0x300] sm:$0xff] }
 0x197   :  { %3232 = vmatpush1.bf16.msra.mxu1 %v3231_v2  ;;  %v179_v2 = vld [vmem:[#allocation5 + $0x3b8] sm:$0xff]  ;;  %v228_v61 = vld [vmem:[#allocation5 + $0x540] sm:$0xff]  ;;  %v177_v30 = vld [vmem:[#allocation5 + $0x3a8] sm:$0xff] }
 0x198   :  { %3488 = vmatpush1.bf16.msra.mxu0 %v3487_v18  ;;  %3234 = vmatprep.subr.bf16.mxu1 %v3233_v29  ;;  %v3491_v18 = vpack.c.bf16 %v76_v10, %v66_v9  ;;  %v3747_v29 = vpack.c.bf16 %v158_v17, %v148_v11  ;;  %v3749_v23 = vpack.c.bf16 %v179_v2, %v169_v15  ;;  %v167_v0 = vld [vmem:[#allocation5 + $0x358] sm:$0xff]  ;;  %v249_v1 = vld [vmem:[#allocation5 + $0x5e8] sm:$0xff]  ;;  %v176_v9 = vld [vmem:[#allocation5 + $0x3a0] sm:$0xff] }
 0x199   :  { %3730 = vmatprep.subr.bf16.mxu0 %v3729_v6  ;;  %v168_v6 = vld [vmem:[#allocation5 + $0x360] sm:$0xff]  ;;  %v259_v3 = vld [vmem:[#allocation5 + $0x638] sm:$0xff]  ;;  %v197_v13 = vld [vmem:[#allocation5 + $0x448] sm:$0xff] }
 0x19a   :  { %v248_v10 = vld [vmem:[#allocation5 + $0x5e0] sm:$0xff]  ;;  %v3765_v11 = vpack.c.bf16 %v259_v3, %v249_v1  ;;  %v187_v17 = vld [vmem:[#allocation5 + $0x3f8] sm:$0xff]  ;;  %v269_v14 = vld [vmem:[#allocation5 + $0x688] sm:$0xff] }
 0x19b   :  { %2164 = vmatmul.mubr.f32.vlgmr.msra.gmra.mrb[2].mxu0 %v4225_v44  ;;  %3236 = vmatpush1.bf16.msra.mxu1 %v3235_v28  ;;  %v199_v28 = vld [vmem:[#allocation5 + $0x458] sm:$0xff]  ;;  %v217_v25 = vld [vmem:[#allocation5 + $0x4e8] sm:$0xff]  ;;  %v236_v48 = vld [vmem:[#allocation5 + $0x580] sm:$0xff] }
 0x19c   :  { %3732 = vmatpush1.bf16.msra.mxu0 %v3731_v31  ;;  %3238 = vmatprep.subr.bf16.mxu1 %v3237_v33  ;;  %v3495_v31 = vpack.c.bf16 %v96_v22, %v86_v21  ;;  %v3751_v33 = vpack.c.bf16 %v178_v24, %v168_v6  ;;  %v3753_v39 = vpack.c.bf16 %v199_v28, %v189_v27  ;;  %v279_v15 = vld [vmem:[#allocation5 + $0x6d8] sm:$0xff]  ;;  %v196_v21 = vld [vmem:[#allocation5 + $0x440] sm:$0xff]  ;;  %v289_v26 = vld [vmem:[#allocation5 + $0x728] sm:$0xff] }
 0x19d   :  { %3734 = vmatprep.subr.bf16.mxu0 %v3733_v38  ;;  %2518 = vmatprep.mubr.f32.mxu0 %v4021_v55  ;;  %v188_v38 = vld [vmem:[#allocation5 + $0x400] sm:$0xff]  ;;  %v3769_v6 = vpack.c.bf16 %v279_v15, %v269_v14  ;;  %v207_v24 = vld [vmem:[#allocation5 + $0x498] sm:$0xff] }
 0x19e   :  { %v268_v22 = vld [vmem:[#allocation5 + $0x680] sm:$0xff]  ;;  %v299_v27 = vld [vmem:[#allocation5 + $0x778] sm:$0xff] }
 0x19f   :  { %3240 = vmatpush1.bf16.msra.mxu1 %v3239_v45  ;;  %v219_v45 = vld [vmem:[#allocation5 + $0x4f8] sm:$0xff]  ;;  %v308_v49 = vld [vmem:[#allocation5 + $0x7c0] sm:$0xff] }
 0x1a0   :  { %3736 = vmatpush1.bf16.msra.mxu0 %v3735_v46  ;;  %3242 = vmatprep.subr.bf16.mxu1 %v3241_v47  ;;  %v3755_v46 = vpack.c.bf16 %v198_v40, %v188_v38  ;;  %v3501_v47 = vpack.c.bf16 %v137_v42, %v127_v41  ;;  %v3773_v38 = vpack.c.bf16 %v299_v27, %v289_v26  ;;  %v227_v40 = vld [vmem:[#allocation5 + $0x538] sm:$0xff]  ;;  %v237_v41 = vld [vmem:[#allocation5 + $0x588] sm:$0xff] }
 0x1a1   :  { %3738 = vmatprep.subr.bf16.mxu0 %v3737_v51  ;;  %v3757_v51 = vpack.c.bf16 %v219_v45, %v209_v43  ;;  %v309_v42 = vld [vmem:[#allocation5 + $0x7c8] sm:$0xff]  ;;  %v319_v43 = vld [vmem:[#allocation5 + $0x818] sm:$0xff] }
 0x1a2   :  { %v359_v1 = vld [vmem:[#allocation5 + $0x958] sm:$0xff] }
 0x1a3   :  { %3244 = vmatpush1.bf16.msra.mxu1 %v3243_v57  ;;  %v3759_v57 = vpack.c.bf16 %v218_v52, %v208_v50  ;;  %v3777_v50 = vpack.c.bf16 %v319_v43, %v309_v42  ;;  %v247_v52 = vld [vmem:[#allocation5 + $0x5d8] sm:$0xff] }
 0x1a4   :  { %3740 = vmatpush1.bf16.msra.mxu0 %v3739_v58  ;;  %3246 = vmatprep.subr.bf16.mxu1 %v3245_v59  ;;  %v3505_v58 = vpack.c.bf16 %v157_v54, %v147_v53  ;;  %v146_v59 = vld [vmem:[#allocation5 + $0x2b0] sm:$0xff]  ;;  %v257_v53 = vld [vmem:[#allocation5 + $0x628] sm:$0xff]  ;;  %v379_v14 = vld [vmem:[#allocation5 + $0x9f8] sm:$0xff] }
 0x1a5   :  { %3742 = vmatprep.subr.bf16.mxu0 %v3741_v63  ;;  %v238_v63 = vld [vmem:[#allocation5 + $0x590] sm:$0xff]  ;;  %v3507_v4 = vpack.c.bf16 %v156_v60, %v146_v59  ;;  %v329_v54 = vld [vmem:[#allocation5 + $0x868] sm:$0xff]  ;;  %v256_v59 = vld [vmem:[#allocation5 + $0x620] sm:$0xff] }
 0x1a6   :  { %v328_v60 = vld [vmem:[#allocation5 + $0x860] sm:$0xff]  ;;  %v399_v26 = vld [vmem:[#allocation5 + $0xa98] sm:$0xff] }
 0x1a7   :  { %3248 = vmatpush1.bf16.msra.mxu1 %v3247_v5  ;;  %v3763_v5 = vpack.c.bf16 %v238_v63, %v228_v61  ;;  %v267_v63 = vld [vmem:[#allocation5 + $0x678] sm:$0xff] }
 0x1a8   :  { %3744 = vmatpush1.bf16.msra.mxu0 %v3743_v7  ;;  %3490 = vmatprep.subr.bf16.mxu1 %v3489_v8  ;;  %v3509_v7 = vpack.c.bf16 %v177_v30, %v167_v0  ;;  %v166_v8 = vld [vmem:[#allocation5 + $0x350] sm:$0xff]  ;;  %v277_v0 = vld [vmem:[#allocation5 + $0x6c8] sm:$0xff]  ;;  %v419_v42 = vld [vmem:[#allocation5 + $0xb38] sm:$0xff] }
 0x1a9   :  { %3746 = vmatprep.subr.bf16.mxu0 %v3745_v12  ;;  %v258_v12 = vld [vmem:[#allocation5 + $0x630] sm:$0xff]  ;;  %v3511_v2 = vpack.c.bf16 %v176_v9, %v166_v8  ;;  %v349_v30 = vld [vmem:[#allocation5 + $0x908] sm:$0xff]  ;;  %v276_v8 = vld [vmem:[#allocation5 + $0x6c0] sm:$0xff] }
 0x1aa   :  { %1880 = vmatmul.mubr.f32.vlgmr.msra.gmra.mrb[2].mxu1 %v4225_v44  ;;  %v3499_v44 = vpack.c.bf16 %v116_v36, %v106_v35  ;;  %v216_v35 = vld [vmem:[#allocation5 + $0x4e0] sm:$0xff] }
 0x1ab   :  { %3492 = vmatpush1.bf16.msra.mxu1 %v3491_v18  ;;  %2234 = vmatprep.mubr.f32.mxu1 %v4021_v55  ;;  %v229_v55 = vld [vmem:[#allocation5 + $0x548] sm:$0xff]  ;;  %v3767_v18 = vpack.c.bf16 %v258_v12, %v248_v10  ;;  %v288_v36 = vld [vmem:[#allocation5 + $0x720] sm:$0xff]  ;;  %v3785_v10 = vpack.c.bf16 %v359_v1, %v349_v30  ;;  %v287_v12 = vld [vmem:[#allocation5 + $0x718] sm:$0xff] }
 0x1ac   :  { %3748 = vmatpush1.bf16.msra.mxu0 %v3747_v29  ;;  %3494 = vmatprep.subr.bf16.mxu1 %v3493_v20  ;;  %v3761_v62 = vpack.c.bf16 %v239_v56, %v229_v55  ;;  %v3513_v29 = vpack.c.bf16 %v197_v13, %v187_v17  ;;  %v186_v20 = vld [vmem:[#allocation5 + $0x3f0] sm:$0xff]  ;;  %v339_v55 = vld [vmem:[#allocation5 + $0x8b8] sm:$0xff]  ;;  %v348_v9 = vld [vmem:[#allocation5 + $0x900] sm:$0xff] }
 0x1ad   :  { %3750 = vmatprep.subr.bf16.mxu0 %v3749_v23  ;;  %v278_v23 = vld [vmem:[#allocation5 + $0x6d0] sm:$0xff]  ;;  %v3515_v28 = vpack.c.bf16 %v196_v21, %v186_v20  ;;  %v3781_v61 = vpack.c.bf16 %v339_v55, %v329_v54  ;;  %v297_v17 = vld [vmem:[#allocation5 + $0x768] sm:$0xff]  ;;  %v296_v20 = vld [vmem:[#allocation5 + $0x760] sm:$0xff] }
 0x1ae   :  { %v369_v13 = vld [vmem:[#allocation5 + $0x9a8] sm:$0xff]  ;;  %v368_v21 = vld [vmem:[#allocation5 + $0x9a0] sm:$0xff]  ;;  %v439_v54 = vld [vmem:[#allocation5 + $0xbd8] sm:$0xff] }
 0x1af   :  { %3496 = vmatpush1.bf16.msra.mxu1 %v3495_v31  ;;  %v3771_v31 = vpack.c.bf16 %v278_v23, %v268_v22  ;;  %v3789_v22 = vpack.c.bf16 %v379_v14, %v369_v13  ;;  %v307_v23 = vld [vmem:[#allocation5 + $0x7b8] sm:$0xff]  ;;  %v4229_v55 = vld [vmem:[#allocation2] sm:$0xff]  ;;  %v449_v1 = vld [vmem:[#allocation5 + $0xc28] sm:$0xff] }
 0x1b0   :  { %3752 = vmatpush1.bf16.msra.mxu0 %v3751_v33  ;;  %3498 = vmatprep.subr.bf16.mxu1 %v3497_v34  ;;  %v3517_v33 = vpack.c.bf16 %v217_v25, %v207_v24  ;;  %v206_v34 = vld [vmem:[#allocation5 + $0x490] sm:$0xff]  ;;  %v317_v24 = vld [vmem:[#allocation5 + $0x808] sm:$0xff]  ;;  %v4023_v30 = vld [vmem:[#allocation2 + $0x18] sm:$0xff] }
 0x1b1   :  { %3754 = vmatprep.subr.bf16.mxu0 %v3753_v39  ;;  %v298_v39 = vld [vmem:[#allocation5 + $0x770] sm:$0xff]  ;;  %v3519_v45 = vpack.c.bf16 %v216_v35, %v206_v34  ;;  %v389_v25 = vld [vmem:[#allocation5 + $0xa48] sm:$0xff]  ;;  %v316_v34 = vld [vmem:[#allocation5 + $0x800] sm:$0xff] }
 0x1b2   :  { %v388_v35 = vld [vmem:[#allocation5 + $0xa40] sm:$0xff]  ;;  %v397_v13 = vld [vmem:[#allocation5 + $0xa88] sm:$0xff] }
 0x1b3   :  { %3500 = vmatpush1.bf16.msra.mxu1 %v3499_v44  ;;  %v3775_v44 = vpack.c.bf16 %v298_v39, %v288_v36  ;;  %v3793_v36 = vpack.c.bf16 %v399_v26, %v389_v25  ;;  %v327_v39 = vld [vmem:[#allocation5 + $0x858] sm:$0xff]  ;;  %v469_v14 = vld [vmem:[#allocation5 + $0xcc8] sm:$0xff] }
 0x1b4   :  { %3756 = vmatpush1.bf16.msra.mxu0 %v3755_v46  ;;  %3502 = vmatprep.subr.bf16.mxu1 %v3501_v47  ;;  %v3521_v46 = vpack.c.bf16 %v237_v41, %v227_v40  ;;  %v226_v47 = vld [vmem:[#allocation5 + $0x530] sm:$0xff]  ;;  %v337_v40 = vld [vmem:[#allocation5 + $0x8a8] sm:$0xff] }
 0x1b5   :  { %3758 = vmatprep.subr.bf16.mxu0 %v3757_v51  ;;  %v318_v51 = vld [vmem:[#allocation5 + $0x810] sm:$0xff]  ;;  %v3523_v56 = vpack.c.bf16 %v236_v48, %v226_v47  ;;  %v409_v41 = vld [vmem:[#allocation5 + $0xae8] sm:$0xff]  ;;  %v336_v47 = vld [vmem:[#allocation5 + $0x8a0] sm:$0xff] }
 0x1b6   :  { %v408_v48 = vld [vmem:[#allocation5 + $0xae0] sm:$0xff]  ;;  %v417_v25 = vld [vmem:[#allocation5 + $0xb28] sm:$0xff] }
 0x1b7   :  { %3504 = vmatpush1.bf16.msra.mxu1 %v3503_v16  ;;  %v3779_v16 = vpack.c.bf16 %v318_v51, %v308_v49  ;;  %v3797_v49 = vpack.c.bf16 %v419_v42, %v409_v41  ;;  %v347_v51 = vld [vmem:[#allocation5 + $0x8f8] sm:$0xff]  ;;  %v489_v26 = vld [vmem:[#allocation5 + $0xd68] sm:$0xff] }
 0x1b8   :  { %3760 = vmatpush1.bf16.msra.mxu0 %v3759_v57  ;;  %3506 = vmatprep.subr.bf16.mxu1 %v3505_v58  ;;  %v3525_v57 = vpack.c.bf16 %v257_v53, %v247_v52  ;;  %v246_v58 = vld [vmem:[#allocation5 + $0x5d0] sm:$0xff]  ;;  %v357_v52 = vld [vmem:[#allocation5 + $0x948] sm:$0xff] }
 0x1b9   :  { %3762 = vmatprep.subr.bf16.mxu0 %v3761_v62  ;;  %v338_v62 = vld [vmem:[#allocation5 + $0x8b0] sm:$0xff]  ;;  %v3527_v3 = vpack.c.bf16 %v256_v59, %v246_v58  ;;  %v429_v53 = vld [vmem:[#allocation5 + $0xb88] sm:$0xff]  ;;  %v356_v59 = vld [vmem:[#allocation5 + $0x940] sm:$0xff] }
 0x1ba   :  { %v346_v58 = vld [vmem:[#allocation5 + $0x8f0] sm:$0xff]  ;;  %v437_v41 = vld [vmem:[#allocation5 + $0xbc8] sm:$0xff] }
 0x1bb   :  { %3508 = vmatpush1.bf16.msra.mxu1 %v3507_v4  ;;  %v3783_v4 = vpack.c.bf16 %v338_v62, %v328_v60  ;;  %v428_v60 = vld [vmem:[#allocation5 + $0xb80] sm:$0xff]  ;;  %v438_v62 = vld [vmem:[#allocation5 + $0xbd0] sm:$0xff]  ;;  %v509_v42 = vld [vmem:[#allocation5 + $0xe08] sm:$0xff] }
 0x1bc   :  { %3764 = vmatpush1.bf16.msra.mxu0 %v3763_v5  ;;  %3510 = vmatprep.subr.bf16.mxu1 %v3509_v7  ;;  %v3529_v5 = vpack.c.bf16 %v277_v0, %v267_v63  ;;  %v266_v7 = vld [vmem:[#allocation5 + $0x670] sm:$0xff]  ;;  %v367_v63 = vld [vmem:[#allocation5 + $0x998] sm:$0xff]  ;;  %v377_v0 = vld [vmem:[#allocation5 + $0x9e8] sm:$0xff] }
 0x1bd   :  { %3766 = vmatprep.subr.bf16.mxu0 %v3765_v11  ;;  %v358_v11 = vld [vmem:[#allocation5 + $0x950] sm:$0xff]  ;;  %v3531_v15 = vpack.c.bf16 %v276_v8, %v266_v7  ;;  %v3549_v7 = vpack.c.bf16 %v377_v0, %v367_v63  ;;  %v467_v63 = vld [vmem:[#allocation5 + $0xcb8] sm:$0xff]  ;;  %v477_v0 = vld [vmem:[#allocation5 + $0xd08] sm:$0xff] }
 0x1be   :  { %v366_v8 = vld [vmem:[#allocation5 + $0x990] sm:$0xff] }
 0x1bf   :  { %3512 = vmatpush1.bf16.msra.mxu1 %v3511_v2  ;;  %v3787_v2 = vpack.c.bf16 %v358_v11, %v348_v9  ;;  %v376_v9 = vld [vmem:[#allocation5 + $0x9e0] sm:$0xff] }
 0x1c0   :  { %3768 = vmatpush1.bf16.msra.mxu0 %v3767_v18  ;;  %3514 = vmatprep.subr.bf16.mxu1 %v3513_v29  ;;  %v3533_v18 = vpack.c.bf16 %v297_v17, %v287_v12  ;;  %v286_v29 = vld [vmem:[#allocation5 + $0x710] sm:$0xff]  ;;  %v387_v17 = vld [vmem:[#allocation5 + $0xa38] sm:$0xff] }
 0x1c1   :  { %3770 = vmatprep.subr.bf16.mxu0 %v3769_v6  ;;  %v378_v6 = vld [vmem:[#allocation5 + $0x9f0] sm:$0xff]  ;;  %v3535_v27 = vpack.c.bf16 %v296_v20, %v286_v29  ;;  %v3553_v29 = vpack.c.bf16 %v397_v13, %v387_v17  ;;  %v497_v17 = vld [vmem:[#allocation5 + $0xda8] sm:$0xff] }
 0x1c2   :  { %v458_v12 = vld [vmem:[#allocation5 + $0xc70] sm:$0xff]  ;;  %v569_v13 = vld [vmem:[#allocation5 + $0xfe8] sm:$0xff] }
 0x1c3   :  { %3516 = vmatpush1.bf16.msra.mxu1 %v3515_v28  ;;  %v3791_v28 = vpack.c.bf16 %v378_v6, %v368_v21  ;;  %v386_v20 = vld [vmem:[#allocation5 + $0xa30] sm:$0xff]  ;;  %v396_v21 = vld [vmem:[#allocation5 + $0xa80] sm:$0xff] }
 0x1c4   :  { %3772 = vmatpush1.bf16.msra.mxu0 %v3771_v31  ;;  %3518 = vmatprep.subr.bf16.mxu1 %v3517_v33  ;;  %v3537_v31 = vpack.c.bf16 %v317_v24, %v307_v23  ;;  %v306_v33 = vld [vmem:[#allocation5 + $0x7b0] sm:$0xff]  ;;  %v407_v24 = vld [vmem:[#allocation5 + $0xad8] sm:$0xff] }
 0x1c5   :  { %3774 = vmatprep.subr.bf16.mxu0 %v3773_v38  ;;  %v398_v38 = vld [vmem:[#allocation5 + $0xa90] sm:$0xff]  ;;  %v3539_v43 = vpack.c.bf16 %v316_v34, %v306_v33  ;;  %v3557_v33 = vpack.c.bf16 %v417_v25, %v407_v24  ;;  %v517_v24 = vld [vmem:[#allocation5 + $0xe48] sm:$0xff] }
 0x1c6   :  { %v478_v23 = vld [vmem:[#allocation5 + $0xd10] sm:$0xff]  ;;  %v589_v25 = vld [vmem:[#allocation5 + $0x1088] sm:$0xff] }
 0x1c7   :  { %3520 = vmatpush1.bf16.msra.mxu1 %v3519_v45  ;;  %v3795_v45 = vpack.c.bf16 %v398_v38, %v388_v35  ;;  %v406_v34 = vld [vmem:[#allocation5 + $0xad0] sm:$0xff]  ;;  %v416_v35 = vld [vmem:[#allocation5 + $0xb20] sm:$0xff] }
 0x1c8   :  { %3776 = vmatpush1.bf16.msra.mxu0 %v3775_v44  ;;  %3522 = vmatprep.subr.bf16.mxu1 %v3521_v46  ;;  %v3541_v44 = vpack.c.bf16 %v337_v40, %v327_v39  ;;  %v326_v46 = vld [vmem:[#allocation5 + $0x850] sm:$0xff]  ;;  %v427_v40 = vld [vmem:[#allocation5 + $0xb78] sm:$0xff] }
 0x1c9   :  { %3778 = vmatprep.subr.bf16.mxu0 %v3777_v50  ;;  %v418_v50 = vld [vmem:[#allocation5 + $0xb30] sm:$0xff] }
 0x1ca   :  { %v498_v39 = vld [vmem:[#allocation5 + $0xdb0] sm:$0xff] }
 0x1cb   :  { %3524 = vmatpush1.bf16.msra.mxu1 %v3523_v56  ;;  %v3543_v56 = vpack.c.bf16 %v336_v47, %v326_v46  ;;  %v3561_v46 = vpack.c.bf16 %v437_v41, %v427_v40  ;;  %v426_v47 = vld [vmem:[#allocation5 + $0xb70] sm:$0xff]  ;;  %v537_v40 = vld [vmem:[#allocation5 + $0xee8] sm:$0xff] }
 0x1cc   :  { %3780 = vmatpush1.bf16.msra.mxu0 %v3779_v16  ;;  %3526 = vmatprep.subr.bf16.mxu1 %v3525_v57  ;;  %v3799_v16 = vpack.c.bf16 %v418_v50, %v408_v48  ;;  %v3545_v57 = vpack.c.bf16 %v357_v52, %v347_v51  ;;  %v436_v48 = vld [vmem:[#allocation5 + $0xbc0] sm:$0xff]  ;;  %v518_v51 = vld [vmem:[#allocation5 + $0xe50] sm:$0xff]  ;;  %v447_v52 = vld [vmem:[#allocation5 + $0xc18] sm:$0xff] }
 0x1cd   :  { %3782 = vmatprep.subr.bf16.mxu0 %v3781_v61  ;;  %v3801_v61 = vpack.c.bf16 %v439_v54, %v429_v53  ;;  %v457_v53 = vld [vmem:[#allocation5 + $0xc68] sm:$0xff] }
 0x1ce   :  { %v529_v54 = vld [vmem:[#allocation5 + $0xea8] sm:$0xff] }
 0x1cf   :  { %3528 = vmatpush1.bf16.msra.mxu1 %v3527_v3  ;;  %v459_v3 = vld [vmem:[#allocation5 + $0xc78] sm:$0xff]  ;;  %v609_v41 = vld [vmem:[#allocation5 + $0x1128] sm:$0xff] }
 0x1d0   :  { %3784 = vmatpush1.bf16.msra.mxu0 %v3783_v4  ;;  %3530 = vmatprep.subr.bf16.mxu1 %v3529_v5  ;;  %v3547_v4 = vpack.c.bf16 %v356_v59, %v346_v58  ;;  %v3803_v5 = vpack.c.bf16 %v438_v62, %v428_v60  ;;  %v3805_v11 = vpack.c.bf16 %v459_v3, %v449_v1  ;;  %v446_v58 = vld [vmem:[#allocation5 + $0xc10] sm:$0xff]  ;;  %v456_v59 = vld [vmem:[#allocation5 + $0xc60] sm:$0xff]  ;;  %v559_v1 = vld [vmem:[#allocation5 + $0xf98] sm:$0xff] }
 0x1d1   :  { %3786 = vmatprep.subr.bf16.mxu0 %v3785_v10  ;;  %v448_v10 = vld [vmem:[#allocation5 + $0xc20] sm:$0xff]  ;;  %v538_v62 = vld [vmem:[#allocation5 + $0xef0] sm:$0xff]  ;;  %v3567_v3 = vpack.c.bf16 %v456_v59, %v446_v58 }
 0x1d2   :  { %v528_v60 = vld [vmem:[#allocation5 + $0xea0] sm:$0xff] }
 0x1d3   :  { %3532 = vmatpush1.bf16.msra.mxu1 %v3531_v15  ;;  %v479_v15 = vld [vmem:[#allocation5 + $0xd18] sm:$0xff]  ;;  %v556_v58 = vld [vmem:[#allocation5 + $0xf80] sm:$0xff] }
 0x1d4   :  { %3788 = vmatpush1.bf16.msra.mxu0 %v3787_v2  ;;  %3534 = vmatprep.subr.bf16.mxu1 %v3533_v18  ;;  %v3551_v2 = vpack.c.bf16 %v376_v9, %v366_v8  ;;  %v3807_v18 = vpack.c.bf16 %v458_v12, %v448_v10  ;;  %v3809_v6 = vpack.c.bf16 %v479_v15, %v469_v14  ;;  %v476_v8 = vld [vmem:[#allocation5 + $0xd00] sm:$0xff]  ;;  %v487_v12 = vld [vmem:[#allocation5 + $0xd58] sm:$0xff] }
 0x1d5   :  { %3790 = vmatprep.subr.bf16.mxu0 %v3789_v22  ;;  %v468_v22 = vld [vmem:[#allocation5 + $0xcc0] sm:$0xff]  ;;  %v579_v14 = vld [vmem:[#allocation5 + $0x1038] sm:$0xff] }
 0x1d6   :  { %v548_v9 = vld [vmem:[#allocation5 + $0xf40] sm:$0xff] }
 0x1d7   :  { %3536 = vmatpush1.bf16.msra.mxu1 %v3535_v27  ;;  %v499_v27 = vld [vmem:[#allocation5 + $0xdb8] sm:$0xff]  ;;  %v628_v59 = vld [vmem:[#allocation5 + $0x11c0] sm:$0xff] }
 0x1d8   :  { %3792 = vmatpush1.bf16.msra.mxu0 %v3791_v28  ;;  %3538 = vmatprep.subr.bf16.mxu1 %v3537_v31  ;;  %v3555_v28 = vpack.c.bf16 %v396_v21, %v386_v20  ;;  %v3811_v31 = vpack.c.bf16 %v478_v23, %v468_v22  ;;  %v3813_v38 = vpack.c.bf16 %v499_v27, %v489_v26  ;;  %v496_v20 = vld [vmem:[#allocation5 + $0xda0] sm:$0xff]  ;;  %v507_v23 = vld [vmem:[#allocation5 + $0xdf8] sm:$0xff] }
 0x1d9   :  { %3794 = vmatprep.subr.bf16.mxu0 %v3793_v36  ;;  %v488_v36 = vld [vmem:[#allocation5 + $0xd60] sm:$0xff]  ;;  %v3829_v22 = vpack.c.bf16 %v579_v14, %v569_v13  ;;  %v599_v26 = vld [vmem:[#allocation5 + $0x10d8] sm:$0xff] }
 0x1da   :  { %v568_v21 = vld [vmem:[#allocation5 + $0xfe0] sm:$0xff]  ;;  %v679_v13 = vld [vmem:[#allocation5 + $0x1358] sm:$0xff] }
 0x1db   :  { %3540 = vmatpush1.bf16.msra.mxu1 %v3539_v43  ;;  %2519 = vmatmul.mubr.f32.vlgmr.msra.gmra.mrb[4].mxu0 %v4229_v55  ;;  %v519_v43 = vld [vmem:[#allocation5 + $0xe58] sm:$0xff] }
 0x1dc   :  { %3796 = vmatpush1.bf16.msra.mxu0 %v3795_v45  ;;  %3542 = vmatprep.subr.bf16.mxu1 %v3541_v44  ;;  %v3559_v45 = vpack.c.bf16 %v416_v35, %v406_v34  ;;  %v3815_v44 = vpack.c.bf16 %v498_v39, %v488_v36  ;;  %v3817_v50 = vpack.c.bf16 %v519_v43, %v509_v42  ;;  %v516_v34 = vld [vmem:[#allocation5 + $0xe40] sm:$0xff]  ;;  %v527_v39 = vld [vmem:[#allocation5 + $0xe98] sm:$0xff] }
 0x1dd   :  { %3798 = vmatprep.subr.bf16.mxu0 %v3797_v49  ;;  %2589 = vmatprep.mubr.f32.mxu0 %v4023_v30  ;;  %v508_v49 = vld [vmem:[#allocation5 + $0xe00] sm:$0xff]  ;;  %v3833_v36 = vpack.c.bf16 %v599_v26, %v589_v25  ;;  %v619_v42 = vld [vmem:[#allocation5 + $0x1178] sm:$0xff] }
 0x1de   :  { %v588_v35 = vld [vmem:[#allocation5 + $0x1080] sm:$0xff]  ;;  %v699_v25 = vld [vmem:[#allocation5 + $0x13f8] sm:$0xff] }
 0x1df   :  { %3544 = vmatpush1.bf16.msra.mxu1 %v3543_v56  ;;  %v539_v56 = vld [vmem:[#allocation5 + $0xef8] sm:$0xff] }
 0x1e0   :  { %3800 = vmatpush1.bf16.msra.mxu0 %v3799_v16  ;;  %3546 = vmatprep.subr.bf16.mxu1 %v3545_v57  ;;  %v3819_v16 = vpack.c.bf16 %v518_v51, %v508_v49  ;;  %v3565_v57 = vpack.c.bf16 %v457_v53, %v447_v52  ;;  %v3837_v49 = vpack.c.bf16 %v619_v42, %v609_v41  ;;  %v547_v51 = vld [vmem:[#allocation5 + $0xf38] sm:$0xff]  ;;  %v557_v52 = vld [vmem:[#allocation5 + $0xf88] sm:$0xff] }
 0x1e1   :  { %3802 = vmatprep.subr.bf16.mxu0 %v3801_v61  ;;  %v3821_v61 = vpack.c.bf16 %v539_v56, %v529_v54  ;;  %v629_v53 = vld [vmem:[#allocation5 + $0x11c8] sm:$0xff]  ;;  %v639_v54 = vld [vmem:[#allocation5 + $0x1218] sm:$0xff] }
 0x1e2   :  { %v719_v41 = vld [vmem:[#allocation5 + $0x1498] sm:$0xff] }
 0x1e3   :  { %3548 = vmatpush1.bf16.msra.mxu1 %v3547_v4  ;;  %v3823_v4 = vpack.c.bf16 %v538_v62, %v528_v60  ;;  %v3841_v60 = vpack.c.bf16 %v639_v54, %v629_v53  ;;  %v567_v62 = vld [vmem:[#allocation5 + $0xfd8] sm:$0xff] }
 0x1e4   :  { %3804 = vmatpush1.bf16.msra.mxu0 %v3803_v5  ;;  %3550 = vmatprep.subr.bf16.mxu1 %v3549_v7  ;;  %v3569_v5 = vpack.c.bf16 %v477_v0, %v467_v63  ;;  %v466_v7 = vld [vmem:[#allocation5 + $0xcb0] sm:$0xff]  ;;  %v577_v63 = vld [vmem:[#allocation5 + $0x1028] sm:$0xff]  ;;  %v739_v53 = vld [vmem:[#allocation5 + $0x1538] sm:$0xff] }
 0x1e5   :  { %3806 = vmatprep.subr.bf16.mxu0 %v3805_v11  ;;  %v558_v11 = vld [vmem:[#allocation5 + $0xf90] sm:$0xff]  ;;  %v3571_v15 = vpack.c.bf16 %v476_v8, %v466_v7  ;;  %v649_v0 = vld [vmem:[#allocation5 + $0x1268] sm:$0xff]  ;;  %v576_v7 = vld [vmem:[#allocation5 + $0x1020] sm:$0xff] }
 0x1e6   :  { %v648_v8 = vld [vmem:[#allocation5 + $0x1260] sm:$0xff] }
 0x1e7   :  { %3552 = vmatpush1.bf16.msra.mxu1 %v3551_v2  ;;  %v3827_v2 = vpack.c.bf16 %v558_v11, %v548_v9  ;;  %v587_v11 = vld [vmem:[#allocation5 + $0x1078] sm:$0xff] }
 0x1e8   :  { %3808 = vmatpush1.bf16.msra.mxu0 %v3807_v18  ;;  %3554 = vmatprep.subr.bf16.mxu1 %v3553_v29  ;;  %v3573_v18 = vpack.c.bf16 %v497_v17, %v487_v12  ;;  %v486_v29 = vld [vmem:[#allocation5 + $0xd50] sm:$0xff]  ;;  %v597_v12 = vld [vmem:[#allocation5 + $0x10c8] sm:$0xff] }
 0x1e9   :  { %3810 = vmatprep.subr.bf16.mxu0 %v3809_v6  ;;  %v578_v6 = vld [vmem:[#allocation5 + $0x1030] sm:$0xff]  ;;  %v3575_v27 = vpack.c.bf16 %v496_v20, %v486_v29  ;;  %v669_v17 = vld [vmem:[#allocation5 + $0x1308] sm:$0xff]  ;;  %v596_v29 = vld [vmem:[#allocation5 + $0x10c0] sm:$0xff] }
 0x1ea   :  { %2235 = vmatmul.mubr.f32.vlgmr.msra.gmra.mrb[4].mxu1 %v4229_v55  ;;  %v3563_v55 = vpack.c.bf16 %v436_v48, %v426_v47  ;;  %v536_v47 = vld [vmem:[#allocation5 + $0xee0] sm:$0xff] }
 0x1eb   :  { %3556 = vmatpush1.bf16.msra.mxu1 %v3555_v28  ;;  %2305 = vmatprep.mubr.f32.mxu1 %v4023_v30  ;;  %v549_v30 = vld [vmem:[#allocation5 + $0xf48] sm:$0xff]  ;;  %v3831_v28 = vpack.c.bf16 %v578_v6, %v568_v21  ;;  %v608_v48 = vld [vmem:[#allocation5 + $0x1120] sm:$0xff]  ;;  %v3849_v21 = vpack.c.bf16 %v679_v13, %v669_v17  ;;  %v607_v6 = vld [vmem:[#allocation5 + $0x1118] sm:$0xff] }
 0x1ec   :  { %3812 = vmatpush1.bf16.msra.mxu0 %v3811_v31  ;;  %3558 = vmatprep.subr.bf16.mxu1 %v3557_v33  ;;  %v3825_v10 = vpack.c.bf16 %v559_v1, %v549_v30  ;;  %v3577_v31 = vpack.c.bf16 %v517_v24, %v507_v23  ;;  %v506_v33 = vld [vmem:[#allocation5 + $0xdf0] sm:$0xff]  ;;  %v659_v30 = vld [vmem:[#allocation5 + $0x12b8] sm:$0xff]  ;;  %v668_v20 = vld [vmem:[#allocation5 + $0x1300] sm:$0xff] }
 0x1ed   :  { %3814 = vmatprep.subr.bf16.mxu0 %v3813_v38  ;;  %v598_v38 = vld [vmem:[#allocation5 + $0x10d0] sm:$0xff]  ;;  %v3579_v43 = vpack.c.bf16 %v516_v34, %v506_v33  ;;  %v3845_v9 = vpack.c.bf16 %v659_v30, %v649_v0  ;;  %v617_v23 = vld [vmem:[#allocation5 + $0x1168] sm:$0xff]  ;;  %v616_v33 = vld [vmem:[#allocation5 + $0x1160] sm:$0xff] }
 0x1ee   :  { %v689_v24 = vld [vmem:[#allocation5 + $0x13a8] sm:$0xff]  ;;  %v688_v34 = vld [vmem:[#allocation5 + $0x13a0] sm:$0xff]  ;;  %v759_v0 = vld [vmem:[#allocation5 + $0x15d8] sm:$0xff] }
 0x1ef   :  { %3560 = vmatpush1.bf16.msra.mxu1 %v3559_v45  ;;  %v3835_v45 = vpack.c.bf16 %v598_v38, %v588_v35  ;;  %v3853_v35 = vpack.c.bf16 %v699_v25, %v689_v24  ;;  %v627_v38 = vld [vmem:[#allocation5 + $0x11b8] sm:$0xff]  ;;  %v4233_v30 = vld [vmem:[#allocation2 + $0x10] sm:$0xff]  ;;  %v4025_v17 = vld [vmem:[#allocation2 + $0x28] sm:$0xff] }
 0x1f0   :  { %3816 = vmatpush1.bf16.msra.mxu0 %v3815_v44  ;;  %3562 = vmatprep.subr.bf16.mxu1 %v3561_v46  ;;  %v3581_v44 = vpack.c.bf16 %v537_v40, %v527_v39  ;;  %v526_v46 = vld [vmem:[#allocation5 + $0xe90] sm:$0xff]  ;;  %v637_v39 = vld [vmem:[#allocation5 + $0x1208] sm:$0xff] }
 0x1f1   :  { %3818 = vmatprep.subr.bf16.mxu0 %v3817_v50  ;;  %v618_v50 = vld [vmem:[#allocation5 + $0x1170] sm:$0xff]  ;;  %v3583_v56 = vpack.c.bf16 %v536_v47, %v526_v46  ;;  %v709_v40 = vld [vmem:[#allocation5 + $0x1448] sm:$0xff]  ;;  %v636_v46 = vld [vmem:[#allocation5 + $0x1200] sm:$0xff] }
 0x1f2   :  { %v708_v47 = vld [vmem:[#allocation5 + $0x1440] sm:$0xff]  ;;  %v769_v13 = vld [vmem:[#allocation5 + $0x1628] sm:$0xff] }
 0x1f3   :  { %3564 = vmatpush1.bf16.msra.mxu1 %v3563_v55  ;;  %v3839_v55 = vpack.c.bf16 %v618_v50, %v608_v48  ;;  %v3857_v48 = vpack.c.bf16 %v719_v41, %v709_v40  ;;  %v647_v50 = vld [vmem:[#allocation5 + $0x1258] sm:$0xff]  ;;  %v717_v24 = vld [vmem:[#allocation5 + $0x1488] sm:$0xff] }
 0x1f4   :  { %3820 = vmatpush1.bf16.msra.mxu0 %v3819_v16  ;;  %3566 = vmatprep.subr.bf16.mxu1 %v3565_v57  ;;  %v3585_v16 = vpack.c.bf16 %v557_v52, %v547_v51  ;;  %v546_v57 = vld [vmem:[#allocation5 + $0xf30] sm:$0xff]  ;;  %v657_v51 = vld [vmem:[#allocation5 + $0x12a8] sm:$0xff] }
 0x1f5   :  { %3822 = vmatprep.subr.bf16.mxu0 %v3821_v61  ;;  %v638_v61 = vld [vmem:[#allocation5 + $0x1210] sm:$0xff]  ;;  %v3587_v1 = vpack.c.bf16 %v556_v58, %v546_v57  ;;  %v729_v52 = vld [vmem:[#allocation5 + $0x14e8] sm:$0xff]  ;;  %v656_v57 = vld [vmem:[#allocation5 + $0x12a0] sm:$0xff] }
 0x1f6   :  { %v728_v58 = vld [vmem:[#allocation5 + $0x14e0] sm:$0xff]  ;;  %v789_v25 = vld [vmem:[#allocation5 + $0x16c8] sm:$0xff] }
 0x1f7   :  { %3568 = vmatpush1.bf16.msra.mxu1 %v3567_v3  ;;  %v3843_v3 = vpack.c.bf16 %v638_v61, %v628_v59  ;;  %v3861_v59 = vpack.c.bf16 %v739_v53, %v729_v52  ;;  %v667_v61 = vld [vmem:[#allocation5 + $0x12f8] sm:$0xff]  ;;  %v737_v40 = vld [vmem:[#allocation5 + $0x1528] sm:$0xff] }
 0x1f8   :  { %3824 = vmatpush1.bf16.msra.mxu0 %v3823_v4  ;;  %3570 = vmatprep.subr.bf16.mxu1 %v3569_v5  ;;  %v3589_v4 = vpack.c.bf16 %v577_v63, %v567_v62  ;;  %v566_v5 = vld [vmem:[#allocation5 + $0xfd0] sm:$0xff]  ;;  %v677_v62 = vld [vmem:[#allocation5 + $0x1348] sm:$0xff] }
 0x1f9   :  { %3826 = vmatprep.subr.bf16.mxu0 %v3825_v10  ;;  %v658_v10 = vld [vmem:[#allocation5 + $0x12b0] sm:$0xff]  ;;  %v3591_v14 = vpack.c.bf16 %v576_v7, %v566_v5  ;;  %v749_v63 = vld [vmem:[#allocation5 + $0x1588] sm:$0xff]  ;;  %v676_v7 = vld [vmem:[#allocation5 + $0x1340] sm:$0xff] }
 0x1fa   :  { %v666_v5 = vld [vmem:[#allocation5 + $0x12f0] sm:$0xff]  ;;  %v809_v41 = vld [vmem:[#allocation5 + $0x1768] sm:$0xff] }
 0x1fb   :  { %3572 = vmatpush1.bf16.msra.mxu1 %v3571_v15  ;;  %v3847_v15 = vpack.c.bf16 %v658_v10, %v648_v8  ;;  %v748_v8 = vld [vmem:[#allocation5 + $0x1580] sm:$0xff]  ;;  %v758_v10 = vld [vmem:[#allocation5 + $0x15d0] sm:$0xff]  ;;  %v757_v52 = vld [vmem:[#allocation5 + $0x15c8] sm:$0xff] }
 0x1fc   :  { %3828 = vmatpush1.bf16.msra.mxu0 %v3827_v2  ;;  %3574 = vmatprep.subr.bf16.mxu1 %v3573_v18  ;;  %v3593_v2 = vpack.c.bf16 %v597_v12, %v587_v11  ;;  %v586_v18 = vld [vmem:[#allocation5 + $0x1070] sm:$0xff]  ;;  %v687_v11 = vld [vmem:[#allocation5 + $0x1398] sm:$0xff]  ;;  %v697_v12 = vld [vmem:[#allocation5 + $0x13e8] sm:$0xff] }
 0x1fd   :  { %3830 = vmatprep.subr.bf16.mxu0 %v3829_v22  ;;  %v678_v22 = vld [vmem:[#allocation5 + $0x1350] sm:$0xff]  ;;  %v3595_v26 = vpack.c.bf16 %v596_v29, %v586_v18  ;;  %v3613_v18 = vpack.c.bf16 %v697_v12, %v687_v11  ;;  %v829_v53 = vld [vmem:[#allocation5 + $0x1808] sm:$0xff]  ;;  %v787_v11 = vld [vmem:[#allocation5 + $0x16b8] sm:$0xff] }
 0x1fe   :  { %v686_v29 = vld [vmem:[#allocation5 + $0x1390] sm:$0xff]  ;;  %v797_v12 = vld [vmem:[#allocation5 + $0x1708] sm:$0xff] }
 0x1ff   :  { %3576 = vmatpush1.bf16.msra.mxu1 %v3575_v27  ;;  %v3851_v27 = vpack.c.bf16 %v678_v22, %v668_v20  ;;  %v696_v20 = vld [vmem:[#allocation5 + $0x13e0] sm:$0xff] }
 0x200   :  { %3832 = vmatpush1.bf16.msra.mxu0 %v3831_v28  ;;  %3578 = vmatprep.subr.bf16.mxu1 %v3577_v31  ;;  %v3597_v28 = vpack.c.bf16 %v617_v23, %v607_v6  ;;  %v606_v31 = vld [vmem:[#allocation5 + $0x1110] sm:$0xff]  ;;  %v707_v23 = vld [vmem:[#allocation5 + $0x1438] sm:$0xff] }
 0x201   :  { %3834 = vmatprep.subr.bf16.mxu0 %v3833_v36  ;;  %v698_v36 = vld [vmem:[#allocation5 + $0x13f0] sm:$0xff]  ;;  %v3599_v42 = vpack.c.bf16 %v616_v33, %v606_v31  ;;  %v3617_v31 = vpack.c.bf16 %v717_v24, %v707_v23  ;;  %v817_v23 = vld [vmem:[#allocation5 + $0x17a8] sm:$0xff] }
 0x202   :  { %v778_v6 = vld [vmem:[#allocation5 + $0x1670] sm:$0xff]  ;;  %v889_v24 = vld [vmem:[#allocation5 + $0x19e8] sm:$0xff] }
 0x203   :  { %3580 = vmatpush1.bf16.msra.mxu1 %v3579_v43  ;;  %v3855_v43 = vpack.c.bf16 %v698_v36, %v688_v34  ;;  %v706_v33 = vld [vmem:[#allocation5 + $0x1430] sm:$0xff]  ;;  %v716_v34 = vld [vmem:[#allocation5 + $0x1480] sm:$0xff] }
 0x204   :  { %3836 = vmatpush1.bf16.msra.mxu0 %v3835_v45  ;;  %3582 = vmatprep.subr.bf16.mxu1 %v3581_v44  ;;  %v3601_v45 = vpack.c.bf16 %v637_v39, %v627_v38  ;;  %v626_v44 = vld [vmem:[#allocation5 + $0x11b0] sm:$0xff]  ;;  %v727_v39 = vld [vmem:[#allocation5 + $0x14d8] sm:$0xff] }
 0x205   :  { %3838 = vmatprep.subr.bf16.mxu0 %v3837_v49  ;;  %v718_v49 = vld [vmem:[#allocation5 + $0x1490] sm:$0xff]  ;;  %v3603_v54 = vpack.c.bf16 %v636_v46, %v626_v44  ;;  %v3621_v44 = vpack.c.bf16 %v737_v40, %v727_v39  ;;  %v837_v39 = vld [vmem:[#allocation5 + $0x1848] sm:$0xff] }
 0x206   :  { %v798_v38 = vld [vmem:[#allocation5 + $0x1710] sm:$0xff]  ;;  %v909_v40 = vld [vmem:[#allocation5 + $0x1a88] sm:$0xff] }
 0x207   :  { %3584 = vmatpush1.bf16.msra.mxu1 %v3583_v56  ;;  %v3859_v56 = vpack.c.bf16 %v718_v49, %v708_v47  ;;  %v726_v46 = vld [vmem:[#allocation5 + $0x14d0] sm:$0xff]  ;;  %v736_v47 = vld [vmem:[#allocation5 + $0x1520] sm:$0xff] }
 0x208   :  { %3840 = vmatpush1.bf16.msra.mxu0 %v3839_v55  ;;  %3586 = vmatprep.subr.bf16.mxu1 %v3585_v16  ;;  %v3605_v55 = vpack.c.bf16 %v657_v51, %v647_v50  ;;  %v646_v16 = vld [vmem:[#allocation5 + $0x1250] sm:$0xff]  ;;  %v747_v51 = vld [vmem:[#allocation5 + $0x1578] sm:$0xff] }
 0x209   :  { %3842 = vmatprep.subr.bf16.mxu0 %v3841_v60  ;;  %v738_v60 = vld [vmem:[#allocation5 + $0x1530] sm:$0xff] }
 0x20a   :  { %v818_v50 = vld [vmem:[#allocation5 + $0x17b0] sm:$0xff] }
 0x20b   :  { %3588 = vmatpush1.bf16.msra.mxu1 %v3587_v1  ;;  %v3607_v1 = vpack.c.bf16 %v656_v57, %v646_v16  ;;  %v3625_v16 = vpack.c.bf16 %v757_v52, %v747_v51  ;;  %v746_v57 = vld [vmem:[#allocation5 + $0x1570] sm:$0xff]  ;;  %v857_v51 = vld [vmem:[#allocation5 + $0x18e8] sm:$0xff] }
 0x20c   :  { %3844 = vmatpush1.bf16.msra.mxu0 %v3843_v3  ;;  %3590 = vmatprep.subr.bf16.mxu1 %v3589_v4  ;;  %v3863_v3 = vpack.c.bf16 %v738_v60, %v728_v58  ;;  %v3609_v4 = vpack.c.bf16 %v677_v62, %v667_v61  ;;  %v756_v58 = vld [vmem:[#allocation5 + $0x15c0] sm:$0xff]  ;;  %v838_v61 = vld [vmem:[#allocation5 + $0x1850] sm:$0xff]  ;;  %v767_v62 = vld [vmem:[#allocation5 + $0x1618] sm:$0xff] }
 0x20d   :  { %3846 = vmatprep.subr.bf16.mxu0 %v3845_v9  ;;  %v3865_v9 = vpack.c.bf16 %v759_v0, %v749_v63  ;;  %v777_v63 = vld [vmem:[#allocation5 + $0x1668] sm:$0xff] }
 0x20e   :  { %v849_v0 = vld [vmem:[#allocation5 + $0x18a8] sm:$0xff] }
 0x20f   :  { %3592 = vmatpush1.bf16.msra.mxu1 %v3591_v14  ;;  %v779_v14 = vld [vmem:[#allocation5 + $0x1678] sm:$0xff]  ;;  %v929_v52 = vld [vmem:[#allocation5 + $0x1b28] sm:$0xff] }
 0x210   :  { %3848 = vmatpush1.bf16.msra.mxu0 %v3847_v15  ;;  %3594 = vmatprep.subr.bf16.mxu1 %v3593_v2  ;;  %v3611_v15 = vpack.c.bf16 %v676_v7, %v666_v5  ;;  %v3867_v2 = vpack.c.bf16 %v758_v10, %v748_v8  ;;  %v3869_v22 = vpack.c.bf16 %v779_v14, %v769_v13  ;;  %v766_v5 = vld [vmem:[#allocation5 + $0x1610] sm:$0xff]  ;;  %v776_v7 = vld [vmem:[#allocation5 + $0x1660] sm:$0xff]  ;;  %v879_v13 = vld [vmem:[#allocation5 + $0x1998] sm:$0xff] }
 0x211   :  { %3850 = vmatprep.subr.bf16.mxu0 %v3849_v21  ;;  %v768_v21 = vld [vmem:[#allocation5 + $0x1620] sm:$0xff]  ;;  %v858_v10 = vld [vmem:[#allocation5 + $0x18f0] sm:$0xff]  ;;  %v3631_v14 = vpack.c.bf16 %v776_v7, %v766_v5 }
 0x212   :  { %v848_v8 = vld [vmem:[#allocation5 + $0x18a0] sm:$0xff] }
 0x213   :  { %3596 = vmatpush1.bf16.msra.mxu1 %v3595_v26  ;;  %v799_v26 = vld [vmem:[#allocation5 + $0x1718] sm:$0xff]  ;;  %v876_v5 = vld [vmem:[#allocation5 + $0x1980] sm:$0xff] }
 0x214   :  { %3852 = vmatpush1.bf16.msra.mxu0 %v3851_v27  ;;  %3598 = vmatprep.subr.bf16.mxu1 %v3597_v28  ;;  %v3615_v27 = vpack.c.bf16 %v696_v20, %v686_v29  ;;  %v3871_v28 = vpack.c.bf16 %v778_v6, %v768_v21  ;;  %v3873_v36 = vpack.c.bf16 %v799_v26, %v789_v25  ;;  %v796_v29 = vld [vmem:[#allocation5 + $0x1700] sm:$0xff]  ;;  %v807_v6 = vld [vmem:[#allocation5 + $0x1758] sm:$0xff] }
 0x215   :  { %3854 = vmatprep.subr.bf16.mxu0 %v3853_v35  ;;  %v788_v35 = vld [vmem:[#allocation5 + $0x16c0] sm:$0xff]  ;;  %v899_v25 = vld [vmem:[#allocation5 + $0x1a38] sm:$0xff] }
 0x216   :  { %v868_v20 = vld [vmem:[#allocation5 + $0x1940] sm:$0xff] }
 0x217   :  { %3600 = vmatpush1.bf16.msra.mxu1 %v3599_v42  ;;  %v819_v42 = vld [vmem:[#allocation5 + $0x17b8] sm:$0xff]  ;;  %v948_v7 = vld [vmem:[#allocation5 + $0x1bc0] sm:$0xff] }
 0x218   :  { %3856 = vmatpush1.bf16.msra.mxu0 %v3855_v43  ;;  %3602 = vmatprep.subr.bf16.mxu1 %v3601_v45  ;;  %v3619_v43 = vpack.c.bf16 %v716_v34, %v706_v33  ;;  %v3875_v45 = vpack.c.bf16 %v798_v38, %v788_v35  ;;  %v3877_v49 = vpack.c.bf16 %v819_v42, %v809_v41  ;;  %v816_v33 = vld [vmem:[#allocation5 + $0x17a0] sm:$0xff]  ;;  %v827_v38 = vld [vmem:[#allocation5 + $0x17f8] sm:$0xff] }
 0x219   :  { %3858 = vmatprep.subr.bf16.mxu0 %v3857_v48  ;;  %v808_v48 = vld [vmem:[#allocation5 + $0x1760] sm:$0xff]  ;;  %v3893_v35 = vpack.c.bf16 %v899_v25, %v889_v24  ;;  %v919_v41 = vld [vmem:[#allocation5 + $0x1ad8] sm:$0xff] }
 0x21a   :  { %v888_v34 = vld [vmem:[#allocation5 + $0x19e0] sm:$0xff]  ;;  %v999_v24 = vld [vmem:[#allocation5 + $0x1d58] sm:$0xff] }
 0x21b   :  { %3604 = vmatpush1.bf16.msra.mxu1 %v3603_v54  ;;  %2590 = vmatmul.mubr.f32.vlgmr.msra.gmra.mrb[4].mxu0 %v4233_v30  ;;  %v839_v54 = vld [vmem:[#allocation5 + $0x1858] sm:$0xff] }
 0x21c   :  { %3860 = vmatpush1.bf16.msra.mxu0 %v3859_v56  ;;  %3606 = vmatprep.subr.bf16.mxu1 %v3605_v55  ;;  %v3623_v56 = vpack.c.bf16 %v736_v47, %v726_v46  ;;  %v3879_v55 = vpack.c.bf16 %v818_v50, %v808_v48  ;;  %v3881_v60 = vpack.c.bf16 %v839_v54, %v829_v53  ;;  %v836_v46 = vld [vmem:[#allocation5 + $0x1840] sm:$0xff]  ;;  %v847_v50 = vld [vmem:[#allocation5 + $0x1898] sm:$0xff] }
 0x21d   :  { %3862 = vmatprep.subr.bf16.mxu0 %v3861_v59  ;;  %2660 = vmatprep.mubr.f32.mxu0 %v4025_v17  ;;  %v828_v59 = vld [vmem:[#allocation5 + $0x1800] sm:$0xff]  ;;  %v3897_v48 = vpack.c.bf16 %v919_v41, %v909_v40  ;;  %v939_v53 = vld [vmem:[#allocation5 + $0x1b78] sm:$0xff] }
 0x21e   :  { %v908_v47 = vld [vmem:[#allocation5 + $0x1a80] sm:$0xff]  ;;  %v1019_v40 = vld [vmem:[#allocation5 + $0x1df8] sm:$0xff] }
 0x21f   :  { %3608 = vmatpush1.bf16.msra.mxu1 %v3607_v1  ;;  %v859_v1 = vld [vmem:[#allocation5 + $0x18f8] sm:$0xff] }
 0x220   :  { %3864 = vmatpush1.bf16.msra.mxu0 %v3863_v3  ;;  %3610 = vmatprep.subr.bf16.mxu1 %v3609_v4  ;;  %v3883_v3 = vpack.c.bf16 %v838_v61, %v828_v59  ;;  %v3629_v4 = vpack.c.bf16 %v777_v63, %v767_v62  ;;  %v3901_v59 = vpack.c.bf16 %v939_v53, %v929_v52  ;;  %v867_v61 = vld [vmem:[#allocation5 + $0x1938] sm:$0xff]  ;;  %v877_v62 = vld [vmem:[#allocation5 + $0x1988] sm:$0xff] }
 0x221   :  { %3866 = vmatprep.subr.bf16.mxu0 %v3865_v9  ;;  %v3885_v9 = vpack.c.bf16 %v859_v1, %v849_v0  ;;  %v949_v63 = vld [vmem:[#allocation5 + $0x1bc8] sm:$0xff]  ;;  %v959_v0 = vld [vmem:[#allocation5 + $0x1c18] sm:$0xff] }
 0x222   :  { %v1039_v52 = vld [vmem:[#allocation5 + $0x1e98] sm:$0xff] }
 0x223   :  { %3612 = vmatpush1.bf16.msra.mxu1 %v3611_v15  ;;  %v3887_v15 = vpack.c.bf16 %v858_v10, %v848_v8  ;;  %v3905_v8 = vpack.c.bf16 %v959_v0, %v949_v63  ;;  %v887_v10 = vld [vmem:[#allocation5 + $0x19d8] sm:$0xff] }
 0x224   :  { %3868 = vmatpush1.bf16.msra.mxu0 %v3867_v2  ;;  %3614 = vmatprep.subr.bf16.mxu1 %v3613_v18  ;;  %v3633_v2 = vpack.c.bf16 %v797_v12, %v787_v11  ;;  %v786_v18 = vld [vmem:[#allocation5 + $0x16b0] sm:$0xff]  ;;  %v897_v11 = vld [vmem:[#allocation5 + $0x1a28] sm:$0xff]  ;;  %v1059_v63 = vld [vmem:[#allocation5 + $0x1f38] sm:$0xff] }
 0x225   :  { %3870 = vmatprep.subr.bf16.mxu0 %v3869_v22  ;;  %v878_v22 = vld [vmem:[#allocation5 + $0x1990] sm:$0xff]  ;;  %v3635_v26 = vpack.c.bf16 %v796_v29, %v786_v18  ;;  %v969_v12 = vld [vmem:[#allocation5 + $0x1c68] sm:$0xff]  ;;  %v896_v18 = vld [vmem:[#allocation5 + $0x1a20] sm:$0xff] }
 0x226   :  { %v968_v29 = vld [vmem:[#allocation5 + $0x1c60] sm:$0xff] }
 0x227   :  { %3616 = vmatpush1.bf16.msra.mxu1 %v3615_v27  ;;  %v3891_v27 = vpack.c.bf16 %v878_v22, %v868_v20  ;;  %v907_v22 = vld [vmem:[#allocation5 + $0x1a78] sm:$0xff] }
 0x228   :  { %3872 = vmatpush1.bf16.msra.mxu0 %v3871_v28  ;;  %3618 = vmatprep.subr.bf16.mxu1 %v3617_v31  ;;  %v3637_v28 = vpack.c.bf16 %v817_v23, %v807_v6  ;;  %v806_v31 = vld [vmem:[#allocation5 + $0x1750] sm:$0xff]  ;;  %v917_v6 = vld [vmem:[#allocation5 + $0x1ac8] sm:$0xff] }
 0x229   :  { %3874 = vmatprep.subr.bf16.mxu0 %v3873_v36  ;;  %v898_v36 = vld [vmem:[#allocation5 + $0x1a30] sm:$0xff]  ;;  %v3639_v42 = vpack.c.bf16 %v816_v33, %v806_v31  ;;  %v989_v23 = vld [vmem:[#allocation5 + $0x1d08] sm:$0xff]  ;;  %v916_v31 = vld [vmem:[#allocation5 + $0x1ac0] sm:$0xff] }
 0x22a   :  { %2306 = vmatmul.mubr.f32.vlgmr.msra.gmra.mrb[4].mxu1 %v4233_v30  ;;  %v3627_v30 = vpack.c.bf16 %v756_v58, %v746_v57  ;;  %v856_v57 = vld [vmem:[#allocation5 + $0x18e0] sm:$0xff] }
 0x22b   :  { %3620 = vmatpush1.bf16.msra.mxu1 %v3619_v43  ;;  %2376 = vmatprep.mubr.f32.mxu1 %v4025_v17  ;;  %v869_v17 = vld [vmem:[#allocation5 + $0x1948] sm:$0xff]  ;;  %v3895_v43 = vpack.c.bf16 %v898_v36, %v888_v34  ;;  %v928_v58 = vld [vmem:[#allocation5 + $0x1b20] sm:$0xff]  ;;  %v3913_v34 = vpack.c.bf16 %v999_v24, %v989_v23  ;;  %v927_v36 = vld [vmem:[#allocation5 + $0x1b18] sm:$0xff] }
 0x22c   :  { %3876 = vmatpush1.bf16.msra.mxu0 %v3875_v45  ;;  %3622 = vmatprep.subr.bf16.mxu1 %v3621_v44  ;;  %v3889_v21 = vpack.c.bf16 %v879_v13, %v869_v17  ;;  %v3641_v45 = vpack.c.bf16 %v837_v39, %v827_v38  ;;  %v826_v44 = vld [vmem:[#allocation5 + $0x17f0] sm:$0xff]  ;;  %v979_v17 = vld [vmem:[#allocation5 + $0x1cb8] sm:$0xff]  ;;  %v988_v33 = vld [vmem:[#allocation5 + $0x1d00] sm:$0xff] }
 0x22d   :  { %3878 = vmatprep.subr.bf16.mxu0 %v3877_v49  ;;  %v918_v49 = vld [vmem:[#allocation5 + $0x1ad0] sm:$0xff]  ;;  %v3643_v54 = vpack.c.bf16 %v836_v46, %v826_v44  ;;  %v3909_v20 = vpack.c.bf16 %v979_v17, %v969_v12  ;;  %v937_v38 = vld [vmem:[#allocation5 + $0x1b68] sm:$0xff]  ;;  %v936_v44 = vld [vmem:[#allocation5 + $0x1b60] sm:$0xff] }
 0x22e   :  { %v1009_v39 = vld [vmem:[#allocation5 + $0x1da8] sm:$0xff]  ;;  %v1008_v46 = vld [vmem:[#allocation5 + $0x1da0] sm:$0xff]  ;;  %v1079_v12 = vld [vmem:[#allocation5 + $0x1fd8] sm:$0xff] }
 0x22f   :  { %3624 = vmatpush1.bf16.msra.mxu1 %v3623_v56  ;;  %v3899_v56 = vpack.c.bf16 %v918_v49, %v908_v47  ;;  %v3917_v47 = vpack.c.bf16 %v1019_v40, %v1009_v39  ;;  %v947_v49 = vld [vmem:[#allocation5 + $0x1bb8] sm:$0xff]  ;;  %v4237_v17 = vld [vmem:[#allocation2 + $0x20] sm:$0xff]  ;;  %v1089_v24 = vld [vmem:[#allocation5 + $0x2028] sm:$0xff] }
 0x230   :  { %3880 = vmatpush1.bf16.msra.mxu0 %v3879_v55  ;;  %3626 = vmatprep.subr.bf16.mxu1 %v3625_v16  ;;  %v3645_v55 = vpack.c.bf16 %v857_v51, %v847_v50  ;;  %v846_v16 = vld [vmem:[#allocation5 + $0x1890] sm:$0xff]  ;;  %v957_v50 = vld [vmem:[#allocation5 + $0x1c08] sm:$0xff]  ;;  %v4027_v23 = vld [vmem:[#allocation2 + $0x38] sm:$0xff] }
 0x231   :  { %3882 = vmatprep.subr.bf16.mxu0 %v3881_v60  ;;  %v938_v60 = vld [vmem:[#allocation5 + $0x1b70] sm:$0xff]  ;;  %v3647_v1 = vpack.c.bf16 %v856_v57, %v846_v16  ;;  %v1029_v51 = vld [vmem:[#allocation5 + $0x1e48] sm:$0xff]  ;;  %v956_v16 = vld [vmem:[#allocation5 + $0x1c00] sm:$0xff] }
 0x232   :  { %v1028_v57 = vld [vmem:[#allocation5 + $0x1e40] sm:$0xff]  ;;  %v1037_v39 = vld [vmem:[#allocation5 + $0x1e88] sm:$0xff] }
 0x233   :  { %3628 = vmatpush1.bf16.msra.mxu1 %v3627_v30  ;;  %v3903_v30 = vpack.c.bf16 %v938_v60, %v928_v58  ;;  %v3921_v58 = vpack.c.bf16 %v1039_v52, %v1029_v51  ;;  %v967_v60 = vld [vmem:[#allocation5 + $0x1c58] sm:$0xff]  ;;  %v1109_v40 = vld [vmem:[#allocation5 + $0x20c8] sm:$0xff] }
 0x234   :  { %3884 = vmatpush1.bf16.msra.mxu0 %v3883_v3  ;;  %3630 = vmatprep.subr.bf16.mxu1 %v3629_v4  ;;  %v3649_v3 = vpack.c.bf16 %v877_v62, %v867_v61  ;;  %v866_v4 = vld [vmem:[#allocation5 + $0x1930] sm:$0xff]  ;;  %v977_v61 = vld [vmem:[#allocation5 + $0x1ca8] sm:$0xff] }
 0x235   :  { %3886 = vmatprep.subr.bf16.mxu0 %v3885_v9  ;;  %v958_v9 = vld [vmem:[#allocation5 + $0x1c10] sm:$0xff]  ;;  %v3651_v13 = vpack.c.bf16 %v876_v5, %v866_v4  ;;  %v1049_v62 = vld [vmem:[#allocation5 + $0x1ee8] sm:$0xff]  ;;  %v976_v4 = vld [vmem:[#allocation5 + $0x1ca0] sm:$0xff] }
 0x236   :  { %v1048_v5 = vld [vmem:[#allocation5 + $0x1ee0] sm:$0xff]  ;;  %v1057_v51 = vld [vmem:[#allocation5 + $0x1f28] sm:$0xff] }
 0x237   :  { %3632 = vmatpush1.bf16.msra.mxu1 %v3631_v14  ;;  %v3907_v14 = vpack.c.bf16 %v958_v9, %v948_v7  ;;  %v3925_v7 = vpack.c.bf16 %v1059_v63, %v1049_v62  ;;  %v987_v9 = vld [vmem:[#allocation5 + $0x1cf8] sm:$0xff]  ;;  %v1129_v52 = vld [vmem:[#allocation5 + $0x2168] sm:$0xff]  ;;  %v1138_v62 = vld [vmem:[#allocation5 + $0x21b0] sm:$0xff] }
 0x238   :  { %3888 = vmatpush1.bf16.msra.mxu0 %v3887_v15  ;;  %3634 = vmatprep.subr.bf16.mxu1 %v3633_v2  ;;  %v3653_v15 = vpack.c.bf16 %v897_v11, %v887_v10  ;;  %v886_v2 = vld [vmem:[#allocation5 + $0x19d0] sm:$0xff]  ;;  %v997_v10 = vld [vmem:[#allocation5 + $0x1d48] sm:$0xff]  ;;  %v1067_v63 = vld [vmem:[#allocation5 + $0x1f78] sm:$0xff] }
 0x239   :  { %3890 = vmatprep.subr.bf16.mxu0 %v3889_v21  ;;  %v978_v21 = vld [vmem:[#allocation5 + $0x1cb0] sm:$0xff]  ;;  %v3655_v25 = vpack.c.bf16 %v896_v18, %v886_v2  ;;  %v1069_v11 = vld [vmem:[#allocation5 + $0x1f88] sm:$0xff]  ;;  %v996_v18 = vld [vmem:[#allocation5 + $0x1d40] sm:$0xff] }
 0x23a   :  { %v986_v2 = vld [vmem:[#allocation5 + $0x1cf0] sm:$0xff] }
 0x23b   :  { %3636 = vmatpush1.bf16.msra.mxu1 %v3635_v26  ;;  %v3911_v26 = vpack.c.bf16 %v978_v21, %v968_v29  ;;  %v1068_v29 = vld [vmem:[#allocation5 + $0x1f80] sm:$0xff]  ;;  %v1078_v21 = vld [vmem:[#allocation5 + $0x1fd0] sm:$0xff] }
 0x23c   :  { %3892 = vmatpush1.bf16.msra.mxu0 %v3891_v27  ;;  %3638 = vmatprep.subr.bf16.mxu1 %v3637_v28  ;;  %v3657_v27 = vpack.c.bf16 %v917_v6, %v907_v22  ;;  %v906_v28 = vld [vmem:[#allocation5 + $0x1a70] sm:$0xff]  ;;  %v1007_v22 = vld [vmem:[#allocation5 + $0x1d98] sm:$0xff]  ;;  %v1017_v6 = vld [vmem:[#allocation5 + $0x1de8] sm:$0xff] }
 0x23d   :  { %3894 = vmatprep.subr.bf16.mxu0 %v3893_v35  ;;  %v998_v35 = vld [vmem:[#allocation5 + $0x1d50] sm:$0xff]  ;;  %v3659_v41 = vpack.c.bf16 %v916_v31, %v906_v28  ;;  %v3677_v28 = vpack.c.bf16 %v1017_v6, %v1007_v22 }
 0x23e   :  { %v1006_v31 = vld [vmem:[#allocation5 + $0x1d90] sm:$0xff] }
 0x23f   :  { %3640 = vmatpush1.bf16.msra.mxu1 %v3639_v42  ;;  %v3915_v42 = vpack.c.bf16 %v998_v35, %v988_v33  ;;  %v1016_v33 = vld [vmem:[#allocation5 + $0x1de0] sm:$0xff] }
 0x240   :  { %3896 = vmatpush1.bf16.msra.mxu0 %v3895_v43  ;;  %3642 = vmatprep.subr.bf16.mxu1 %v3641_v45  ;;  %v3661_v43 = vpack.c.bf16 %v937_v38, %v927_v36  ;;  %v926_v45 = vld [vmem:[#allocation5 + $0x1b10] sm:$0xff]  ;;  %v1027_v38 = vld [vmem:[#allocation5 + $0x1e38] sm:$0xff] }
 0x241   :  { %3898 = vmatprep.subr.bf16.mxu0 %v3897_v48  ;;  %v1018_v48 = vld [vmem:[#allocation5 + $0x1df0] sm:$0xff]  ;;  %v3663_v53 = vpack.c.bf16 %v936_v44, %v926_v45  ;;  %v3681_v45 = vpack.c.bf16 %v1037_v39, %v1027_v38 }
 0x242   :  { %v1098_v36 = vld [vmem:[#allocation5 + $0x2070] sm:$0xff] }
 0x243   :  { %3644 = vmatpush1.bf16.msra.mxu1 %v3643_v54  ;;  %v3919_v54 = vpack.c.bf16 %v1018_v48, %v1008_v46  ;;  %v1026_v44 = vld [vmem:[#allocation5 + $0x1e30] sm:$0xff]  ;;  %v1036_v46 = vld [vmem:[#allocation5 + $0x1e80] sm:$0xff] }
 0x244   :  { %3900 = vmatpush1.bf16.msra.mxu0 %v3899_v56  ;;  %3646 = vmatprep.subr.bf16.mxu1 %v3645_v55  ;;  %v3665_v56 = vpack.c.bf16 %v957_v50, %v947_v49  ;;  %v946_v55 = vld [vmem:[#allocation5 + $0x1bb0] sm:$0xff]  ;;  %v1047_v50 = vld [vmem:[#allocation5 + $0x1ed8] sm:$0xff] }
 0x245   :  { %3902 = vmatprep.subr.bf16.mxu0 %v3901_v59  ;;  %v1038_v59 = vld [vmem:[#allocation5 + $0x1e90] sm:$0xff]  ;;  %v3667_v0 = vpack.c.bf16 %v956_v16, %v946_v55  ;;  %v1286_v16 = vsub.s32 5, %v4215_v19 }
 0x246   :  { %v1118_v49 = vld [vmem:[#allocation5 + $0x2110] sm:$0xff] }
 0x247   :  { %3648 = vmatpush1.bf16.msra.mxu1 %v3647_v1  ;;  %v3923_v1 = vpack.c.bf16 %v1038_v59, %v1028_v57  ;;  %v3685_v57 = vpack.c.bf16 %v1057_v51, %v1047_v50  ;;  %v1056_v59 = vld [vmem:[#allocation5 + $0x1f20] sm:$0xff]  ;;  %v1219_v50 = vld [vmem:[#allocation5 + $0x2438] sm:$0xff] }
 0x248   :  { %3904 = vmatpush1.bf16.msra.mxu0 %v3903_v30  ;;  %3650 = vmatprep.subr.bf16.mxu1 %v3649_v3  ;;  %v3669_v30 = vpack.c.bf16 %v977_v61, %v967_v60  ;;  %v966_v3 = vld [vmem:[#allocation5 + $0x1c50] sm:$0xff]  ;;  %v1128_v60 = vld [vmem:[#allocation5 + $0x2160] sm:$0xff] }
 0x249   :  { %3906 = vmatprep.subr.bf16.mxu0 %v3905_v8  ;;  %v1058_v8 = vld [vmem:[#allocation5 + $0x1f30] sm:$0xff] }
 0x24b   :  { %3652 = vmatpush1.bf16.msra.mxu1 %v3651_v13  ;;  %v3671_v13 = vpack.c.bf16 %v976_v4, %v966_v3  ;;  %v4244_v3 = vld [vmem:[#allocation7] sm:$0xff] }
 0x24c   :  { %3908 = vmatpush1.bf16.msra.mxu0 %v3907_v14  ;;  %3654 = vmatprep.subr.bf16.mxu1 %v3653_v15  ;;  %v3927_v14 = vpack.c.bf16 %v1058_v8, %v1048_v5  ;;  %v3673_v15 = vpack.c.bf16 %v997_v10, %v987_v9  ;;  %v3943_v8 = vpack.c.bf16 %v1138_v62, %v1128_v60  ;;  %v1066_v10 = vld [vmem:[#allocation5 + $0x1f70] sm:$0xff]  ;;  %v1157_v60 = vld [vmem:[#allocation5 + $0x2248] sm:$0xff] }
 0x24d   :  { %3910 = vmatprep.subr.bf16.mxu0 %v3909_v20  ;;  %v3929_v20 = vpack.c.bf16 %v1079_v12, %v1069_v11  ;;  %v1076_v11 = vld [vmem:[#allocation5 + $0x1fc0] sm:$0xff]  ;;  %v1229_v62 = vld [vmem:[#allocation5 + $0x2488] sm:$0xff] }
 0x24e   :  { %v1148_v12 = vld [vmem:[#allocation5 + $0x2200] sm:$0xff]  ;;  %v3691_v22 = vpack.c.bf16 %v1076_v11, %v1066_v10  ;;  %v1238_v11 = vld [vmem:[#allocation5 + $0x24d0] sm:$0xff] }
 0x24f   :  { %3656 = vmatpush1.bf16.msra.mxu1 %v3655_v25  ;;  %v1099_v25 = vld [vmem:[#allocation5 + $0x2078] sm:$0xff] }
 0x250   :  { %3912 = vmatpush1.bf16.msra.mxu0 %v3911_v26  ;;  %3658 = vmatprep.subr.bf16.mxu1 %v3657_v27  ;;  %v3675_v26 = vpack.c.bf16 %v996_v18, %v986_v2  ;;  %v3931_v27 = vpack.c.bf16 %v1078_v21, %v1068_v29  ;;  %v3933_v35 = vpack.c.bf16 %v1099_v25, %v1089_v24  ;;  %v1169_v18 = vld [vmem:[#allocation5 + $0x22a8] sm:$0xff]  ;;  %v1179_v29 = vld [vmem:[#allocation5 + $0x22f8] sm:$0xff]  ;;  %v1086_v25 = vld [vmem:[#allocation5 + $0x2010] sm:$0xff] }
 0x251   :  { %3914 = vmatprep.subr.bf16.mxu0 %v3913_v34  ;;  %v1088_v34 = vld [vmem:[#allocation5 + $0x2020] sm:$0xff] }
 0x253   :  { %3660 = vmatpush1.bf16.msra.mxu1 %v3659_v41  ;;  %v1119_v41 = vld [vmem:[#allocation5 + $0x2118] sm:$0xff] }
 0x254   :  { %3916 = vmatpush1.bf16.msra.mxu0 %v3915_v42  ;;  %3662 = vmatprep.subr.bf16.mxu1 %v3661_v43  ;;  %v3679_v42 = vpack.c.bf16 %v1016_v33, %v1006_v31  ;;  %v3935_v43 = vpack.c.bf16 %v1098_v36, %v1088_v34  ;;  %v3937_v48 = vpack.c.bf16 %v1119_v41, %v1109_v40  ;;  %v1178_v31 = vld [vmem:[#allocation5 + $0x22f0] sm:$0xff]  ;;  %v1107_v33 = vld [vmem:[#allocation5 + $0x20b8] sm:$0xff]  ;;  %v1117_v34 = vld [vmem:[#allocation5 + $0x2108] sm:$0xff] }
 0x255   :  { %3918 = vmatprep.subr.bf16.mxu0 %v3917_v47  ;;  %v1108_v47 = vld [vmem:[#allocation5 + $0x20c0] sm:$0xff]  ;;  %v1199_v36 = vld [vmem:[#allocation5 + $0x2398] sm:$0xff]  ;;  %v3697_v40 = vpack.c.bf16 %v1117_v34, %v1107_v33  ;;  %v1106_v41 = vld [vmem:[#allocation5 + $0x20b0] sm:$0xff] }
 0x256   :  { %v3939_v55 = vpack.c.bf16 %v1118_v49, %v1108_v47  ;;  %v1137_v47 = vld [vmem:[#allocation5 + $0x21a8] sm:$0xff]  ;;  %v1186_v34 = vld [vmem:[#allocation5 + $0x2330] sm:$0xff] }
 0x257   :  { %3664 = vmatpush1.bf16.msra.mxu1 %v3663_v53  ;;  %v1139_v53 = vld [vmem:[#allocation5 + $0x21b8] sm:$0xff]  ;;  %v1209_v49 = vld [vmem:[#allocation5 + $0x23e8] sm:$0xff] }
 0x258   :  { %3920 = vmatpush1.bf16.msra.mxu0 %v3919_v54  ;;  %3666 = vmatprep.subr.bf16.mxu1 %v3665_v56  ;;  %v3683_v54 = vpack.c.bf16 %v1036_v46, %v1026_v44  ;;  %v1282_v56 = vsub.s32 4, %v4215_v19  ;;  %v3941_v61 = vpack.c.bf16 %v1139_v53, %v1129_v52  ;;  %v1198_v44 = vld [vmem:[#allocation5 + $0x2390] sm:$0xff]  ;;  %v1127_v46 = vld [vmem:[#allocation5 + $0x2158] sm:$0xff]  ;;  %v1278_v52 = vsub.s32 3, %v4215_v19 }
 0x259   :  { %3922 = vmatprep.subr.bf16.mxu0 %v3921_v58  ;;  %v1046_v58 = vld [vmem:[#allocation5 + $0x1ed0] sm:$0xff] }
 0x25a   :  { %v1283_v4 = vrot.slane %v4244_v3, %v1282_v56  ;;  %v3687_v5 = vpack.c.bf16 %v1056_v59, %v1046_v58  ;;  %v1126_v56 = vld [vmem:[#allocation5 + $0x2150] sm:$0xff]  ;;  %v1147_v59 = vld [vmem:[#allocation5 + $0x21f8] sm:$0xff] }
 0x25b   :  { %3668 = vmatpush1.bf16.msra.mxu1 %v3667_v0  ;;  %2661 = vmatmul.mubr.f32.vlgmr.msra.gmra.mrb[4].mxu0 %v4237_v17  ;;  %v1077_v0 = vld [vmem:[#allocation5 + $0x1fc8] sm:$0xff]  ;;  %v1218_v58 = vld [vmem:[#allocation5 + $0x2430] sm:$0xff] }
 0x25c   :  { %3924 = vmatpush1.bf16.msra.mxu0 %v3923_v1  ;;  %3670 = vmatprep.subr.bf16.mxu1 %v3669_v30  ;;  %v1149_v1 = vld [vmem:[#allocation5 + $0x2208] sm:$0xff]  ;;  %v1159_v30 = vld [vmem:[#allocation5 + $0x2258] sm:$0xff]  ;;  %v3689_v9 = vpack.c.bf16 %v1077_v0, %v1067_v63  ;;  %v1279_v0 = vrot.slane %v4244_v3, %v1278_v52 }
 0x25d   :  { %3926 = vmatprep.subr.bf16.mxu0 %v3925_v7  ;;  %2768 = vmatprep.mubr.msk.f32.mxu0 %vm1314_vm0, %v4027_v23  ;;  %v1287_v7 = vrot.slane %v4244_v3, %v1286_v16  ;;  %v1208_v16 = vld [vmem:[#allocation5 + $0x23e0] sm:$0xff]  ;;  %v1239_v63 = vld [vmem:[#allocation5 + $0x24d8] sm:$0xff] }
 0x25e   :  { %v3961_v10 = vpack.c.bf16 %v1239_v63, %v1229_v62  ;;  %v1290_v63 = vsub.s32 6, %v4215_v19 }
 0x25f   :  { %3672 = vmatpush1.bf16.msra.mxu1 %v3671_v13  ;;  %v1158_v13 = vld [vmem:[#allocation5 + $0x2250] sm:$0xff] }
 0x260   :  { %3928 = vmatpush1.bf16.msra.mxu0 %v3927_v14  ;;  %3674 = vmatprep.subr.bf16.mxu1 %v3673_v15  ;;  %v1087_v14 = vld [vmem:[#allocation5 + $0x2018] sm:$0xff]  ;;  %v1097_v15 = vld [vmem:[#allocation5 + $0x2068] sm:$0xff] }
 0x261   :  { %3930 = vmatprep.subr.bf16.mxu0 %v3929_v20  ;;  %v3693_v24 = vpack.c.bf16 %v1097_v15, %v1087_v14  ;;  %v1249_v15 = vld [vmem:[#allocation5 + $0x2528] sm:$0xff] }
 0x263   :  { %3676 = vmatpush1.bf16.msra.mxu1 %v3675_v26  ;;  %v1096_v26 = vld [vmem:[#allocation5 + $0x2060] sm:$0xff] }
 0x264   :  { %3932 = vmatpush1.bf16.msra.mxu0 %v3931_v27  ;;  %3678 = vmatprep.subr.bf16.mxu1 %v3677_v28  ;;  %v1168_v27 = vld [vmem:[#allocation5 + $0x22a0] sm:$0xff]  ;;  %v3949_v28 = vpack.c.bf16 %v1179_v29, %v1169_v18  ;;  %v3695_v38 = vpack.c.bf16 %v1096_v26, %v1086_v25  ;;  %v1258_v25 = vld [vmem:[#allocation5 + $0x2570] sm:$0xff]  ;;  %v1187_v26 = vld [vmem:[#allocation5 + $0x2338] sm:$0xff] }
 0x265   :  { %3934 = vmatprep.subr.bf16.mxu0 %v3933_v35  ;;  %v1189_v35 = vld [vmem:[#allocation5 + $0x2348] sm:$0xff]  ;;  %v3951_v39 = vpack.c.bf16 %v1178_v31, %v1168_v27 }
 0x266   :  { %v1197_v27 = vld [vmem:[#allocation5 + $0x2388] sm:$0xff] }
 0x267   :  { %3680 = vmatpush1.bf16.msra.mxu1 %v3679_v42  ;;  %v1116_v42 = vld [vmem:[#allocation5 + $0x2100] sm:$0xff]  ;;  %v3713_v33 = vpack.c.bf16 %v1197_v27, %v1187_v26 }
 0x268   :  { %3936 = vmatpush1.bf16.msra.mxu0 %v3935_v43  ;;  %3682 = vmatprep.subr.bf16.mxu1 %v3681_v45  ;;  %v1188_v43 = vld [vmem:[#allocation5 + $0x2340] sm:$0xff]  ;;  %v3953_v45 = vpack.c.bf16 %v1199_v36, %v1189_v35  ;;  %v3699_v51 = vpack.c.bf16 %v1116_v42, %v1106_v41  ;;  %v1207_v36 = vld [vmem:[#allocation5 + $0x23d8] sm:$0xff]  ;;  %v1206_v41 = vld [vmem:[#allocation5 + $0x23d0] sm:$0xff] }
 0x269   :  { %3938 = vmatprep.subr.bf16.mxu0 %v3937_v48  ;;  %v1274_v48 = vsub.s32 2, %v4215_v19  ;;  %v3955_v53 = vpack.c.bf16 %v1198_v44, %v1188_v43  ;;  %v1196_v35 = vld [vmem:[#allocation5 + $0x2380] sm:$0xff]  ;;  %v1227_v43 = vld [vmem:[#allocation5 + $0x2478] sm:$0xff]  ;;  %v4029_v44 = vld [vmem:[#allocation2 + $0x30] sm:$0xff] }
 0x26a   :  { %2377 = vmatmul.mubr.f32.vlgmr.msra.gmra.mrb[4].mxu1 %v4237_v17  ;;  %v3945_v17 = vpack.c.bf16 %v1159_v30, %v1149_v1  ;;  %v3959_v30 = vpack.c.bf16 %v1218_v58, %v1208_v16  ;;  %v1216_v42 = vld [vmem:[#allocation5 + $0x2420] sm:$0xff]  ;;  %v1261_v16 = vld [vmem:[#allocation7 + $0x8] sm:$0x3] }
 0x26b   :  { %3684 = vmatpush1.bf16.msra.mxu1 %v3683_v54  ;;  %2767 = vmatprep.mubr.msk.f32.mxu1 %vm1314_vm0, %v4027_v23  ;;  %v3947_v23 = vpack.c.bf16 %v1158_v13, %v1148_v12  ;;  %v3701_v54 = vpack.c.bf16 %v1137_v47, %v1127_v46  ;;  %v1167_v12 = vld [vmem:[#allocation5 + $0x2298] sm:$0xff]  ;;  %v3719_v46 = vpack.c.bf16 %v1216_v42, %v1206_v41 }
 0x26c   :  { %3940 = vmatpush1.bf16.msra.mxu0 %v3939_v55  ;;  %3686 = vmatprep.subr.bf16.mxu1 %v3685_v57  ;;  %v1136_v55 = vld [vmem:[#allocation5 + $0x21a0] sm:$0xff]  ;;  %v3957_v57 = vpack.c.bf16 %v1219_v50, %v1209_v49  ;;  %v1247_v50 = vld [vmem:[#allocation5 + $0x2518] sm:$0xff]  ;;  %v1303_v58 = vrot.slane %v1261_v16, %v1270_v37 }
 0x26d   :  { %3942 = vmatprep.subr.bf16.mxu0 %v3941_v61  ;;  %v1275_v61 = vrot.slane %v4244_v3, %v1274_v48  ;;  %v3703_v1 = vpack.c.bf16 %v1136_v55, %v1126_v56  ;;  %v1226_v48 = vld [vmem:[#allocation5 + $0x2470] sm:$0xff]  ;;  %v1236_v49 = vld [vmem:[#allocation5 + $0x24c0] sm:$0xff] }
 0x26e   :  { %v2165_v2 = vpop.f32.mrb[2].mxu0  ;;  %v3723_v52 = vpack.c.bf16 %v1236_v49, %v1226_v48  ;;  %v1256_v56 = vld [vmem:[#allocation5 + $0x2560] sm:$0xff] }
 0x26f   :  { %v3975_v20 = vadd.f32 %v2165_v2, %v1283_v4  ;;  %v2167_v21 = vpop.f32.mrb[3].mxu0  ;;  %3688 = vmatpush1.bf16.msra.mxu1 %v3687_v5  ;;  %v3705_v4 = vpack.c.bf16 %v1157_v60, %v1147_v59  ;;  %v1146_v5 = vld [vmem:[#allocation5 + $0x21f0] sm:$0xff]  ;;  %v1259_v2 = vld [vmem:[#allocation5 + $0x2578] sm:$0xff] }
 0x270   :  { %v3976_v6 = vadd.f32 %v2167_v21, %v1287_v7  ;;  %3944 = vmatpush1.bf16.msra.mxu0 %v3943_v8  ;;  %3690 = vmatprep.subr.bf16.mxu1 %v3689_v9  ;;  %v1156_v7 = vld [vmem:[#allocation5 + $0x2240] sm:$0xff] }
 0x271   :  { %2742 = vst [vmem:[#allocation8 + $0x20] sm:$0xff] %v3975_v20  ;;  %3946 = vmatprep.subr.bf16.mxu0 %v3945_v17  ;;  %v1228_v8 = vld [vmem:[#allocation5 + $0x2480] sm:$0xff]  ;;  %v1177_v17 = vld [vmem:[#allocation5 + $0x22e8] sm:$0xff]  ;;  %v3707_v29 = vpack.c.bf16 %v1156_v7, %v1146_v5 }
 0x272   :  { %2743 = vst [vmem:[#allocation8 + $0x28] sm:$0xff] %v3976_v6  ;;  %v3963_v20 = vpack.c.bf16 %v1238_v11, %v1228_v8  ;;  %v3709_v21 = vpack.c.bf16 %v1177_v17, %v1167_v12  ;;  %v1176_v6 = vld [vmem:[#allocation5 + $0x22e0] sm:$0xff] }
 0x273   :  { %3692 = vmatpush1.bf16.msra.mxu1 %v3691_v22  ;;  %v1166_v22 = vld [vmem:[#allocation5 + $0x2290] sm:$0xff] }
 0x274   :  { %3948 = vmatpush1.bf16.msra.mxu0 %v3947_v23  ;;  %3694 = vmatprep.subr.bf16.mxu1 %v3693_v24  ;;  %v1248_v23 = vld [vmem:[#allocation5 + $0x2520] sm:$0xff]  ;;  %v3965_v24 = vpack.c.bf16 %v1259_v2, %v1249_v15 }
 0x275   :  { %3950 = vmatprep.subr.bf16.mxu0 %v3949_v28  ;;  %v3711_v28 = vpack.c.bf16 %v1176_v6, %v1166_v22  ;;  %v3967_v31 = vpack.c.bf16 %v1258_v25, %v1248_v23 }
 0x277   :  { %3696 = vmatpush1.bf16.msra.mxu1 %v3695_v38  ;;  %v1217_v38 = vld [vmem:[#allocation5 + $0x2428] sm:$0xff] }
 0x278   :  { %3952 = vmatpush1.bf16.msra.mxu0 %v3951_v39  ;;  %3698 = vmatprep.subr.bf16.mxu1 %v3697_v40  ;;  %v3715_v39 = vpack.c.bf16 %v1196_v35, %v1186_v34  ;;  %v3717_v40 = vpack.c.bf16 %v1217_v38, %v1207_v36 }
 0x279   :  { %3954 = vmatprep.subr.bf16.mxu0 %v3953_v45  ;;  %v1237_v45 = vld [vmem:[#allocation5 + $0x24c8] sm:$0xff] }
 0x27a   :  { %v3721_v47 = vpack.c.bf16 %v1237_v45, %v1227_v43 }
 0x27b   :  { %3700 = vmatpush1.bf16.msra.mxu1 %v3699_v51  ;;  %v1257_v51 = vld [vmem:[#allocation5 + $0x2568] sm:$0xff] }
 0x27c   :  { %3956 = vmatpush1.bf16.msra.mxu0 %v3955_v53  ;;  %3702 = vmatprep.subr.bf16.mxu1 %v3701_v54  ;;  %v3725_v53 = vpack.c.bf16 %v1257_v51, %v1247_v50  ;;  %v1246_v54 = vld [vmem:[#allocation5 + $0x2510] sm:$0xff] }
 0x27d   :  { %v1881_v9 = vpop.f32.mrb[2].mxu1  ;;  %3958 = vmatprep.subr.bf16.mxu0 %v3957_v57  ;;  %v3727_v55 = vpack.c.bf16 %v1256_v56, %v1246_v54  ;;  %v1299_v57 = vrot.slane %v1261_v16, %v1266_v32 }
 0x27e   :  { %v3973_v13 = vadd.f32 %v1881_v9, %v1275_v61  ;;  %v1883_v14 = vpop.f32.mrb[3].mxu1 }
 0x27f   :  { %v3974_v18 = vadd.f32 %v1883_v14, %v1279_v0  ;;  %3704 = vmatpush1.bf16.msra.mxu1 %v3703_v1  ;;  %v1294_v0 = vsub.s32 7, %v4215_v19  ;;  %v1291_v1 = vrot.slane %v4244_v3, %v1290_v63 }
 0x280   :  { %2740 = vst [vmem:[#allocation8 + $0x10] sm:$0xff] %v3973_v13  ;;  %3960 = vmatpush1.bf16.msra.mxu0 %v3959_v30  ;;  %3706 = vmatprep.subr.bf16.mxu1 %v3705_v4 }
 0x281   :  { %2741 = vst [vmem:[#allocation8 + $0x18] sm:$0xff] %v3974_v18  ;;  %3962 = vmatprep.subr.bf16.mxu0 %v3961_v10  ;;  %v1295_v30 = vrot.slane %v4244_v3, %v1294_v0 }
 0x283   :  { %3708 = vmatpush1.bf16.msra.mxu1 %v3707_v29 }
 0x284   :  { %3964 = vmatpush1.bf16.msra.mxu0 %v3963_v20  ;;  %3710 = vmatprep.subr.bf16.mxu1 %v3709_v21 }
 0x285   :  { %3966 = vmatprep.subr.bf16.mxu0 %v3965_v24 }
 0x287   :  { %3712 = vmatpush1.bf16.msra.mxu1 %v3711_v28 }
 0x288   :  { %3968 = vmatpush1.bf16.msra.mxu0 %v3967_v31  ;;  %3714 = vmatprep.subr.bf16.mxu1 %v3713_v33 }
 0x28b   :  { %2732 = vmatmul.mubr.f32.vlgmr.msra.gmra.mrb[4].mxu0 %v4029_v44  ;;  %3716 = vmatpush1.bf16.msra.mxu1 %v3715_v39 }
 0x28c   :  { %3718 = vmatprep.subr.bf16.mxu1 %v3717_v40 }
 0x28f   :  { %3720 = vmatpush1.bf16.msra.mxu1 %v3719_v46 }
 0x290   :  { %3722 = vmatprep.subr.bf16.mxu1 %v3721_v47 }
 0x293   :  { %3724 = vmatpush1.bf16.msra.mxu1 %v3723_v52 }
 0x294   :  { %3726 = vmatprep.subr.bf16.mxu1 %v3725_v53 }
 0x297   :  { %3728 = vmatpush1.bf16.msra.mxu1 %v3727_v55 }
 0x29a   :  { %2448 = vmatmul.mubr.f32.vlgmr.msra.gmra.mrb[4].mxu1 %v4029_v44 }
 0x35e   :  { %v2733_v59 = vpop.f32.mrb[4].mxu0 }
 0x35f   :  { %v3979_v60 = vadd.f32 %v2733_v59, %v1299_v57  ;;  %v2735_v61 = vpop.f32.mrb[5].mxu0 }
 0x360   :  { %v3980_v62 = vadd.f32 %v2735_v61, %v1303_v58 }
 0x361   :  { %2746 = vst [vmem:[#allocation8 + $0x40] sm:$0xff] %v3979_v60 }
 0x362   :  { %2747 = vst [vmem:[#allocation8 + $0x48] sm:$0xff] %v3980_v62 }
 0x36d   :  { %v2449_v32 = vpop.f32.mrb[4].mxu1 }
 0x36e   :  { %v3977_v4 = vadd.f32 %v2449_v32, %v1291_v1  ;;  %v2451_v5 = vpop.f32.mrb[5].mxu1 }
 0x36f   :  { %v3978_v37 = vadd.f32 %v2451_v5, %v1295_v30 }
 0x370   :  { %2744 = vst [vmem:[#allocation8 + $0x30] sm:$0xff] %v3977_v4 }
 0x371   :  { %2745 = vst [vmem:[#allocation8 + $0x38] sm:$0xff] %v3978_v37 }
 0x372   :  { %4107 = shalt.err (!%p4104_p0)
}
 0x373   :  { %s4108_s25 = scalar_lea.hbm %s4276_s3, 1280 }
 0x374   :  { %p4109_p1 = scmp.ne.s32.totalorder %s4276_s3, %s4108_s25  ;;  %p4112_p2 = scmp.lt.u32.totalorder %s4108_s25, %s4276_s3 }
 0x376   :  { %p4114_p3 = pnand %p4112_p2, %p4109_p1 }
 0x378   :  { %4117 = shalt.err (!%p4114_p3)
}
 0x379   :  { %2757 = dma.vmem_to_hbm [thread:$0]  %s2755_s21, 1280, %s4276_s3, [#allocation4]  }
 0x37a   :  { %4122 = dma.done.wait [#allocation4], 1280  }
 0x37b   :  { %4123 = vsyncadd [#allocation4], 4294966016 }
 0x37c   :  { %2761 = vsyncpa [#allocation3], 1 }
 0x37d   :  { %2762 = vsyncpa [#allocation6], 1 }
 0x37e   :  { %2763 = vsyncpa [#allocation4], 1 }

</bundles_post_ra>
